<compile_context>
chip_gen: v6e
topology: v6e:2x2x1
jax: 0.10.0
libtpu: 0.0.40
codegen_flags: <defaults>
</compile_context>

<pallas_src>
import functools

import numpy as np

import jax
import jax.numpy as jnp
from jax.experimental import pallas as pl
from jax.experimental.pallas import tpu as pltpu


_VMEM = pl.BlockSpec(memory_space=pltpu.MemorySpace.VMEM)


def _round_up(n, m):
    return ((n + m - 1) // m) * m


# ----------------------------------------------------------------------------
# The single fused decoder kernel.
# Activation layout everywhere: rows = (b, h)  [padded to a multiple of 8],
# columns = (w, c) channels-last.  Padded rows carry finite garbage that is
# annihilated by zero columns of the prep-built scatter matrices.
# ----------------------------------------------------------------------------
def _decoder_kernel(
    z_ref, w1_ref, b1_ref, w2_ref, b2_ref,
    wm1_ref, s1_ref, bias1_ref,
    wm2_ref, s2_ref, bias2_ref,
    gamma_ref, beta_ref,
    wm3_ref, s3_ref, bias3_ref,
    wm4_ref, s4_ref, bias4_ref,
    out_ref,
    act0_ref, a2n_ref,
    *, B, d1, c4, c2, Wo2, eps, layers, bn_rows, bn_count, out_rows):
    f32 = jnp.float32
    bf16 = jnp.bfloat16

    # ---- fc1 + ReLU + fc2 + ReLU (rows >= B are zero-padded inputs) --------
    h1 = jnp.dot(z_ref[...].astype(bf16), w1_ref[...],
                 preferred_element_type=f32)
    h1 = jnp.maximum(h1 + b1_ref[...], 0.0)
    h2 = jnp.dot(h1.astype(bf16), w2_ref[...], preferred_element_type=f32)
    h2 = jnp.maximum(h2 + b2_ref[...], 0.0)

    # ---- (B, d1*d1*c4) [cols ordered (h,w,c)] -> spatial rows (B*d1, d1*c4)
    row_w = d1 * c4
    act0_ref[...] = jnp.zeros(act0_ref.shape, f32)
    for b in range(B):
        for h in range(d1):
            act0_ref[b * d1 + h:b * d1 + h + 1, :] = (
                h2[b:b + 1, h * row_w:(h + 1) * row_w])
    a0 = act0_ref[...]

    # ---- ConvTranspose2d(stride=2) = width matmul + 3 row-scatter matmuls --
    def deconv(act, wm_ref, s_ref, bias_ref, woc, wocp):
        A = jnp.dot(act.astype(bf16), wm_ref[...], preferred_element_type=f32)
        y = jnp.dot(s_ref[0], A[:, 0:woc], preferred_element_type=f32)
        y = y + jnp.dot(s_ref[1], A[:, wocp:wocp + woc],
                        preferred_element_type=f32)
        y = y + jnp.dot(s_ref[2], A[:, 2 * wocp:2 * wocp + woc],
                        preferred_element_type=f32)
        return y + bias_ref[...]

    (woc1, wp1), (woc2, wp2), (woc3, wp3), (woc4, wp4) = layers

    a1 = jnp.maximum(deconv(a0, wm1_ref, s1_ref, bias1_ref, woc1, wp1), 0.0)
    a2 = deconv(a1, wm2_ref, s2_ref, bias2_ref, woc2, wp2)

    # TODO(synk): dropout treated as identity (eval mode).

    # ---- BatchNorm(c2) with batch statistics + ReLU, fully in-kernel -------
    xv = a2[0:bn_rows, :]                              # valid rows only
    s_col = jnp.sum(xv, axis=0, keepdims=True)         # (1, Wo2*c2)
    q_col = jnp.sum(xv * xv, axis=0, keepdims=True)
    s_ch = s_col[:, 0:c2]
    q_ch = q_col[:, 0:c2]
    for w in range(1, Wo2):                            # fold width positions
        s_ch = s_ch + s_col[:, w * c2:(w + 1) * c2]
        q_ch = q_ch + q_col[:, w * c2:(w + 1) * c2]
    inv_n = 1.0 / float(bn_count)
    mean = s_ch * inv_n
    var = q_ch * inv_n - mean * mean                   # biased (train-mode)
    scale = gamma_ref[...] * jax.lax.rsqrt(var + eps)
    shift = beta_ref[...] - mean * scale
    for w in range(Wo2):                               # per-channel affine
        blk = a2[:, w * c2:(w + 1) * c2]
        a2n_ref[:, w * c2:(w + 1) * c2] = jnp.maximum(blk * scale + shift, 0.0)
    a2n = a2n_ref[...]

    a3 = jnp.maximum(deconv(a2n, wm3_ref, s3_ref, bias3_ref, woc3, wp3), 0.0)
    y4 = deconv(a3, wm4_ref, s4_ref, bias4_ref, woc4, wp4)
    out_ref[...] = y4[0:out_rows, :]


# ----------------------------------------------------------------------------
# One-time parameter preparation (hoisted out of the forward).
# ----------------------------------------------------------------------------
def prepare_decoder(params, *, batch_size, kernel_size, deconv1_size, eps=1e-5):
    B = batch_size
    stride = 2
    d1 = deconv1_size

    w1, b1 = params["fc1"]
    w2, b2 = params["fc2"]
    gamma, beta = params["bn"]
    fc = w1.shape[1]
    c4 = params["deconv1"][0].shape[0]
    c2 = gamma.shape[0]

    # fc2 output features permuted (c, h, w) -> (h, w, c): the MLP output then
    # maps straight into the channels-last spatial-row activation layout.
    w2p = (w2.reshape(fc, c4, d1, d1).transpose(0, 2, 3, 1)
             .reshape(fc, d1 * d1 * c4))
    b2p = b2.reshape(c4, d1, d1).transpose(1, 2, 0).reshape(1, d1 * d1 * c4)

    def deconv_prep(wt, bias, h_in, out_pad, in_rows_pad):
        cin, cout, k, _ = wt.shape
        ho = stride * (h_in - 1) + k + out_pad
        woc = ho * cout
        wocp = _round_up(woc, 128)                 # lane-dense column blocks
        # Width-direction Toeplitz weight: (W_in*Cin, K*wocp)
        iw = np.arange(h_in)[:, None, None]
        kw = np.arange(k)[None, :, None]
        ow = np.arange(ho)[None, None, :]
        P = (ow == stride * iw + kw).astype(np.float32)        # (W, K, Wo)
        R = jnp.einsum("wko,ichk->wihoc", jnp.asarray(P), wt)  # W,Ci,K,Wo,Co
        R = R.reshape(h_in * cin, k, woc)
        R = jnp.pad(R, ((0, 0), (0, 0), (0, wocp - woc)))
        wm = R.reshape(h_in * cin, k * wocp).astype(jnp.bfloat16)
        # Height-direction 0/1 scatter matrices, rows padded to multiples of 8.
        rows_pad = _round_up(B * ho, 8)
        S = np.zeros((k, rows_pad, in_rows_pad), np.float32)
        for kh in range(k):
            for b in range(B):
                for i in range(h_in):
                    S[kh, b * ho + stride * i + kh, b * h_in + i] = 1.0
        bias_row = jnp.tile(bias, (ho,)).reshape(1, woc).astype(jnp.float32)
        return (wm, jnp.asarray(S), bias_row), ho, woc, wocp, rows_pad

    r0_pad = _round_up(B * d1, 8)
    (wm1, s1, bias1), ho1, woc1, wp1, r1p = deconv_prep(
        *params["deconv1"], d1, 0, r0_pad)
    (wm2, s2, bias2), ho2, woc2, wp2, r2p = deconv_prep(
        *params["deconv2"], ho1, 0, r1p)
    (wm3, s3, bias3), ho3, woc3, wp3, r3p = deconv_prep(
        *params["deconv3"], ho2, 1, r2p)
    (wm4, s4, bias4), ho4, woc4, wp4, r4p = deconv_prep(
        *params["deconv4"], ho3, 0, r3p)

    arrays = (
        w1.astype(jnp.bfloat16), b1.reshape(1, -1).astype(jnp.float32),
        w2p.astype(jnp.bfloat16), b2p.astype(jnp.float32),
        wm1, s1, bias1,
        wm2, s2, bias2,
        gamma.reshape(1, -1).astype(jnp.float32),
        beta.reshape(1, -1).astype(jnp.float32),
        wm3, s3, bias3,
        wm4, s4, bias4,
    )
    meta = dict(
        B=B, zrows=_round_up(B, 8), d1=d1, c4=c4, c2=c2, Wo2=ho2, eps=eps,
        r0_pad=r0_pad, r2_pad=r2p, woc2=woc2,
        layers=((woc1, wp1), (woc2, wp2), (woc3, wp3), (woc4, wp4)),
        bn_rows=B * ho2, bn_count=B * ho2 * ho2,
        out_rows=B * ho4, Ho4=ho4, Wo4=ho4,
    )
    jax.block_until_ready(arrays)
    return arrays, meta


# ----------------------------------------------------------------------------
# Forward: one tiny concat/pad, ONE pallas_call, one free reshape.
# ----------------------------------------------------------------------------
def decoder_forward(arrays, x, labels, *, meta):
    B = x.shape[0]
    z = jnp.concatenate([x, labels.reshape(-1, 1).astype(x.dtype)], axis=1)
    zp = jnp.pad(z, ((0, meta["zrows"] - B), (0, 0)))

    kernel = functools.partial(
        _decoder_kernel,
        B=B, d1=meta["d1"], c4=meta["c4"], c2=meta["c2"], Wo2=meta["Wo2"],
        eps=meta["eps"], layers=meta["layers"],
        bn_rows=meta["bn_rows"], bn_count=meta["bn_count"],
        out_rows=meta["out_rows"],
    )
    out_flat = pl.pallas_call(
        kernel,
        out_shape=jax.ShapeDtypeStruct((meta["out_rows"], meta["Wo4"]),
                                       jnp.float32),
        in_specs=[_VMEM] * (1 + len(arrays)),
        out_specs=_VMEM,
        scratch_shapes=[
            pltpu.VMEM((meta["r0_pad"], meta["d1"] * meta["c4"]), jnp.float32),
            pltpu.VMEM((meta["r2_pad"], meta["woc2"]), jnp.float32),
        ],
    )(zp, *arrays)
    return out_flat.reshape(B, 1, meta["Ho4"], meta["Wo4"])


# ----------------------------------------------------------------------------
# Deterministic PyTorch-default-style parameter init.
# ----------------------------------------------------------------------------
def init_params(key, latent_dim, kernel_size, deconv1_size, cfg):
    ks = jax.random.split(key, 6)

    def linear_init(k, din, dout):
        kw, kb = jax.random.split(k)
        bound = 1.0 / float(din) ** 0.5
        w = jax.random.uniform(kw, (din, dout), jnp.float32, -bound, bound)
        b = jax.random.uniform(kb, (dout,), jnp.float32, -bound, bound)
        return w, b

    def deconv_init(k, cin, cout):
        kw, kb = jax.random.split(k)
        fan_in = cin * kernel_size * kernel_size
        bound = 1.0 / float(fan_in) ** 0.5
        w = jax.random.uniform(kw, (cin, cout, kernel_size, kernel_size),
                               jnp.float32, -bound, bound)
        b = jax.random.uniform(kb, (cout,), jnp.float32, -bound, bound)
        return w, b

    return {
        "fc1": linear_init(ks[0], latent_dim + 1, cfg["fc_size"]),
        "fc2": linear_init(ks[1], cfg["fc_size"],
                           cfg["c4"] * deconv1_size * deconv1_size),
        "deconv1": deconv_init(ks[2], cfg["c4"], cfg["c3"]),
        "deconv2": deconv_init(ks[3], cfg["c3"], cfg["c2"]),
        "deconv3": deconv_init(ks[4], cfg["c2"], cfg["c1"]),
        "deconv4": deconv_init(ks[5], cfg["c1"], 1),
        "bn": (jnp.ones((cfg["c2"],), jnp.float32),
               jnp.zeros((cfg["c2"],), jnp.float32)),
    }


if __name__ == "__main__":
    latent_dim, kernel_size, deconv1_size = 16, 3, 2
    cfg = dict(c1=8, c2=16, c3=32, c4=64, fc_size=64,
               dropout_p=0.1, activation="relu")

    key = jax.random.PRNGKey(0)
    kp, kx, kl = jax.random.split(key, 3)
    params = init_params(kp, latent_dim, kernel_size, deconv1_size, cfg)

    B = 2
    x = jax.random.normal(kx, (B, latent_dim), jnp.float32)
    labels = jax.random.randint(kl, (B,), 0, 10).astype(jnp.float32)

    arrays, meta = prepare_decoder(params, batch_size=B,
                                   kernel_size=kernel_size,
                                   deconv1_size=deconv1_size)

    fwd = jax.jit(functools.partial(decoder_forward, meta=meta))
    out = fwd(arrays, x, labels)
    jax.block_until_ready(out)

    # Expected spatial chain: 2 -> 5 -> 11 -> 24 -> 49
    assert out.shape == (B, 1, 49, 49), out.shape
    assert bool(jnp.all(jnp.isfinite(out)))
    print("KERNEL_OK")
</pallas_src>

<mosaic_0001>
module attributes {stable_mosaic.version = 11 : i64} {
  func.func @_decoder_kernel(%arg0: memref<8x17xf32, #tpu.memory_space<vmem>>, %arg1: memref<17x64xbf16, #tpu.memory_space<vmem>>, %arg2: memref<1x64xf32, #tpu.memory_space<vmem>>, %arg3: memref<64x256xbf16, #tpu.memory_space<vmem>>, %arg4: memref<1x256xf32, #tpu.memory_space<vmem>>, %arg5: memref<128x768xbf16, #tpu.memory_space<vmem>>, %arg6: memref<3x16x8xf32, #tpu.memory_space<vmem>>, %arg7: memref<1x160xf32, #tpu.memory_space<vmem>>, %arg8: memref<160x768xbf16, #tpu.memory_space<vmem>>, %arg9: memref<3x24x16xf32, #tpu.memory_space<vmem>>, %arg10: memref<1x176xf32, #tpu.memory_space<vmem>>, %arg11: memref<1x16xf32, #tpu.memory_space<vmem>>, %arg12: memref<1x16xf32, #tpu.memory_space<vmem>>, %arg13: memref<176x768xbf16, #tpu.memory_space<vmem>>, %arg14: memref<3x48x24xf32, #tpu.memory_space<vmem>>, %arg15: memref<1x192xf32, #tpu.memory_space<vmem>>, %arg16: memref<192x384xbf16, #tpu.memory_space<vmem>>, %arg17: memref<3x104x48xf32, #tpu.memory_space<vmem>>, %arg18: memref<1x49xf32, #tpu.memory_space<vmem>>, %arg19: memref<98x49xf32, #tpu.memory_space<vmem>>, %arg20: memref<8x128xf32, #tpu.memory_space<vmem>>, %arg21: memref<24x176xf32, #tpu.memory_space<vmem>>) attributes {dimension_semantics = [], scalar_prefetch = 0 : i64, scratch_operands = 2 : i64, tpu.core_type = #tpu.core_type<tc>} {
    %c0 = arith.constant 0 : index
    %c0_0 = arith.constant 0 : index
    %0 = vector.load %arg0[%c0, %c0_0] : memref<8x17xf32, #tpu.memory_space<vmem>>, vector<8x17xf32>
    %1 = arith.truncf %0 : vector<8x17xf32> to vector<8x17xbf16>
    %c0_1 = arith.constant 0 : index
    %c0_2 = arith.constant 0 : index
    %2 = vector.load %arg1[%c0_1, %c0_2] : memref<17x64xbf16, #tpu.memory_space<vmem>>, vector<17x64xbf16>
    %cst = arith.constant dense<0.000000e+00> : vector<8x64xf32>
    %3 = tpu.matmul %1, %2, %cst {dimension_numbers = #tpu.dot_dimension_numbers<[1], [0], [0], [1], [0, 0, 1, 1], [], []>} : vector<8x17xbf16>, vector<17x64xbf16>, vector<8x64xf32> -> vector<8x64xf32>
    %c0_3 = arith.constant 0 : index
    %c0_4 = arith.constant 0 : index
    %4 = vector.load %arg2[%c0_3, %c0_4] : memref<1x64xf32, #tpu.memory_space<vmem>>, vector<1x64xf32>
    %5 = vector.broadcast %4 : vector<1x64xf32> to vector<8x64xf32>
    %6 = arith.addf %3, %5 : vector<8x64xf32>
    %cst_5 = arith.constant 0.000000e+00 : f32
    %7 = vector.broadcast %cst_5 : f32 to vector<8x64xf32>
    %8 = arith.maximumf %6, %7 : vector<8x64xf32>
    %9 = arith.truncf %8 : vector<8x64xf32> to vector<8x64xbf16>
    %c0_6 = arith.constant 0 : index
    %c0_7 = arith.constant 0 : index
    %10 = vector.load %arg3[%c0_6, %c0_7] : memref<64x256xbf16, #tpu.memory_space<vmem>>, vector<64x256xbf16>
    %cst_8 = arith.constant dense<0.000000e+00> : vector<8x256xf32>
    %11 = tpu.matmul %9, %10, %cst_8 {dimension_numbers = #tpu.dot_dimension_numbers<[1], [0], [0], [1], [0, 0, 1, 1], [], []>} : vector<8x64xbf16>, vector<64x256xbf16>, vector<8x256xf32> -> vector<8x256xf32>
    %c0_9 = arith.constant 0 : index
    %c0_10 = arith.constant 0 : index
    %12 = vector.load %arg4[%c0_9, %c0_10] : memref<1x256xf32, #tpu.memory_space<vmem>>, vector<1x256xf32>
    %13 = vector.broadcast %12 : vector<1x256xf32> to vector<8x256xf32>
    %14 = arith.addf %11, %13 : vector<8x256xf32>
    %cst_11 = arith.constant 0.000000e+00 : f32
    %15 = vector.broadcast %cst_11 : f32 to vector<8x256xf32>
    %16 = arith.maximumf %14, %15 : vector<8x256xf32>
    %cst_12 = arith.constant 0.000000e+00 : f32
    %17 = vector.broadcast %cst_12 : f32 to vector<8x128xf32>
    %c0_13 = arith.constant 0 : index
    %c0_14 = arith.constant 0 : index
    %18 = vector.load %arg20[%c0_13, %c0_14] : memref<8x128xf32, #tpu.memory_space<vmem>>, vector<8x128xf32>
    tpu.vector_store %arg20[%c0_13, %c0_14], %17 {strides = array<i32>} : memref<8x128xf32, #tpu.memory_space<vmem>>, vector<8x128xf32>,
    %19 = vector.extract_strided_slice %16 {offsets = [0, 0], sizes = [1, 128], strides = [1, 1]} : vector<8x256xf32> to vector<1x128xf32>
    %c0_15 = arith.constant 0 : index
    %c0_16 = arith.constant 0 : index
    %20 = vector.load %arg20[%c0_15, %c0_16] : memref<8x128xf32, #tpu.memory_space<vmem>>, vector<1x128xf32>
    tpu.vector_store %arg20[%c0_15, %c0_16], %19 {strides = array<i32>} : memref<8x128xf32, #tpu.memory_space<vmem>>, vector<1x128xf32>,
    %21 = vector.extract_strided_slice %16 {offsets = [0, 128], sizes = [1, 128], strides = [1, 1]} : vector<8x256xf32> to vector<1x128xf32>
    %c1 = arith.constant 1 : index
    %c0_17 = arith.constant 0 : index
    %22 = vector.load %arg20[%c1, %c0_17] : memref<8x128xf32, #tpu.memory_space<vmem>>, vector<1x128xf32>
    tpu.vector_store %arg20[%c1, %c0_17], %21 {strides = array<i32>} : memref<8x128xf32, #tpu.memory_space<vmem>>, vector<1x128xf32>,
    %23 = vector.extract_strided_slice %16 {offsets = [1, 0], sizes = [1, 128], strides = [1, 1]} : vector<8x256xf32> to vector<1x128xf32>
    %c2 = arith.constant 2 : index
    %c0_18 = arith.constant 0 : index
    %24 = vector.load %arg20[%c2, %c0_18] : memref<8x128xf32, #tpu.memory_space<vmem>>, vector<1x128xf32>
    tpu.vector_store %arg20[%c2, %c0_18], %23 {strides = array<i32>} : memref<8x128xf32, #tpu.memory_space<vmem>>, vector<1x128xf32>,
    %25 = vector.extract_strided_slice %16 {offsets = [1, 128], sizes = [1, 128], strides = [1, 1]} : vector<8x256xf32> to vector<1x128xf32>
    %c3 = arith.constant 3 : index
    %c0_19 = arith.constant 0 : index
    %26 = vector.load %arg20[%c3, %c0_19] : memref<8x128xf32, #tpu.memory_space<vmem>>, vector<1x128xf32>
    tpu.vector_store %arg20[%c3, %c0_19], %25 {strides = array<i32>} : memref<8x128xf32, #tpu.memory_space<vmem>>, vector<1x128xf32>,
    %c0_20 = arith.constant 0 : index
    %c0_21 = arith.constant 0 : index
    %27 = vector.load %arg20[%c0_20, %c0_21] : memref<8x128xf32, #tpu.memory_space<vmem>>, vector<8x128xf32>
    %28 = arith.truncf %27 : vector<8x128xf32> to vector<8x128xbf16>
    %c0_22 = arith.constant 0 : index
    %c0_23 = arith.constant 0 : index
    %29 = vector.load %arg5[%c0_22, %c0_23] : memref<128x768xbf16, #tpu.memory_space<vmem>>, vector<128x768xbf16>
    %cst_24 = arith.constant dense<0.000000e+00> : vector<8x768xf32>
    %30 = tpu.matmul %28, %29, %cst_24 {dimension_numbers = #tpu.dot_dimension_numbers<[1], [0], [0], [1], [0, 0, 1, 1], [], []>} : vector<8x128xbf16>, vector<128x768xbf16>, vector<8x768xf32> -> vector<8x768xf32>
    %c0_25 = arith.constant 0 : index
    %c0_26 = arith.constant 0 : index
    %c0_27 = arith.constant 0 : index
    %31 = vector.load %arg6[%c0_25, %c0_26, %c0_27] : memref<3x16x8xf32, #tpu.memory_space<vmem>>, vector<1x16x8xf32>
    %32 = vector.shape_cast %31 : vector<1x16x8xf32> to vector<16x8xf32>
    %33 = vector.extract_strided_slice %30 {offsets = [0, 0], sizes = [8, 160], strides = [1, 1]} : vector<8x768xf32> to vector<8x160xf32>
    %cst_28 = arith.constant dense<0.000000e+00> : vector<16x160xf32>
    %34 = tpu.matmul %32, %33, %cst_28 {dimension_numbers = #tpu.dot_dimension_numbers<[1], [0], [0], [1], [0, 0, 1, 1], [], []>} : vector<16x8xf32>, vector<8x160xf32>, vector<16x160xf32> -> vector<16x160xf32>
    %c1_29 = arith.constant 1 : index
    %c0_30 = arith.constant 0 : index
    %c0_31 = arith.constant 0 : index
    %35 = vector.load %arg6[%c1_29, %c0_30, %c0_31] : memref<3x16x8xf32, #tpu.memory_space<vmem>>, vector<1x16x8xf32>
    %36 = vector.shape_cast %35 : vector<1x16x8xf32> to vector<16x8xf32>
    %37 = vector.extract_strided_slice %30 {offsets = [0, 256], sizes = [8, 160], strides = [1, 1]} : vector<8x768xf32> to vector<8x160xf32>
    %cst_32 = arith.constant dense<0.000000e+00> : vector<16x160xf32>
    %38 = tpu.matmul %36, %37, %cst_32 {dimension_numbers = #tpu.dot_dimension_numbers<[1], [0], [0], [1], [0, 0, 1, 1], [], []>} : vector<16x8xf32>, vector<8x160xf32>, vector<16x160xf32> -> vector<16x160xf32>
    %39 = arith.addf %34, %38 : vector<16x160xf32>
    %c2_33 = arith.constant 2 : index
    %c0_34 = arith.constant 0 : index
    %c0_35 = arith.constant 0 : index
    %40 = vector.load %arg6[%c2_33, %c0_34, %c0_35] : memref<3x16x8xf32, #tpu.memory_space<vmem>>, vector<1x16x8xf32>
    %41 = vector.shape_cast %40 : vector<1x16x8xf32> to vector<16x8xf32>
    %42 = vector.extract_strided_slice %30 {offsets = [0, 512], sizes = [8, 160], strides = [1, 1]} : vector<8x768xf32> to vector<8x160xf32>
    %cst_36 = arith.constant dense<0.000000e+00> : vector<16x160xf32>
    %43 = tpu.matmul %41, %42, %cst_36 {dimension_numbers = #tpu.dot_dimension_numbers<[1], [0], [0], [1], [0, 0, 1, 1], [], []>} : vector<16x8xf32>, vector<8x160xf32>, vector<16x160xf32> -> vector<16x160xf32>
    %44 = arith.addf %39, %43 : vector<16x160xf32>
    %c0_37 = arith.constant 0 : index
    %c0_38 = arith.constant 0 : index
    %45 = vector.load %arg7[%c0_37, %c0_38] : memref<1x160xf32, #tpu.memory_space<vmem>>, vector<1x160xf32>
    %46 = vector.broadcast %45 : vector<1x160xf32> to vector<16x160xf32>
    %47 = arith.addf %44, %46 : vector<16x160xf32>
    %cst_39 = arith.constant 0.000000e+00 : f32
    %48 = vector.broadcast %cst_39 : f32 to vector<16x160xf32>
    %49 = arith.maximumf %47, %48 : vector<16x160xf32>
    %50 = arith.truncf %49 : vector<16x160xf32> to vector<16x160xbf16>
    %c0_40 = arith.constant 0 : index
    %c0_41 = arith.constant 0 : index
    %51 = vector.load %arg8[%c0_40, %c0_41] : memref<160x768xbf16, #tpu.memory_space<vmem>>, vector<160x768xbf16>
    %cst_42 = arith.constant dense<0.000000e+00> : vector<16x768xf32>
    %52 = tpu.matmul %50, %51, %cst_42 {dimension_numbers = #tpu.dot_dimension_numbers<[1], [0], [0], [1], [0, 0, 1, 1], [], []>} : vector<16x160xbf16>, vector<160x768xbf16>, vector<16x768xf32> -> vector<16x768xf32>
    %c0_43 = arith.constant 0 : index
    %c0_44 = arith.constant 0 : index
    %c0_45 = arith.constant 0 : index
    %53 = vector.load %arg9[%c0_43, %c0_44, %c0_45] : memref<3x24x16xf32, #tpu.memory_space<vmem>>, vector<1x24x16xf32>
    %54 = vector.shape_cast %53 : vector<1x24x16xf32> to vector<24x16xf32>
    %55 = vector.extract_strided_slice %52 {offsets = [0, 0], sizes = [16, 176], strides = [1, 1]} : vector<16x768xf32> to vector<16x176xf32>
    %cst_46 = arith.constant dense<0.000000e+00> : vector<24x176xf32>
    %56 = tpu.matmul %54, %55, %cst_46 {dimension_numbers = #tpu.dot_dimension_numbers<[1], [0], [0], [1], [0, 0, 1, 1], [], []>} : vector<24x16xf32>, vector<16x176xf32>, vector<24x176xf32> -> vector<24x176xf32>
    %c1_47 = arith.constant 1 : index
    %c0_48 = arith.constant 0 : index
    %c0_49 = arith.constant 0 : index
    %57 = vector.load %arg9[%c1_47, %c0_48, %c0_49] : memref<3x24x16xf32, #tpu.memory_space<vmem>>, vector<1x24x16xf32>
    %58 = vector.shape_cast %57 : vector<1x24x16xf32> to vector<24x16xf32>
    %59 = vector.extract_strided_slice %52 {offsets = [0, 256], sizes = [16, 176], strides = [1, 1]} : vector<16x768xf32> to vector<16x176xf32>
    %cst_50 = arith.constant dense<0.000000e+00> : vector<24x176xf32>
    %60 = tpu.matmul %58, %59, %cst_50 {dimension_numbers = #tpu.dot_dimension_numbers<[1], [0], [0], [1], [0, 0, 1, 1], [], []>} : vector<24x16xf32>, vector<16x176xf32>, vector<24x176xf32> -> vector<24x176xf32>
    %61 = arith.addf %56, %60 : vector<24x176xf32>
    %c2_51 = arith.constant 2 : index
    %c0_52 = arith.constant 0 : index
    %c0_53 = arith.constant 0 : index
    %62 = vector.load %arg9[%c2_51, %c0_52, %c0_53] : memref<3x24x16xf32, #tpu.memory_space<vmem>>, vector<1x24x16xf32>
    %63 = vector.shape_cast %62 : vector<1x24x16xf32> to vector<24x16xf32>
    %64 = vector.extract_strided_slice %52 {offsets = [0, 512], sizes = [16, 176], strides = [1, 1]} : vector<16x768xf32> to vector<16x176xf32>
    %cst_54 = arith.constant dense<0.000000e+00> : vector<24x176xf32>
    %65 = tpu.matmul %63, %64, %cst_54 {dimension_numbers = #tpu.dot_dimension_numbers<[1], [0], [0], [1], [0, 0, 1, 1], [], []>} : vector<24x16xf32>, vector<16x176xf32>, vector<24x176xf32> -> vector<24x176xf32>
    %66 = arith.addf %61, %65 : vector<24x176xf32>
    %c0_55 = arith.constant 0 : index
    %c0_56 = arith.constant 0 : index
    %67 = vector.load %arg10[%c0_55, %c0_56] : memref<1x176xf32, #tpu.memory_space<vmem>>, vector<1x176xf32>
    %68 = vector.broadcast %67 : vector<1x176xf32> to vector<24x176xf32>
    %69 = arith.addf %66, %68 : vector<24x176xf32>
    %70 = vector.extract_strided_slice %69 {offsets = [0, 0], sizes = [22, 176], strides = [1, 1]} : vector<24x176xf32> to vector<22x176xf32>
    %cst_57 = arith.constant dense<0.000000e+00> : vector<176xf32>
    %71 = vector.multi_reduction <add>, %70, %cst_57 [0] : vector<22x176xf32> to vector<176xf32>
    %72 = vector.shape_cast %71 : vector<176xf32> to vector<1x176xf32>
    %73 = arith.mulf %70, %70 : vector<22x176xf32>
    %cst_58 = arith.constant dense<0.000000e+00> : vector<176xf32>
    %74 = vector.multi_reduction <add>, %73, %cst_58 [0] : vector<22x176xf32> to vector<176xf32>
    %75 = vector.shape_cast %74 : vector<176xf32> to vector<1x176xf32>
    %76 = vector.extract_strided_slice %72 {offsets = [0, 0], sizes = [1, 16], strides = [1, 1]} : vector<1x176xf32> to vector<1x16xf32>
    %77 = vector.extract_strided_slice %75 {offsets = [0, 0], sizes = [1, 16], strides = [1, 1]} : vector<1x176xf32> to vector<1x16xf32>
    %78 = vector.extract_strided_slice %72 {offsets = [0, 16], sizes = [1, 16], strides = [1, 1]} : vector<1x176xf32> to vector<1x16xf32>
    %79 = arith.addf %76, %78 : vector<1x16xf32>
    %80 = vector.extract_strided_slice %75 {offsets = [0, 16], sizes = [1, 16], strides = [1, 1]} : vector<1x176xf32> to vector<1x16xf32>
    %81 = arith.addf %77, %80 : vector<1x16xf32>
    %82 = vector.extract_strided_slice %72 {offsets = [0, 32], sizes = [1, 16], strides = [1, 1]} : vector<1x176xf32> to vector<1x16xf32>
    %83 = arith.addf %79, %82 : vector<1x16xf32>
    %84 = vector.extract_strided_slice %75 {offsets = [0, 32], sizes = [1, 16], strides = [1, 1]} : vector<1x176xf32> to vector<1x16xf32>
    %85 = arith.addf %81, %84 : vector<1x16xf32>
    %86 = vector.extract_strided_slice %72 {offsets = [0, 48], sizes = [1, 16], strides = [1, 1]} : vector<1x176xf32> to vector<1x16xf32>
    %87 = arith.addf %83, %86 : vector<1x16xf32>
    %88 = vector.extract_strided_slice %75 {offsets = [0, 48], sizes = [1, 16], strides = [1, 1]} : vector<1x176xf32> to vector<1x16xf32>
    %89 = arith.addf %85, %88 : vector<1x16xf32>
    %90 = vector.extract_strided_slice %72 {offsets = [0, 64], sizes = [1, 16], strides = [1, 1]} : vector<1x176xf32> to vector<1x16xf32>
    %91 = arith.addf %87, %90 : vector<1x16xf32>
    %92 = vector.extract_strided_slice %75 {offsets = [0, 64], sizes = [1, 16], strides = [1, 1]} : vector<1x176xf32> to vector<1x16xf32>
    %93 = arith.addf %89, %92 : vector<1x16xf32>
    %94 = vector.extract_strided_slice %72 {offsets = [0, 80], sizes = [1, 16], strides = [1, 1]} : vector<1x176xf32> to vector<1x16xf32>
    %95 = arith.addf %91, %94 : vector<1x16xf32>
    %96 = vector.extract_strided_slice %75 {offsets = [0, 80], sizes = [1, 16], strides = [1, 1]} : vector<1x176xf32> to vector<1x16xf32>
    %97 = arith.addf %93, %96 : vector<1x16xf32>
    %98 = vector.extract_strided_slice %72 {offsets = [0, 96], sizes = [1, 16], strides = [1, 1]} : vector<1x176xf32> to vector<1x16xf32>
    %99 = arith.addf %95, %98 : vector<1x16xf32>
    %100 = vector.extract_strided_slice %75 {offsets = [0, 96], sizes = [1, 16], strides = [1, 1]} : vector<1x176xf32> to vector<1x16xf32>
    %101 = arith.addf %97, %100 : vector<1x16xf32>
    %102 = vector.extract_strided_slice %72 {offsets = [0, 112], sizes = [1, 16], strides = [1, 1]} : vector<1x176xf32> to vector<1x16xf32>
    %103 = arith.addf %99, %102 : vector<1x16xf32>
    %104 = vector.extract_strided_slice %75 {offsets = [0, 112], sizes = [1, 16], strides = [1, 1]} : vector<1x176xf32> to vector<1x16xf32>
    %105 = arith.addf %101, %104 : vector<1x16xf32>
    %106 = vector.extract_strided_slice %72 {offsets = [0, 128], sizes = [1, 16], strides = [1, 1]} : vector<1x176xf32> to vector<1x16xf32>
    %107 = arith.addf %103, %106 : vector<1x16xf32>
    %108 = vector.extract_strided_slice %75 {offsets = [0, 128], sizes = [1, 16], strides = [1, 1]} : vector<1x176xf32> to vector<1x16xf32>
    %109 = arith.addf %105, %108 : vector<1x16xf32>
    %110 = vector.extract_strided_slice %72 {offsets = [0, 144], sizes = [1, 16], strides = [1, 1]} : vector<1x176xf32> to vector<1x16xf32>
    %111 = arith.addf %107, %110 : vector<1x16xf32>
    %112 = vector.extract_strided_slice %75 {offsets = [0, 144], sizes = [1, 16], strides = [1, 1]} : vector<1x176xf32> to vector<1x16xf32>
    %113 = arith.addf %109, %112 : vector<1x16xf32>
    %114 = vector.extract_strided_slice %72 {offsets = [0, 160], sizes = [1, 16], strides = [1, 1]} : vector<1x176xf32> to vector<1x16xf32>
    %115 = arith.addf %111, %114 : vector<1x16xf32>
    %116 = vector.extract_strided_slice %75 {offsets = [0, 160], sizes = [1, 16], strides = [1, 1]} : vector<1x176xf32> to vector<1x16xf32>
    %117 = arith.addf %113, %116 : vector<1x16xf32>
    %cst_59 = arith.constant 0.00413223123 : f32
    %118 = vector.broadcast %cst_59 : f32 to vector<1x16xf32>
    %119 = arith.mulf %115, %118 : vector<1x16xf32>
    %cst_60 = arith.constant 0.00413223123 : f32
    %120 = vector.broadcast %cst_60 : f32 to vector<1x16xf32>
    %121 = arith.mulf %117, %120 : vector<1x16xf32>
    %122 = arith.mulf %119, %119 : vector<1x16xf32>
    %123 = arith.subf %121, %122 : vector<1x16xf32>
    %c0_61 = arith.constant 0 : index
    %c0_62 = arith.constant 0 : index
    %124 = vector.load %arg11[%c0_61, %c0_62] : memref<1x16xf32, #tpu.memory_space<vmem>>, vector<1x16xf32>
    %cst_63 = arith.constant 9.99999974E-6 : f32
    %125 = vector.broadcast %cst_63 : f32 to vector<1x16xf32>
    %126 = arith.addf %123, %125 : vector<1x16xf32>
    %127 = math.rsqrt %126 : vector<1x16xf32>
    %128 = arith.mulf %124, %127 : vector<1x16xf32>
    %c0_64 = arith.constant 0 : index
    %c0_65 = arith.constant 0 : index
    %129 = vector.load %arg12[%c0_64, %c0_65] : memref<1x16xf32, #tpu.memory_space<vmem>>, vector<1x16xf32>
    %130 = arith.mulf %119, %128 : vector<1x16xf32>
    %131 = arith.subf %129, %130 : vector<1x16xf32>
    %132 = vector.extract_strided_slice %69 {offsets = [0, 0], sizes = [24, 16], strides = [1, 1]} : vector<24x176xf32> to vector<24x16xf32>
    %133 = vector.broadcast %128 : vector<1x16xf32> to vector<24x16xf32>
    %134 = arith.mulf %132, %133 : vector<24x16xf32>
    %135 = vector.broadcast %131 : vector<1x16xf32> to vector<24x16xf32>
    %136 = arith.addf %134, %135 : vector<24x16xf32>
    %cst_66 = arith.constant 0.000000e+00 : f32
    %137 = vector.broadcast %cst_66 : f32 to vector<24x16xf32>
    %138 = arith.maximumf %136, %137 : vector<24x16xf32>
    %c0_67 = arith.constant 0 : index
    %c0_68 = arith.constant 0 : index
    %139 = vector.load %arg21[%c0_67, %c0_68] : memref<24x176xf32, #tpu.memory_space<vmem>>, vector<24x16xf32>
    tpu.vector_store %arg21[%c0_67, %c0_68], %138 {strides = array<i32>} : memref<24x176xf32, #tpu.memory_space<vmem>>, vector<24x16xf32>,
    %140 = vector.extract_strided_slice %69 {offsets = [0, 16], sizes = [24, 16], strides = [1, 1]} : vector<24x176xf32> to vector<24x16xf32>
    %141 = vector.broadcast %128 : vector<1x16xf32> to vector<24x16xf32>
    %142 = arith.mulf %140, %141 : vector<24x16xf32>
    %143 = vector.broadcast %131 : vector<1x16xf32> to vector<24x16xf32>
    %144 = arith.addf %142, %143 : vector<24x16xf32>
    %cst_69 = arith.constant 0.000000e+00 : f32
    %145 = vector.broadcast %cst_69 : f32 to vector<24x16xf32>
    %146 = arith.maximumf %144, %145 : vector<24x16xf32>
    %c0_70 = arith.constant 0 : index
    %c16 = arith.constant 16 : index
    %147 = vector.load %arg21[%c0_70, %c16] : memref<24x176xf32, #tpu.memory_space<vmem>>, vector<24x16xf32>
    tpu.vector_store %arg21[%c0_70, %c16], %146 {strides = array<i32>} : memref<24x176xf32, #tpu.memory_space<vmem>>, vector<24x16xf32>,
    %148 = vector.extract_strided_slice %69 {offsets = [0, 32], sizes = [24, 16], strides = [1, 1]} : vector<24x176xf32> to vector<24x16xf32>
    %149 = vector.broadcast %128 : vector<1x16xf32> to vector<24x16xf32>
    %150 = arith.mulf %148, %149 : vector<24x16xf32>
    %151 = vector.broadcast %131 : vector<1x16xf32> to vector<24x16xf32>
    %152 = arith.addf %150, %151 : vector<24x16xf32>
    %cst_71 = arith.constant 0.000000e+00 : f32
    %153 = vector.broadcast %cst_71 : f32 to vector<24x16xf32>
    %154 = arith.maximumf %152, %153 : vector<24x16xf32>
    %c0_72 = arith.constant 0 : index
    %c32 = arith.constant 32 : index
    %155 = vector.load %arg21[%c0_72, %c32] : memref<24x176xf32, #tpu.memory_space<vmem>>, vector<24x16xf32>
    tpu.vector_store %arg21[%c0_72, %c32], %154 {strides = array<i32>} : memref<24x176xf32, #tpu.memory_space<vmem>>, vector<24x16xf32>,
    %156 = vector.extract_strided_slice %69 {offsets = [0, 48], sizes = [24, 16], strides = [1, 1]} : vector<24x176xf32> to vector<24x16xf32>
    %157 = vector.broadcast %128 : vector<1x16xf32> to vector<24x16xf32>
    %158 = arith.mulf %156, %157 : vector<24x16xf32>
    %159 = vector.broadcast %131 : vector<1x16xf32> to vector<24x16xf32>
    %160 = arith.addf %158, %159 : vector<24x16xf32>
    %cst_73 = arith.constant 0.000000e+00 : f32
    %161 = vector.broadcast %cst_73 : f32 to vector<24x16xf32>
    %162 = arith.maximumf %160, %161 : vector<24x16xf32>
    %c0_74 = arith.constant 0 : index
    %c48 = arith.constant 48 : index
    %163 = vector.load %arg21[%c0_74, %c48] : memref<24x176xf32, #tpu.memory_space<vmem>>, vector<24x16xf32>
    tpu.vector_store %arg21[%c0_74, %c48], %162 {strides = array<i32>} : memref<24x176xf32, #tpu.memory_space<vmem>>, vector<24x16xf32>,
    %164 = vector.extract_strided_slice %69 {offsets = [0, 64], sizes = [24, 16], strides = [1, 1]} : vector<24x176xf32> to vector<24x16xf32>
    %165 = vector.broadcast %128 : vector<1x16xf32> to vector<24x16xf32>
    %166 = arith.mulf %164, %165 : vector<24x16xf32>
    %167 = vector.broadcast %131 : vector<1x16xf32> to vector<24x16xf32>
    %168 = arith.addf %166, %167 : vector<24x16xf32>
    %cst_75 = arith.constant 0.000000e+00 : f32
    %169 = vector.broadcast %cst_75 : f32 to vector<24x16xf32>
    %170 = arith.maximumf %168, %169 : vector<24x16xf32>
    %c0_76 = arith.constant 0 : index
    %c64 = arith.constant 64 : index
    %171 = vector.load %arg21[%c0_76, %c64] : memref<24x176xf32, #tpu.memory_space<vmem>>, vector<24x16xf32>
    tpu.vector_store %arg21[%c0_76, %c64], %170 {strides = array<i32>} : memref<24x176xf32, #tpu.memory_space<vmem>>, vector<24x16xf32>,
    %172 = vector.extract_strided_slice %69 {offsets = [0, 80], sizes = [24, 16], strides = [1, 1]} : vector<24x176xf32> to vector<24x16xf32>
    %173 = vector.broadcast %128 : vector<1x16xf32> to vector<24x16xf32>
    %174 = arith.mulf %172, %173 : vector<24x16xf32>
    %175 = vector.broadcast %131 : vector<1x16xf32> to vector<24x16xf32>
    %176 = arith.addf %174, %175 : vector<24x16xf32>
    %cst_77 = arith.constant 0.000000e+00 : f32
    %177 = vector.broadcast %cst_77 : f32 to vector<24x16xf32>
    %178 = arith.maximumf %176, %177 : vector<24x16xf32>
    %c0_78 = arith.constant 0 : index
    %c80 = arith.constant 80 : index
    %179 = vector.load %arg21[%c0_78, %c80] : memref<24x176xf32, #tpu.memory_space<vmem>>, vector<24x16xf32>
    tpu.vector_store %arg21[%c0_78, %c80], %178 {strides = array<i32>} : memref<24x176xf32, #tpu.memory_space<vmem>>, vector<24x16xf32>,
    %180 = vector.extract_strided_slice %69 {offsets = [0, 96], sizes = [24, 16], strides = [1, 1]} : vector<24x176xf32> to vector<24x16xf32>
    %181 = vector.broadcast %128 : vector<1x16xf32> to vector<24x16xf32>
    %182 = arith.mulf %180, %181 : vector<24x16xf32>
    %183 = vector.broadcast %131 : vector<1x16xf32> to vector<24x16xf32>
    %184 = arith.addf %182, %183 : vector<24x16xf32>
    %cst_79 = arith.constant 0.000000e+00 : f32
    %185 = vector.broadcast %cst_79 : f32 to vector<24x16xf32>
    %186 = arith.maximumf %184, %185 : vector<24x16xf32>
    %c0_80 = arith.constant 0 : index
    %c96 = arith.constant 96 : index
    %187 = vector.load %arg21[%c0_80, %c96] : memref<24x176xf32, #tpu.memory_space<vmem>>, vector<24x16xf32>
    tpu.vector_store %arg21[%c0_80, %c96], %186 {strides = array<i32>} : memref<24x176xf32, #tpu.memory_space<vmem>>, vector<24x16xf32>,
    %188 = vector.extract_strided_slice %69 {offsets = [0, 112], sizes = [24, 16], strides = [1, 1]} : vector<24x176xf32> to vector<24x16xf32>
    %189 = vector.broadcast %128 : vector<1x16xf32> to vector<24x16xf32>
    %190 = arith.mulf %188, %189 : vector<24x16xf32>
    %191 = vector.broadcast %131 : vector<1x16xf32> to vector<24x16xf32>
    %192 = arith.addf %190, %191 : vector<24x16xf32>
    %cst_81 = arith.constant 0.000000e+00 : f32
    %193 = vector.broadcast %cst_81 : f32 to vector<24x16xf32>
    %194 = arith.maximumf %192, %193 : vector<24x16xf32>
    %c0_82 = arith.constant 0 : index
    %c112 = arith.constant 112 : index
    %195 = vector.load %arg21[%c0_82, %c112] : memref<24x176xf32, #tpu.memory_space<vmem>>, vector<24x16xf32>
    tpu.vector_store %arg21[%c0_82, %c112], %194 {strides = array<i32>} : memref<24x176xf32, #tpu.memory_space<vmem>>, vector<24x16xf32>,
    %196 = vector.extract_strided_slice %69 {offsets = [0, 128], sizes = [24, 16], strides = [1, 1]} : vector<24x176xf32> to vector<24x16xf32>
    %197 = vector.broadcast %128 : vector<1x16xf32> to vector<24x16xf32>
    %198 = arith.mulf %196, %197 : vector<24x16xf32>
    %199 = vector.broadcast %131 : vector<1x16xf32> to vector<24x16xf32>
    %200 = arith.addf %198, %199 : vector<24x16xf32>
    %cst_83 = arith.constant 0.000000e+00 : f32
    %201 = vector.broadcast %cst_83 : f32 to vector<24x16xf32>
    %202 = arith.maximumf %200, %201 : vector<24x16xf32>
    %c0_84 = arith.constant 0 : index
    %c128 = arith.constant 128 : index
    %203 = vector.load %arg21[%c0_84, %c128] : memref<24x176xf32, #tpu.memory_space<vmem>>, vector<24x16xf32>
    tpu.vector_store %arg21[%c0_84, %c128], %202 {strides = array<i32>} : memref<24x176xf32, #tpu.memory_space<vmem>>, vector<24x16xf32>,
    %204 = vector.extract_strided_slice %69 {offsets = [0, 144], sizes = [24, 16], strides = [1, 1]} : vector<24x176xf32> to vector<24x16xf32>
    %205 = vector.broadcast %128 : vector<1x16xf32> to vector<24x16xf32>
    %206 = arith.mulf %204, %205 : vector<24x16xf32>
    %207 = vector.broadcast %131 : vector<1x16xf32> to vector<24x16xf32>
    %208 = arith.addf %206, %207 : vector<24x16xf32>
    %cst_85 = arith.constant 0.000000e+00 : f32
    %209 = vector.broadcast %cst_85 : f32 to vector<24x16xf32>
    %210 = arith.maximumf %208, %209 : vector<24x16xf32>
    %c0_86 = arith.constant 0 : index
    %c144 = arith.constant 144 : index
    %211 = vector.load %arg21[%c0_86, %c144] : memref<24x176xf32, #tpu.memory_space<vmem>>, vector<24x16xf32>
    tpu.vector_store %arg21[%c0_86, %c144], %210 {strides = array<i32>} : memref<24x176xf32, #tpu.memory_space<vmem>>, vector<24x16xf32>,
    %212 = vector.extract_strided_slice %69 {offsets = [0, 160], sizes = [24, 16], strides = [1, 1]} : vector<24x176xf32> to vector<24x16xf32>
    %213 = vector.broadcast %128 : vector<1x16xf32> to vector<24x16xf32>
    %214 = arith.mulf %212, %213 : vector<24x16xf32>
    %215 = vector.broadcast %131 : vector<1x16xf32> to vector<24x16xf32>
    %216 = arith.addf %214, %215 : vector<24x16xf32>
    %cst_87 = arith.constant 0.000000e+00 : f32
    %217 = vector.broadcast %cst_87 : f32 to vector<24x16xf32>
    %218 = arith.maximumf %216, %217 : vector<24x16xf32>
    %c0_88 = arith.constant 0 : index
    %c160 = arith.constant 160 : index
    %219 = vector.load %arg21[%c0_88, %c160] : memref<24x176xf32, #tpu.memory_space<vmem>>, vector<24x16xf32>
    tpu.vector_store %arg21[%c0_88, %c160], %218 {strides = array<i32>} : memref<24x176xf32, #tpu.memory_space<vmem>>, vector<24x16xf32>,
    %c0_89 = arith.constant 0 : index
    %c0_90 = arith.constant 0 : index
    %220 = vector.load %arg21[%c0_89, %c0_90] : memref<24x176xf32, #tpu.memory_space<vmem>>, vector<24x176xf32>
    %221 = arith.truncf %220 : vector<24x176xf32> to vector<24x176xbf16>
    %c0_91 = arith.constant 0 : index
    %c0_92 = arith.constant 0 : index
    %222 = vector.load %arg13[%c0_91, %c0_92] : memref<176x768xbf16, #tpu.memory_space<vmem>>, vector<176x768xbf16>
    %cst_93 = arith.constant dense<0.000000e+00> : vector<24x768xf32>
    %223 = tpu.matmul %221, %222, %cst_93 {dimension_numbers = #tpu.dot_dimension_numbers<[1], [0], [0], [1], [0, 0, 1, 1], [], []>} : vector<24x176xbf16>, vector<176x768xbf16>, vector<24x768xf32> -> vector<24x768xf32>
    %c0_94 = arith.constant 0 : index
    %c0_95 = arith.constant 0 : index
    %c0_96 = arith.constant 0 : index
    %224 = vector.load %arg14[%c0_94, %c0_95, %c0_96] : memref<3x48x24xf32, #tpu.memory_space<vmem>>, vector<1x48x24xf32>
    %225 = vector.shape_cast %224 : vector<1x48x24xf32> to vector<48x24xf32>
    %226 = vector.extract_strided_slice %223 {offsets = [0, 0], sizes = [24, 192], strides = [1, 1]} : vector<24x768xf32> to vector<24x192xf32>
    %cst_97 = arith.constant dense<0.000000e+00> : vector<48x192xf32>
    %227 = tpu.matmul %225, %226, %cst_97 {dimension_numbers = #tpu.dot_dimension_numbers<[1], [0], [0], [1], [0, 0, 1, 1], [], []>} : vector<48x24xf32>, vector<24x192xf32>, vector<48x192xf32> -> vector<48x192xf32>
    %c1_98 = arith.constant 1 : index
    %c0_99 = arith.constant 0 : index
    %c0_100 = arith.constant 0 : index
    %228 = vector.load %arg14[%c1_98, %c0_99, %c0_100] : memref<3x48x24xf32, #tpu.memory_space<vmem>>, vector<1x48x24xf32>
    %229 = vector.shape_cast %228 : vector<1x48x24xf32> to vector<48x24xf32>
    %230 = vector.extract_strided_slice %223 {offsets = [0, 256], sizes = [24, 192], strides = [1, 1]} : vector<24x768xf32> to vector<24x192xf32>
    %cst_101 = arith.constant dense<0.000000e+00> : vector<48x192xf32>
    %231 = tpu.matmul %229, %230, %cst_101 {dimension_numbers = #tpu.dot_dimension_numbers<[1], [0], [0], [1], [0, 0, 1, 1], [], []>} : vector<48x24xf32>, vector<24x192xf32>, vector<48x192xf32> -> vector<48x192xf32>
    %232 = arith.addf %227, %231 : vector<48x192xf32>
    %c2_102 = arith.constant 2 : index
    %c0_103 = arith.constant 0 : index
    %c0_104 = arith.constant 0 : index
    %233 = vector.load %arg14[%c2_102, %c0_103, %c0_104] : memref<3x48x24xf32, #tpu.memory_space<vmem>>, vector<1x48x24xf32>
    %234 = vector.shape_cast %233 : vector<1x48x24xf32> to vector<48x24xf32>
    %235 = vector.extract_strided_slice %223 {offsets = [0, 512], sizes = [24, 192], strides = [1, 1]} : vector<24x768xf32> to vector<24x192xf32>
    %cst_105 = arith.constant dense<0.000000e+00> : vector<48x192xf32>
    %236 = tpu.matmul %234, %235, %cst_105 {dimension_numbers = #tpu.dot_dimension_numbers<[1], [0], [0], [1], [0, 0, 1, 1], [], []>} : vector<48x24xf32>, vector<24x192xf32>, vector<48x192xf32> -> vector<48x192xf32>
    %237 = arith.addf %232, %236 : vector<48x192xf32>
    %c0_106 = arith.constant 0 : index
    %c0_107 = arith.constant 0 : index
    %238 = vector.load %arg15[%c0_106, %c0_107] : memref<1x192xf32, #tpu.memory_space<vmem>>, vector<1x192xf32>
    %239 = vector.broadcast %238 : vector<1x192xf32> to vector<48x192xf32>
    %240 = arith.addf %237, %239 : vector<48x192xf32>
    %cst_108 = arith.constant 0.000000e+00 : f32
    %241 = vector.broadcast %cst_108 : f32 to vector<48x192xf32>
    %242 = arith.maximumf %240, %241 : vector<48x192xf32>
    %243 = arith.truncf %242 : vector<48x192xf32> to vector<48x192xbf16>
    %c0_109 = arith.constant 0 : index
    %c0_110 = arith.constant 0 : index
    %244 = vector.load %arg16[%c0_109, %c0_110] : memref<192x384xbf16, #tpu.memory_space<vmem>>, vector<192x384xbf16>
    %cst_111 = arith.constant dense<0.000000e+00> : vector<48x384xf32>
    %245 = tpu.matmul %243, %244, %cst_111 {dimension_numbers = #tpu.dot_dimension_numbers<[1], [0], [0], [1], [0, 0, 1, 1], [], []>} : vector<48x192xbf16>, vector<192x384xbf16>, vector<48x384xf32> -> vector<48x384xf32>
    %c0_112 = arith.constant 0 : index
    %c0_113 = arith.constant 0 : index
    %c0_114 = arith.constant 0 : index
    %246 = vector.load %arg17[%c0_112, %c0_113, %c0_114] : memref<3x104x48xf32, #tpu.memory_space<vmem>>, vector<1x104x48xf32>
    %247 = vector.shape_cast %246 : vector<1x104x48xf32> to vector<104x48xf32>
    %248 = vector.extract_strided_slice %245 {offsets = [0, 0], sizes = [48, 49], strides = [1, 1]} : vector<48x384xf32> to vector<48x49xf32>
    %cst_115 = arith.constant dense<0.000000e+00> : vector<104x49xf32>
    %249 = tpu.matmul %247, %248, %cst_115 {dimension_numbers = #tpu.dot_dimension_numbers<[1], [0], [0], [1], [0, 0, 1, 1], [], []>} : vector<104x48xf32>, vector<48x49xf32>, vector<104x49xf32> -> vector<104x49xf32>
    %c1_116 = arith.constant 1 : index
    %c0_117 = arith.constant 0 : index
    %c0_118 = arith.constant 0 : index
    %250 = vector.load %arg17[%c1_116, %c0_117, %c0_118] : memref<3x104x48xf32, #tpu.memory_space<vmem>>, vector<1x104x48xf32>
    %251 = vector.shape_cast %250 : vector<1x104x48xf32> to vector<104x48xf32>
    %252 = vector.extract_strided_slice %245 {offsets = [0, 128], sizes = [48, 49], strides = [1, 1]} : vector<48x384xf32> to vector<48x49xf32>
    %cst_119 = arith.constant dense<0.000000e+00> : vector<104x49xf32>
    %253 = tpu.matmul %251, %252, %cst_119 {dimension_numbers = #tpu.dot_dimension_numbers<[1], [0], [0], [1], [0, 0, 1, 1], [], []>} : vector<104x48xf32>, vector<48x49xf32>, vector<104x49xf32> -> vector<104x49xf32>
    %254 = arith.addf %249, %253 : vector<104x49xf32>
    %c2_120 = arith.constant 2 : index
    %c0_121 = arith.constant 0 : index
    %c0_122 = arith.constant 0 : index
    %255 = vector.load %arg17[%c2_120, %c0_121, %c0_122] : memref<3x104x48xf32, #tpu.memory_space<vmem>>, vector<1x104x48xf32>
    %256 = vector.shape_cast %255 : vector<1x104x48xf32> to vector<104x48xf32>
    %257 = vector.extract_strided_slice %245 {offsets = [0, 256], sizes = [48, 49], strides = [1, 1]} : vector<48x384xf32> to vector<48x49xf32>
    %cst_123 = arith.constant dense<0.000000e+00> : vector<104x49xf32>
    %258 = tpu.matmul %256, %257, %cst_123 {dimension_numbers = #tpu.dot_dimension_numbers<[1], [0], [0], [1], [0, 0, 1, 1], [], []>} : vector<104x48xf32>, vector<48x49xf32>, vector<104x49xf32> -> vector<104x49xf32>
    %259 = arith.addf %254, %258 : vector<104x49xf32>
    %c0_124 = arith.constant 0 : index
    %c0_125 = arith.constant 0 : index
    %260 = vector.load %arg18[%c0_124, %c0_125] : memref<1x49xf32, #tpu.memory_space<vmem>>, vector<1x49xf32>
    %261 = vector.broadcast %260 : vector<1x49xf32> to vector<104x49xf32>
    %262 = arith.addf %259, %261 : vector<104x49xf32>
    %263 = vector.extract_strided_slice %262 {offsets = [0, 0], sizes = [98, 49], strides = [1, 1]} : vector<104x49xf32> to vector<98x49xf32>
    %c0_126 = arith.constant 0 : index
    %c0_127 = arith.constant 0 : index
    %264 = vector.load %arg19[%c0_126, %c0_127] : memref<98x49xf32, #tpu.memory_space<vmem>>, vector<98x49xf32>
    tpu.vector_store %arg19[%c0_126, %c0_127], %263 {strides = array<i32>} : memref<98x49xf32, #tpu.memory_space<vmem>>, vector<98x49xf32>,
    return
  }
}

</mosaic_0001>

<bundles_post_ra>
// kernel: decoder_forward.1
= control target key start
LH: loop header
LB: loop body
LE: loop exit
PB: predicated region body
PF: predicated region fallthrough
CT: control target
= control target key end

     0   :  { %s6529_s0 = inlined_call_operand.vmem [shape: f32[8,17], index: 0, kind: input, shape index: {}]   ;;  %s6530_s1 = inlined_call_operand.vmem [shape: bf16[17,64], index: 1, kind: input, shape index: {}]   ;;  %s6531_s2 = inlined_call_operand.hbm [shape: f32[1,64], index: 2, kind: input, shape index: {}]   ;;  %s6532_s3 = inlined_call_operand.hbm [shape: bf16[64,256], index: 3, kind: input, shape index: {}]   ;;  %s6533_s4 = inlined_call_operand.vmem [shape: f32[1,256], index: 4, kind: input, shape index: {}]   ;;  %s6534_s5 = inlined_call_operand.hbm [shape: bf16[128,768], index: 5, kind: input, shape index: {}]   ;;  %s6535_s6 = inlined_call_operand.vmem [shape: f32[3,16,8], index: 6, kind: input, shape index: {}]   ;;  %s6536_s7 = inlined_call_operand.vmem [shape: f32[1,160], index: 7, kind: input, shape index: {}]   ;;  %s6537_s8 = inlined_call_operand.hbm [shape: bf16[160,768], index: 8, kind: input, shape index: {}]   ;;  %s6538_s9 = inlined_call_operand.vmem [shape: f32[3,24,16], index: 9, kind: input, shape index: {}]   ;;  %s6539_s10 = inlined_call_operand.hbm [shape: f32[1,176], index: 10, kind: input, shape index: {}]   ;;  %s6540_s11 = inlined_call_operand.hbm [shape: f32[1,16], index: 11, kind: input, shape index: {}]   ;;  %s6541_s12 = inlined_call_operand.hbm [shape: f32[1,16], index: 12, kind: input, shape index: {}]   ;;  %s6542_s13 = inlined_call_operand.vmem [shape: bf16[176,768], index: 13, kind: input, shape index: {}]   ;;  %s6543_s14 = inlined_call_operand.vmem [shape: f32[3,48,24], index: 14, kind: input, shape index: {}]   ;;  %s6544_s15 = inlined_call_operand.hbm [shape: f32[1,192], index: 15, kind: input, shape index: {}]   ;;  %s6545_s16 = inlined_call_operand.vmem [shape: bf16[192,384], index: 16, kind: input, shape index: {}]   ;;  %s6546_s17 = inlined_call_operand.vmem [shape: f32[3,104,48], index: 17, kind: input, shape index: {}]   ;;  %s6547_s18 = inlined_call_operand.hbm [shape: f32[1,49], index: 18, kind: input, shape index: {}]   ;;  %s6548_s19 = inlined_call_operand.vmem [shape: f32[98,49], index: 19, kind: output, shape index: {}]  }
   0x1   :  { %6550 = sst [smem:[#allocation23_spill]] %s6529_s0 }
   0x2   :  { %6551 = sst [smem:[#allocation24_spill]] %s6530_s1 }
   0x3   :  { %6552 = sst [smem:[#allocation25_spill]] %s6531_s2 }
   0x4   :  { %6553 = sst [smem:[#allocation26_spill]] %s6532_s3 }
   0x5   :  { %24 = vsyncpa [#allocation5], 0 }
   0x6   :  { %25 = vsyncpa [#allocation7], 0 }
   0x7   :  { %26 = vsyncpa [#allocation10], 0 }
   0x8   :  { %27 = vsyncpa [#allocation13], 0 }
   0x9   :  { %28 = vsyncpa [#allocation16], 0  ;;  %s5292_s0 = smov [#allocation6]  }
   0xa   :  { %s48_s30 = sshll.u32 %s5292_s0, 4  ;;  %s49_s30 = int_to_ptr.vmem [resolvable:$true] %s48_s30 }
   0xb   :  { %s5110_s20 = scalar_lea.vmem %s49_s30, 1024  ;;  %p5115_p1 = scmp.lt.s32.totalorder %s49_s30, %s49_s30 }
   0xc   :  { %p5111_p0 = scmp.ne.s32.totalorder %s49_s30, %s5110_s20  ;;  %p5116_p2 = scmp.lt.s32.totalorder %s5110_s20, %s5110_s20 }
   0xe   :  { %p5117_p3 = por %p5116_p2, %p5115_p1 }
  0x10   :  { %p5118_p4 = pnand %p5117_p3, %p5111_p0 }
  0x12   :  { %5121 = shalt.err (!%p5118_p4)
}
  0x13   :  { %s5293_s21 = smov 128   ;;  %s5294_s1 = smov 8  }
  0x14   :  { %s6554_s23 = sld [smem:[#allocation26_spill]]  ;;  %s5295_s24 = smov [#allocation9]  }
  0x15   :  { %s78_s25 = sshll.u32 %s5295_s24, 4  ;;  %s5296_s3 = smov [#allocation12]   ;;  %s79_s25 = int_to_ptr.vmem [resolvable:$true] %s78_s25 }
  0x16   :  { %s103_s26 = sshll.u32 %s5296_s3, 4  ;;  %s5130_s27 = scalar_lea.vmem %s79_s25, 7680  ;;  %s104_s26 = int_to_ptr.vmem [resolvable:$true] %s103_s26 }
  0x17   :  { %p5131_p5 = scmp.ne.s32.totalorder %s79_s25, %s5130_s27  ;;  %p5135_p6 = scmp.lt.s32.totalorder %s79_s25, %s79_s25 }
  0x18   :  { %p5136_p7 = scmp.lt.s32.totalorder %s5130_s27, %s5130_s27 }
  0x1a   :  { %54 = dma.hbm_to_vmem [thread:$0]  %s6554_s23, 1024, %s49_s30, [#allocation7], %s5293_s21, %s5293_s21, %s5294_s1  }
  0x1b   :  { %p5137_p8 = por %p5136_p7, %p5135_p6 }
  0x1d   :  { %p5138_p9 = pnand %p5137_p8, %p5131_p5 }
  0x1f   :  { %5141 = shalt.err (!%p5138_p9)
}
  0x20   :  { %s5297_s28 = smov 384   ;;  %s5298_s29 = smov 24  }
  0x21   :  { %84 = dma.hbm_to_vmem [thread:$0]  %s6537_s8, 7680, %s79_s25, [#allocation10], %s5297_s28, %s5297_s28, %s5298_s29  }
  0x22   :  { %s5150_s30 = scalar_lea.vmem %s104_s26, 16  ;;  %s5154_s21 = scalar_lea.vmem %s104_s26, 32 }
  0x23   :  { %p5151_p10 = scmp.ne.s32.totalorder %s104_s26, %s5150_s30  ;;  %p5155_p11 = scmp.lt.s32.totalorder %s104_s26, %s104_s26 }
  0x24   :  { %p5156_p12 = scmp.lt.s32.totalorder %s5154_s21, %s5150_s30 }
  0x26   :  { %p5157_p13 = por %p5156_p12, %p5155_p11 }
  0x28   :  { %p5158_p0 = pnand %p5157_p13, %p5151_p10 }
  0x2a   :  { %5161 = shalt.err (!%p5158_p0)
}
  0x2b   :  { %106 = dma.hbm_to_vmem [thread:$0]  %s6540_s11, 16, %s104_s26, [#allocation13]  }
  0x2c   :  { %s5299_s2 = smov [#allocation15]   ;;  %s5300_s24 = smov [#allocation4]  }
  0x2d   :  { %s127_s23 = sshll.u32 %s5299_s2, 4  ;;  %s39_s3 = sshll.u32 %s5300_s24, 4  ;;  %s128_s23 = int_to_ptr.vmem [resolvable:$true] %s127_s23  ;;  %s40_s3 = int_to_ptr.vmem [resolvable:$true] %s39_s3 }
  0x2e   :  { %s5170_s27 = scalar_lea.vmem %s128_s23, 32  ;;  %p5175_p2 = scmp.lt.s32.totalorder %s128_s23, %s128_s23 }
  0x2f   :  { %p5171_p1 = scmp.ne.s32.totalorder %s128_s23, %s5170_s27  ;;  %p5176_p3 = scmp.lt.s32.totalorder %s5170_s27, %s5170_s27 }
  0x31   :  { %p5177_p4 = por %p5176_p3, %p5175_p2 }
  0x33   :  { %p5178_p5 = pnand %p5177_p4, %p5171_p1 }
  0x35   :  { %5181 = shalt.err (!%p5178_p5)
}
  0x36   :  { %130 = dma.hbm_to_vmem [thread:$0]  %s6544_s15, 32, %s128_s23, [#allocation16]  }
  0x37   :  { %s5190_s0 = scalar_lea.vmem %s40_s3, 16  ;;  %s5194_s11 = scalar_lea.vmem %s40_s3, 32 }
  0x38   :  { %p5191_p6 = scmp.ne.s32.totalorder %s40_s3, %s5190_s0  ;;  %p5195_p7 = scmp.lt.s32.totalorder %s40_s3, %s40_s3 }
  0x39   :  { %p5196_p8 = scmp.lt.s32.totalorder %s5194_s11, %s5190_s0 }
  0x3b   :  { %p5197_p9 = por %p5196_p8, %p5195_p7 }
  0x3d   :  { %p5198_p10 = pnand %p5197_p9, %p5191_p6 }
  0x3f   :  { %5201 = shalt.err (!%p5198_p10)
}
  0x40   :  { %s6555_s30 = sld [smem:[#allocation25_spill]]  ;;  %s5301_s21 = smov [#allocation8]  }
  0x41   :  { %s62_s1 = sshll.u32 %s5301_s21, 4  ;;  %s5302_s22 = smov [#allocation11]   ;;  %s63_s1 = int_to_ptr.vmem [resolvable:$true] %s62_s1 }
  0x42   :  { %s93_s2 = sshll.u32 %s5302_s22, 4  ;;  %s5210_s24 = scalar_lea.vmem %s63_s1, 6144  ;;  %s94_s2 = int_to_ptr.vmem [resolvable:$true] %s93_s2 }
  0x43   :  { %p5211_p11 = scmp.ne.s32.totalorder %s63_s1, %s5210_s24  ;;  %p5215_p12 = scmp.lt.s32.totalorder %s63_s1, %s63_s1 }
  0x44   :  { %p5216_p13 = scmp.lt.s32.totalorder %s5210_s24, %s5210_s24 }
  0x46   :  { %42 = dma.hbm_to_vmem [thread:$0]  %s6555_s30, 16, %s40_s3, [#allocation5]  }
  0x47   :  { %p5217_p0 = por %p5216_p13, %p5215_p12 }
  0x49   :  { %p5218_p1 = pnand %p5217_p0, %p5211_p11 }
  0x4b   :  { %5221 = shalt.err (!%p5218_p1)
}
  0x4c   :  { %68 = dma.hbm_to_vmem [thread:$0]  %s6534_s5, 6144, %s63_s1, [#allocation7], %s5297_s28, %s5297_s28, %s5298_s29  }
  0x4d   :  { %s5230_s3 = scalar_lea.vmem %s94_s2, 32  ;;  %p5235_p3 = scmp.lt.s32.totalorder %s94_s2, %s94_s2 }
  0x4e   :  { %p5231_p2 = scmp.ne.s32.totalorder %s94_s2, %s5230_s3  ;;  %p5236_p4 = scmp.lt.s32.totalorder %s5230_s3, %s5230_s3 }
  0x50   :  { %p5237_p5 = por %p5236_p4, %p5235_p3 }
  0x52   :  { %p5238_p6 = pnand %p5237_p5, %p5231_p2 }
  0x54   :  { %5241 = shalt.err (!%p5238_p6)
}
  0x55   :  { %96 = dma.hbm_to_vmem [thread:$0]  %s6539_s10, 32, %s94_s2, [#allocation10]  }
  0x56   :  { %s5303_s25 = smov [#allocation14]   ;;  %s5304_s11 = smov [#allocation17]  }
  0x57   :  { %s113_s0 = sshll.u32 %s5303_s25, 4  ;;  %s141_s26 = sshll.u32 %s5304_s11, 4  ;;  %s114_s0 = int_to_ptr.vmem [resolvable:$true] %s113_s0  ;;  %s142_s26 = int_to_ptr.vmem [resolvable:$true] %s141_s26 }
  0x58   :  { %s5250_s20 = scalar_lea.vmem %s114_s0, 16  ;;  %s5254_s5 = scalar_lea.vmem %s114_s0, 32 }
  0x59   :  { %p5251_p7 = scmp.ne.s32.totalorder %s114_s0, %s5250_s20  ;;  %p5255_p8 = scmp.lt.s32.totalorder %s114_s0, %s114_s0 }
  0x5a   :  { %p5256_p9 = scmp.lt.s32.totalorder %s5254_s5, %s5250_s20 }
  0x5c   :  { %p5257_p10 = por %p5256_p9, %p5255_p8 }
  0x5e   :  { %p5258_p11 = pnand %p5257_p10, %p5251_p7 }
  0x60   :  { %5261 = shalt.err (!%p5258_p11)
}
  0x61   :  { %116 = dma.hbm_to_vmem [thread:$0]  %s6541_s12, 16, %s114_s0, [#allocation13]  }
  0x62   :  { %s5270_s30 = scalar_lea.vmem %s142_s26, 16  ;;  %s5274_s10 = scalar_lea.vmem %s142_s26, 32 }
  0x63   :  { %p5271_p12 = scmp.ne.s32.totalorder %s142_s26, %s5270_s30  ;;  %p5275_p13 = scmp.lt.s32.totalorder %s142_s26, %s142_s26 }
  0x64   :  { %p5276_p0 = scmp.lt.s32.totalorder %s5274_s10, %s5270_s30 }
  0x66   :  { %p5277_p1 = por %p5276_p0, %p5275_p13 }
  0x68   :  { %p5278_p2 = pnand %p5277_p1, %p5271_p12 }
  0x6a   :  { %5281 = shalt.err (!%p5278_p2)
}
  0x6b   :  { %144 = dma.hbm_to_vmem [thread:$0]  %s6547_s18, 16, %s142_s26, [#allocation16]  }
  0x6c   :  { %5282 = dma.done.wait [#allocation5], 16  }
  0x6d   :  { %5283 = vsyncadd [#allocation5], 4294967280 }
  0x6e   :  { %5284 = dma.done.wait [#allocation7], 7168  }
  0x6f   :  { %5285 = vsyncadd [#allocation7], 4294960128 }
  0x70   :  { %5286 = dma.done.wait [#allocation10], 7712  }
  0x71   :  { %5287 = vsyncadd [#allocation10], 4294959584 }
  0x72   :  { %5288 = dma.done.wait [#allocation13], 32  }
  0x73   :  { %5289 = vsyncadd [#allocation13], 4294967264 }
  0x74   :  { %5290 = dma.done.wait [#allocation16], 48  }
  0x75   :  { %5291 = vsyncadd [#allocation16], 4294967248  ;;  %v5305_v0 = vmov 0.0   ;;  %vm5306_vm0 = vmmov 0   ;;  %v5307_v1 = vmov 0   ;;  %vm198_vm1 = vcmask 1040384  }
  0x76   :  { %4581 = vmatprep.subr.bf16.mxu0 %v5305_v0  ;;  %353 = vst [vmem:[#allocation2] sm:$0xff] %v5305_v0  ;;  %4585 = vmatprep.mubr.msk.bf16.mxu0 %vm5306_vm0, %v5305_v0  ;;  %v200_v2 = vsel %vm198_vm1, 65535, %v5307_v1  ;;  %s6556_s22 = sld [smem:[#allocation24_spill]]  ;;  %v4779_v6 = vld [vmem:[#allocation6 + $0x34] ss:$8 sps:$4 sm:$0xff]   ;;  %vm194_vm2 = vcmask 138240   ;;  %v256_v57 = vlaneseq }
  0x77   :  { %342 = vmatprep.mubr.bf16.mxu1 %v5307_v1  ;;  %v4781_v7 = vld [vmem:[#allocation6 + $0x30] ss:$8 sps:$4 sm:$0xff]   ;;  %s6557_s3 = sld [smem:[#allocation23_spill]]  ;;  %318 = vmatprep.subr.bf16.mxu1 %v4779_v6  ;;  %v4782_v9 = vld [vmem:[#allocation6 + $0x24] ss:$8 sps:$4 sm:$0xff]   ;;  %vm306_vm3 = vcmask 523264  }
  0x78   :  { %319 = vmatpush1.bf16.msra.mxu1 %v4781_v7  ;;  %v4784_v10 = vld [vmem:[#allocation6 + $0x20] ss:$8 sps:$4 sm:$0xff]   ;;  %v4785_v11 = vld [vmem:[#allocation6 + $0x14] ss:$8 sps:$4 sm:$0xff]   ;;  %v4787_v13 = vld [vmem:[#allocation6 + $0x10] ss:$8 sps:$4 sm:$0xff]  }
  0x79   :  { %320 = vmatprep.subr.bf16.mxu1 %v4782_v9  ;;  %v4788_v14 = vld [vmem:[#allocation6 + $0x4] ss:$8 sps:$4 sm:$0xff]   ;;  %v4790_v15 = vld [vmem:[#allocation6] ss:$8 sps:$4 sm:$0xff]   ;;  %v4796_v18 = vld [vmem:[#allocation8 + $0x15c] ss:$24 sps:$4 sm:$0xff]  }
  0x7a   :  { %v4791_v16 = vld [vmem:[#allocation8 + $0x150] ss:$24 sps:$4 sm:$0xff]   ;;  %v4793_v17 = vld [vmem:[#allocation8 + $0x154] ss:$24 sps:$4 sm:$0xff]   ;;  %v4799_v19 = vld [vmem:[#allocation8 + $0x124] ss:$24 sps:$4 sm:$0xff]  }
  0x7b   :  { %v4797_v20 = vld [vmem:[#allocation8 + $0x120] ss:$24 sps:$4 sm:$0xff]   ;;  %v4805_v21 = vld [vmem:[#allocation8 + $0xf4] ss:$24 sps:$4 sm:$0xff]   ;;  %v4803_v22 = vld [vmem:[#allocation8 + $0xf0] ss:$24 sps:$4 sm:$0xff]  }
  0x7c   :  { %v4777_v3 = vld [vmem:[%s6556_s22 + $0x8] ss:$0 sps:$4 sm:$0x11]   ;;  %v4778_v5 = vld [vmem:[%s6556_s22] sm:$0xff]   ;;  %321 = vmatpush1.bf16.msra.mxu1 %v4784_v10  ;;  %v4809_v24 = vld [vmem:[#allocation8 + $0xc0] ss:$24 sps:$4 sm:$0xff]  }
  0x7d   :  { %v202_v4 = vand.u32 %v4777_v3, %v200_v2  ;;  %v173_v8 = vld [vmem:[%s6557_s3] sm:$0xff]  ;;  %322 = vmatprep.subr.bf16.mxu1 %v4785_v11  ;;  %v4162_v25 = vld [vmem:[#allocation4] ss:$0 sm:$0xff]  ;;  %v4794_v31 = vld [vmem:[#allocation8 + $0x158] ss:$24 sps:$4 sm:$0xff]   ;;  %v257_v58 = vshrl.u32 %v256_v57, 7 }
  0x7e   :  { %v174_v12 = vpack.c.bf16 %v173_v8, %v173_v8  ;;  %v4811_v23 = vld [vmem:[#allocation8 + $0xc4] ss:$24 sps:$4 sm:$0xff]   ;;  %v4800_v35 = vld [vmem:[#allocation8 + $0x128] ss:$24 sps:$4 sm:$0xff]   ;;  %v4806_v37 = vld [vmem:[#allocation8 + $0xf8] ss:$24 sps:$4 sm:$0xff]  }
  0x7f   :  { %4582 = vmatpush3.bf16.msra.mxu0 %v202_v4  ;;  %v4802_v33 = vld [vmem:[#allocation8 + $0x12c] ss:$24 sps:$4 sm:$0xff]   ;;  %v4808_v36 = vld [vmem:[#allocation8 + $0xfc] ss:$24 sps:$4 sm:$0xff]   ;;  %v4812_v39 = vld [vmem:[#allocation8 + $0xc8] ss:$24 sps:$4 sm:$0xff]  }
  0x80   :  { %4583 = vmatprep.subr.bf16.mxu0 %v5305_v0  ;;  %323 = vmatpush1.bf16.msra.mxu1 %v4787_v13  ;;  %v4814_v38 = vld [vmem:[#allocation8 + $0xcc] ss:$24 sps:$4 sm:$0xff]   ;;  %v4815_v41 = vld [vmem:[#allocation8 + $0x90] ss:$24 sps:$4 sm:$0xff]   ;;  %v4820_v42 = vld [vmem:[#allocation8 + $0x9c] ss:$24 sps:$4 sm:$0xff]  }
  0x81   :  { %324 = vmatprep.subr.bf16.mxu1 %v4788_v14  ;;  %v4817_v40 = vld [vmem:[#allocation8 + $0x94] ss:$24 sps:$4 sm:$0xff]   ;;  %v4818_v43 = vld [vmem:[#allocation8 + $0x98] ss:$24 sps:$4 sm:$0xff]   ;;  %v4823_v44 = vld [vmem:[#allocation8 + $0x64] ss:$24 sps:$4 sm:$0xff]  }
  0x82   :  { %v4821_v45 = vld [vmem:[#allocation8 + $0x60] ss:$24 sps:$4 sm:$0xff]   ;;  %v4826_v46 = vld [vmem:[#allocation8 + $0x6c] ss:$24 sps:$4 sm:$0xff]   ;;  %v4827_v49 = vld [vmem:[#allocation8 + $0x30] ss:$24 sps:$4 sm:$0xff]  }
  0x83   :  { %4584 = vmatpush3.bf16.msra.mxu0 %v4778_v5  ;;  %v4824_v47 = vld [vmem:[#allocation8 + $0x68] ss:$24 sps:$4 sm:$0xff]   ;;  %v4829_v48 = vld [vmem:[#allocation8 + $0x34] ss:$24 sps:$4 sm:$0xff]   ;;  %v4830_v50 = vld [vmem:[#allocation8 + $0x38] ss:$24 sps:$4 sm:$0xff]  }
  0x84   :  { %325 = vmatpush1.bf16.msra.mxu1 %v4790_v15  ;;  %648 = vmatprep.subr.bf16.mxu0 %v4793_v17  ;;  %v4832_v51 = vld [vmem:[#allocation8 + $0x3c] ss:$24 sps:$4 sm:$0xff]   ;;  %v4833_v53 = vld [vmem:[#allocation8] ss:$24 sps:$4 sm:$0xff]   ;;  %v4838_v54 = vld [vmem:[#allocation8 + $0xc] ss:$24 sps:$4 sm:$0xff]  }
  0x85   :  { %689 = vmatprep.subr.bf16.mxu1 %v4796_v18  ;;  %v4835_v52 = vld [vmem:[#allocation8 + $0x4] ss:$24 sps:$4 sm:$0xff]   ;;  %v4836_v56 = vld [vmem:[#allocation8 + $0x8] ss:$24 sps:$4 sm:$0xff]   ;;  %v5467_v59 = vsub.s32 0, %v257_v58  ;;  %v5472_v61 = vsub.s32 1, %v257_v58 }
  0x86   :  { %4586 = vmatmul.mubr.msk.bf16.vlgmr.msra.gmra.mxu0 %vm194_vm2, %v174_v12  ;;  %v4841_v55 = vld [vmem:[#allocation8 + $0x164] ss:$24 sps:$4 sm:$0xff]   ;;  %v4839_v10 = vld [vmem:[#allocation8 + $0x160] ss:$24 sps:$4 sm:$0xff]   ;;  %v4844_v13 = vld [vmem:[#allocation8 + $0x134] ss:$24 sps:$4 sm:$0xff]  }
  0x87   :  { %680 = vmatprep.mubr.bf16.mxu0 %v5307_v1  ;;  %649 = vmatpush1.bf16.msra.mxu0 %v4791_v16  ;;  %v254_v60 = vld [vmem:[%s6533_s4] sm:$0x3]  ;;  %v4842_v14 = vld [vmem:[#allocation8 + $0x130] ss:$24 sps:$4 sm:$0xff]   ;;  %v4845_v16 = vld [vmem:[#allocation8 + $0x100] ss:$24 sps:$4 sm:$0xff]  }
  0x88   :  { %650 = vmatprep.subr.bf16.mxu0 %v4799_v19  ;;  %v259_v62 = vrot.slane %v254_v60, %v5467_v59  ;;  %v263_v63 = vrot.slane %v254_v60, %v5472_v61  ;;  %v4847_v15 = vld [vmem:[#allocation8 + $0x104] ss:$24 sps:$4 sm:$0xff]   ;;  %v4850_v17 = vld [vmem:[#allocation8 + $0xd4] ss:$24 sps:$4 sm:$0xff]   ;;  %v4848_v18 = vld [vmem:[#allocation8 + $0xd0] ss:$24 sps:$4 sm:$0xff]  }
  0x89   :  { %v4853_v19 = vld [vmem:[#allocation8 + $0xa4] ss:$24 sps:$4 sm:$0xff]   ;;  %vm776_vm4 = vcmask 64512   ;;  %v4881_v57 = vld [vmem:[#allocation9 + $0xc0] ss:$24 sps:$4 sm:$0xff]   ;;  %vm1415_vm5 = vcmask 261120  }
  0x8a   :  { %v4883_v58 = vld [vmem:[#allocation9 + $0xc4] ss:$24 sps:$4 sm:$0xff]   ;;  %v4884_v60 = vld [vmem:[#allocation9 + $0xc8] ss:$24 sps:$4 sm:$0xff]   ;;  %vm1555_vm6 = vcmask 130048   ;;  %vm1861_vm7 = vcmask 1045504  }
  0x8b   :  { %651 = vmatpush1.bf16.msra.mxu0 %v4797_v20  ;;  %v4851_v20 = vld [vmem:[#allocation8 + $0xa0] ss:$24 sps:$4 sm:$0xff]   ;;  %vm1870_vm8 = vcmask 392192   ;;  %vm1874_vm9 = vcmask 390144   ;;  %s5309_s28 = smov 112   ;;  %s5310_s29 = smov 80  }
  0x8c   :  { %652 = vmatprep.subr.bf16.mxu0 %v4805_v21  ;;  %v4856_v21 = vld [vmem:[#allocation8 + $0x74] ss:$24 sps:$4 sm:$0xff]   ;;  %s5311_s30 = smov 64   ;;  %s5312_s10 = smov 48   ;;  %vm2037_vm10 = vcmask 261248   ;;  %vm2056_vm11 = vcmask 392448  }
  0x8d   :  { %s5313_s21 = smov 32   ;;  %vm2075_vm12 = vcmask 523648   ;;  %vm2094_vm13 = vcmask 654848   ;;  %vm2113_vm14 = vcmask 786048   ;;  %vm2132_vm15 = vcmask 917248  }
  0x8e   :  { %vm2151_vm1 = vcmask 1048448   ;;  %vm2769_vm2 = vcmask 195584  }
  0x8f   :  { %653 = vmatpush1.bf16.msra.mxu0 %v4803_v22  ;;  %v4854_v22 = vld [vmem:[#allocation8 + $0x70] ss:$24 sps:$4 sm:$0xff]  }
  0x90   :  { %654 = vmatprep.subr.bf16.mxu0 %v4811_v23  ;;  %v4859_v23 = vld [vmem:[#allocation8 + $0x44] ss:$24 sps:$4 sm:$0xff]  }
  0x93   :  { %655 = vmatpush1.bf16.msra.mxu0 %v4809_v24  ;;  %v4857_v24 = vld [vmem:[#allocation8 + $0x40] ss:$24 sps:$4 sm:$0xff]  }
  0x94   :  { %656 = vmatprep.subr.bf16.mxu0 %v4817_v40 }
  0x97   :  { %657 = vmatpush1.bf16.msra.mxu0 %v4815_v41  ;;  %v4229_v41 = vld [vmem:[%s6535_s6 + $0x20] sm:$0xff] }
  0x98   :  { %658 = vmatprep.subr.bf16.mxu0 %v4823_v44  ;;  %v4230_v44 = vld [vmem:[%s6535_s6 + $0x28] sm:$0xff] }
  0x9b   :  { %659 = vmatpush1.bf16.msra.mxu0 %v4821_v45  ;;  %v4863_v45 = vld [vmem:[#allocation9 + $0x150] ss:$24 sps:$4 sm:$0xff]  }
  0x9c   :  { %660 = vmatprep.subr.bf16.mxu0 %v4829_v48  ;;  %v4868_v48 = vld [vmem:[#allocation9 + $0x15c] ss:$24 sps:$4 sm:$0xff]  }
  0x9f   :  { %661 = vmatpush1.bf16.msra.mxu0 %v4827_v49  ;;  %v4869_v49 = vld [vmem:[#allocation9 + $0x120] ss:$24 sps:$4 sm:$0xff]  }
  0xa0   :  { %662 = vmatprep.subr.bf16.mxu0 %v4835_v52  ;;  %v4874_v52 = vld [vmem:[#allocation9 + $0x12c] ss:$24 sps:$4 sm:$0xff]  }
  0xa3   :  { %663 = vmatpush1.bf16.msra.mxu0 %v4833_v53  ;;  %v4875_v53 = vld [vmem:[#allocation9 + $0xf0] ss:$24 sps:$4 sm:$0xff]  }
  0xa4   :  { %730 = vmatprep.subr.bf16.mxu0 %v4841_v55  ;;  %v4878_v55 = vld [vmem:[#allocation9 + $0xf8] ss:$24 sps:$4 sm:$0xff]  }
 0x146   :  { %v238_v26 = vpop.f32.mrf.mxu0 }
 0x147   :  { %v239_v27 = vadd.f32 %v4162_v25, %v238_v26  ;;  %v4862_v25 = vld [vmem:[#allocation8 + $0x14] ss:$24 sps:$4 sm:$0xff]   ;;  %v4860_v26 = vld [vmem:[#allocation8 + $0x10] ss:$24 sps:$4 sm:$0xff]  }
 0x148   :  { %v4587_v28 = vpop.f32.mrf.mxu0 }
 0x149   :  { %v244_v29 = vmax.f32 %v239_v27, 0.0 }
 0x14a   :  { %v241_v30 = vpop.f32.mrf.mxu0 }
 0x14b   :  { %v245_v32 = vpack.c.bf16 %v244_v29, %v244_v29 }
 0x14c   :  { %v4588_v34 = vpop.f32.mrf.mxu0 }
 0x14d   :  { %4174 = vmatmul.mubr.msk.bf16.vlgmr.msra.gmra.mxu1 %vm306_vm3, %v245_v32 }
 0x14e   :  { %690 = vmatpush1.bf16.msra.mxu1 %v4794_v31  ;;  %721 = vmatprep.mubr.bf16.mxu1 %v5307_v1  ;;  %v4223_v31 = vld [vmem:[%s6535_s6 + $0x10] sm:$0xff] }
 0x14f   :  { %691 = vmatprep.subr.bf16.mxu1 %v4802_v33 }
 0x152   :  { %692 = vmatpush1.bf16.msra.mxu1 %v4800_v35 }
 0x153   :  { %693 = vmatprep.subr.bf16.mxu1 %v4808_v36  ;;  %v4224_v36 = vld [vmem:[%s6535_s6 + $0x18] sm:$0xff] }
 0x156   :  { %694 = vmatpush1.bf16.msra.mxu1 %v4806_v37  ;;  %v771_v37 = vld [vmem:[%s6535_s6] sm:$0xff] }
 0x157   :  { %695 = vmatprep.subr.bf16.mxu1 %v4814_v38  ;;  %v772_v38 = vld [vmem:[%s6535_s6 + $0x8] sm:$0xff]  ;;  %s5314_s6 = smov 16  }
 0x15a   :  { %696 = vmatpush1.bf16.msra.mxu1 %v4812_v39 }
 0x15b   :  { %697 = vmatprep.subr.bf16.mxu1 %v4820_v42 }
 0x15e   :  { %698 = vmatpush1.bf16.msra.mxu1 %v4818_v43 }
 0x15f   :  { %699 = vmatprep.subr.bf16.mxu1 %v4826_v46  ;;  %v4865_v46 = vld [vmem:[#allocation9 + $0x154] ss:$24 sps:$4 sm:$0xff]  }
 0x162   :  { %700 = vmatpush1.bf16.msra.mxu1 %v4824_v47  ;;  %v4866_v47 = vld [vmem:[#allocation9 + $0x158] ss:$24 sps:$4 sm:$0xff]  }
 0x163   :  { %701 = vmatprep.subr.bf16.mxu1 %v4832_v51  ;;  %v4872_v51 = vld [vmem:[#allocation9 + $0x128] ss:$24 sps:$4 sm:$0xff]  }
 0x166   :  { %702 = vmatpush1.bf16.msra.mxu1 %v4830_v50  ;;  %v4871_v50 = vld [vmem:[#allocation9 + $0x124] ss:$24 sps:$4 sm:$0xff]  }
 0x167   :  { %703 = vmatprep.subr.bf16.mxu1 %v4838_v54  ;;  %v4877_v54 = vld [vmem:[#allocation9 + $0xf4] ss:$24 sps:$4 sm:$0xff]  }
 0x16a   :  { %704 = vmatpush1.bf16.msra.mxu1 %v4836_v56  ;;  %v4880_v56 = vld [vmem:[#allocation9 + $0xfc] ss:$24 sps:$4 sm:$0xff]  }
 0x20d   :  { %v344_v2 = vpop.f32.mrf.mxu1 }
 0x20e   :  { %v345_v3 = vadd.f32 %v344_v2, %v259_v62  ;;  %v4886_v62 = vld [vmem:[#allocation9 + $0xcc] ss:$24 sps:$4 sm:$0xff]  }
 0x20f   :  { %v346_v4 = vpop.f32.mrf.mxu1  ;;  %v4889_v2 = vld [vmem:[#allocation9 + $0x94] ss:$24 sps:$4 sm:$0xff]  }
 0x210   :  { %v351_v5 = vmax.f32 %v345_v3, 0.0  ;;  %v347_v6 = vadd.f32 %v346_v4, %v263_v63  ;;  %v4887_v63 = vld [vmem:[#allocation9 + $0x90] ss:$24 sps:$4 sm:$0xff]   ;;  %v4892_v3 = vld [vmem:[#allocation9 + $0x9c] ss:$24 sps:$4 sm:$0xff]  }
 0x211   :  { %v348_v7 = vpop.f32.mrf.mxu1  ;;  %v4895_v4 = vld [vmem:[#allocation9 + $0x64] ss:$24 sps:$4 sm:$0xff]  }
 0x212   :  { %354 = vst [vmem:[#allocation2] sm:$0x1] %v351_v5  ;;  %356 = vst [vmem:[#allocation2 + $0x1] sm:$0x2] %v351_v5  ;;  %v352_v8 = vmax.f32 %v347_v6, 0.0 }
 0x213   :  { %v349_v9 = vpop.f32.mrf.mxu1  ;;  %v4890_v5 = vld [vmem:[#allocation9 + $0x98] ss:$24 sps:$4 sm:$0xff]   ;;  %v4898_v6 = vld [vmem:[#allocation9 + $0x6c] ss:$24 sps:$4 sm:$0xff]  }
 0x214   :  { %355 = vst [vmem:[#allocation2 + $0x1] sm:$0x1] %v352_v8  ;;  %357 = vst [vmem:[#allocation2 + $0x2] sm:$0x2] %v352_v8  ;;  %v4893_v7 = vld [vmem:[#allocation9 + $0x60] ss:$24 sps:$4 sm:$0xff]  }
 0x215   :  { %v4901_v8 = vld [vmem:[#allocation9 + $0x34] ss:$24 sps:$4 sm:$0xff]   ;;  %v4896_v9 = vld [vmem:[#allocation9 + $0x68] ss:$24 sps:$4 sm:$0xff]  }
 0x21b   :  { %v358_v11 = vld [vmem:[#allocation2] sm:$0xff] }
 0x21c   :  { %v359_v12 = vpack.c.bf16 %v358_v11, %v358_v11  ;;  %v4904_v11 = vld [vmem:[#allocation9 + $0x3c] ss:$24 sps:$4 sm:$0xff]  }
 0x21e   :  { %681 = vmatmul.mubr.bf16.vlgmr.msra.gmra.mxu0 %v359_v12  ;;  %722 = vmatmul.mubr.bf16.vlgmr.msra.gmra.mxu1 %v359_v12 }
 0x21f   :  { %731 = vmatpush1.bf16.msra.mxu0 %v4839_v10  ;;  %762 = vmatprep.mubr.bf16.mxu0 %v5307_v1  ;;  %v4899_v10 = vld [vmem:[#allocation9 + $0x30] ss:$24 sps:$4 sm:$0xff]  }
 0x220   :  { %732 = vmatprep.subr.bf16.mxu0 %v4844_v13  ;;  %847 = vmatprep.mubr.f32.mxu1 %v5305_v0  ;;  %v4907_v13 = vld [vmem:[#allocation9 + $0x4] ss:$24 sps:$4 sm:$0xff]  }
 0x223   :  { %733 = vmatpush1.bf16.msra.mxu0 %v4842_v14  ;;  %v4905_v14 = vld [vmem:[#allocation9] ss:$24 sps:$4 sm:$0xff]  }
 0x224   :  { %734 = vmatprep.subr.bf16.mxu0 %v4847_v15  ;;  %v4910_v15 = vld [vmem:[#allocation9 + $0xc] ss:$24 sps:$4 sm:$0xff]  }
 0x227   :  { %735 = vmatpush1.bf16.msra.mxu0 %v4845_v16  ;;  %v4908_v16 = vld [vmem:[#allocation9 + $0x8] ss:$24 sps:$4 sm:$0xff]  }
 0x228   :  { %736 = vmatprep.subr.bf16.mxu0 %v4850_v17  ;;  %v4913_v17 = vld [vmem:[#allocation9 + $0x1b4] ss:$24 sps:$4 sm:$0xff]  }
 0x22b   :  { %737 = vmatpush1.bf16.msra.mxu0 %v4848_v18  ;;  %v4911_v18 = vld [vmem:[#allocation9 + $0x1b0] ss:$24 sps:$4 sm:$0xff]  }
 0x22c   :  { %738 = vmatprep.subr.bf16.mxu0 %v4853_v19  ;;  %v4916_v19 = vld [vmem:[#allocation9 + $0x1bc] ss:$24 sps:$4 sm:$0xff]  }
 0x22f   :  { %739 = vmatpush1.bf16.msra.mxu0 %v4851_v20  ;;  %v4914_v20 = vld [vmem:[#allocation9 + $0x1b8] ss:$24 sps:$4 sm:$0xff]  }
 0x230   :  { %740 = vmatprep.subr.bf16.mxu0 %v4856_v21  ;;  %v4919_v21 = vld [vmem:[#allocation9 + $0x184] ss:$24 sps:$4 sm:$0xff]  }
 0x233   :  { %741 = vmatpush1.bf16.msra.mxu0 %v4854_v22  ;;  %v4917_v22 = vld [vmem:[#allocation9 + $0x180] ss:$24 sps:$4 sm:$0xff]  }
 0x234   :  { %742 = vmatprep.subr.bf16.mxu0 %v4859_v23  ;;  %v4922_v23 = vld [vmem:[#allocation9 + $0x18c] ss:$24 sps:$4 sm:$0xff]  }
 0x237   :  { %743 = vmatpush1.bf16.msra.mxu0 %v4857_v24  ;;  %v4920_v24 = vld [vmem:[#allocation9 + $0x188] ss:$24 sps:$4 sm:$0xff]  }
 0x238   :  { %744 = vmatprep.subr.bf16.mxu0 %v4862_v25  ;;  %v4925_v25 = vld [vmem:[#allocation9 + $0x164] ss:$24 sps:$4 sm:$0xff]  }
 0x23b   :  { %745 = vmatpush1.bf16.msra.mxu0 %v4860_v26 }
 0x23c   :  { %1419 = vmatprep.subr.bf16.mxu0 %v4865_v46 }
 0x23e   :  { %763 = vmatmul.mubr.bf16.vlgmr.msra.gmra.mxu0 %v359_v12  ;;  %v4902_v12 = vld [vmem:[#allocation9 + $0x38] ss:$24 sps:$4 sm:$0xff]  }
 0x23f   :  { %1420 = vmatpush1.bf16.msra.mxu0 %v4863_v45 }
 0x240   :  { %1421 = vmatprep.subr.bf16.mxu0 %v4871_v50 }
 0x243   :  { %1422 = vmatpush1.bf16.msra.mxu0 %v4869_v49 }
 0x244   :  { %1423 = vmatprep.subr.bf16.mxu0 %v4877_v54 }
 0x247   :  { %1424 = vmatpush1.bf16.msra.mxu0 %v4875_v53 }
 0x248   :  { %1425 = vmatprep.subr.bf16.mxu0 %v4883_v58  ;;  %v4923_v58 = vld [vmem:[#allocation9 + $0x160] ss:$24 sps:$4 sm:$0xff]  }
 0x24b   :  { %1426 = vmatpush1.bf16.msra.mxu0 %v4881_v57 }
 0x24c   :  { %1427 = vmatprep.subr.bf16.mxu0 %v4889_v2  ;;  %v4931_v2 = vld [vmem:[#allocation9 + $0x104] ss:$24 sps:$4 sm:$0xff]  }
 0x24f   :  { %1428 = vmatpush1.bf16.msra.mxu0 %v4887_v63  ;;  %v4926_v63 = vld [vmem:[#allocation9 + $0x130] ss:$24 sps:$4 sm:$0xff]  }
 0x250   :  { %1429 = vmatprep.subr.bf16.mxu0 %v4895_v4  ;;  %v4934_v4 = vld [vmem:[#allocation9 + $0xd4] ss:$24 sps:$4 sm:$0xff]  }
 0x253   :  { %1430 = vmatpush1.bf16.msra.mxu0 %v4893_v7  ;;  %v4935_v7 = vld [vmem:[#allocation9 + $0xa0] ss:$24 sps:$4 sm:$0xff]  }
 0x254   :  { %1431 = vmatprep.subr.bf16.mxu0 %v4901_v8  ;;  %v4940_v8 = vld [vmem:[#allocation9 + $0x74] ss:$24 sps:$4 sm:$0xff]  }
 0x257   :  { %1432 = vmatpush1.bf16.msra.mxu0 %v4899_v10  ;;  %v4943_v10 = vld [vmem:[#allocation9 + $0x44] ss:$24 sps:$4 sm:$0xff]  }
 0x258   :  { %1433 = vmatprep.subr.bf16.mxu0 %v4907_v13  ;;  %v4944_v13 = vld [vmem:[#allocation9 + $0x10] ss:$24 sps:$4 sm:$0xff]  }
 0x25b   :  { %1434 = vmatpush1.bf16.msra.mxu0 %v4905_v14  ;;  %v4949_v14 = vld [vmem:[#allocation9 + $0x1c4] ss:$24 sps:$4 sm:$0xff]  }
 0x25c   :  { %1447 = vmatprep.subr.bf16.mxu0 %v4913_v17  ;;  %v4950_v17 = vld [vmem:[#allocation9 + $0x190] ss:$24 sps:$4 sm:$0xff]  }
 0x25f   :  { %1448 = vmatpush2.bf16.msra.mxu0 %v4911_v18 }
 0x260   :  { %1449 = vmatprep.subr.bf16.mxu0 %v4919_v21 }
 0x263   :  { %1450 = vmatpush2.bf16.msra.mxu0 %v4917_v22 }
 0x264   :  { %1505 = vmatprep.subr.bf16.mxu0 %v4925_v25  ;;  %v4296_v25 = vld [vmem:[%s6538_s9 + $0x18] sm:$0xff] }
 0x2de   :  { %v682_v27 = vpop.f32.mrf.mxu0  ;;  %v723_v28 = vpop.f32.mrf.mxu1 }
 0x2e0   :  { %v684_v29 = vpop.f32.mrf.mxu0  ;;  %v725_v30 = vpop.f32.mrf.mxu1 }
 0x2e1   :  { %813 = vmatprep.subr.mxu1 %v725_v30 }
 0x2e2   :  { %v686_v32 = vpop.f32.mrf.mxu0  ;;  %v727_v33 = vpop.f32.mrf.mxu1  ;;  %814 = vmatpush1.msra.mxu1 %v723_v28 }
 0x2e3   :  { %896 = vmatprep.subr.mxu1 %v684_v29  ;;  %4225 = vmatmul.mubr.msk.f32.vlgmr.msra.gmra.mxu1 %vm776_vm4, %v4223_v31 }
 0x2e4   :  { %v687_v34 = vpop.f32.mrf.mxu0  ;;  %v728_v35 = vpop.f32.mrf.mxu1  ;;  %897 = vmatpush1.msra.mxu1 %v682_v27  ;;  %853 = vmatprep.mubr.f32.mxu1 %v5305_v0 }
 0x2e7   :  { %4226 = vmatmul.mubr.msk.f32.gmra.mxu1 %vm776_vm4, %v4224_v36  ;;  %v1033_v36 = vld [vmem:[%s6536_s7] sm:$0x3] }
 0x2e8   :  { %930 = vmatprep.mubr.f32.mxu1 %v5305_v0 }
 0x2eb   :  { %4227 = vmatmul.mubr.msk.f32.vlgmr.msra.gmra.mxu1 %vm776_vm4, %v771_v37 }
 0x2ec   :  { %936 = vmatprep.mubr.f32.mxu1 %v5305_v0 }
 0x2ef   :  { %4228 = vmatmul.mubr.msk.f32.gmra.mxu1 %vm776_vm4, %v772_v38 }
 0x2f0   :  { %1016 = vmatprep.mubr.f32.mxu1 %v5305_v0 }
 0x2fe   :  { %v764_v39 = vpop.f32.mrf.mxu0 }
 0x300   :  { %v766_v40 = vpop.f32.mrf.mxu0 }
 0x301   :  { %982 = vmatprep.subr.mxu1 %v766_v40 }
 0x302   :  { %v768_v42 = vpop.f32.mrf.mxu0  ;;  %983 = vmatpush1.msra.mxu1 %v764_v39 }
 0x303   :  { %4231 = vmatmul.mubr.msk.f32.vlgmr.msra.gmra.mxu1 %vm776_vm4, %v4229_v41  ;;  %1462 = vmatprep.subr.bf16.mxu1 %v4868_v48  ;;  %v1042_v41 = vrot.slane %v1033_v36, %v5472_v61 }
 0x304   :  { %v769_v43 = vpop.f32.mrf.mxu0  ;;  %1022 = vmatprep.mubr.f32.mxu1 %v5305_v0  ;;  %1463 = vmatpush1.bf16.msra.mxu1 %v4866_v47 }
 0x305   :  { %1464 = vmatprep.subr.bf16.mxu1 %v4874_v52  ;;  %v1038_v43 = vrot.slane %v1033_v36, %v5467_v59  ;;  %v4305_v36 = vld [vmem:[%s6538_s9 + $0x30] sm:$0xff] }
 0x307   :  { %4232 = vmatmul.mubr.msk.f32.gmra.mxu1 %vm776_vm4, %v4230_v44 }
 0x308   :  { %1465 = vmatpush1.bf16.msra.mxu1 %v4872_v51 }
 0x309   :  { %1466 = vmatprep.subr.bf16.mxu1 %v4880_v56 }
 0x30c   :  { %1467 = vmatpush1.bf16.msra.mxu1 %v4878_v55 }
 0x30d   :  { %1468 = vmatprep.subr.bf16.mxu1 %v4886_v62  ;;  %v4928_v62 = vld [vmem:[#allocation9 + $0x134] ss:$24 sps:$4 sm:$0xff]  }
 0x310   :  { %1469 = vmatpush1.bf16.msra.mxu1 %v4884_v60 }
 0x311   :  { %1470 = vmatprep.subr.bf16.mxu1 %v4892_v3  ;;  %v4929_v3 = vld [vmem:[#allocation9 + $0x100] ss:$24 sps:$4 sm:$0xff]  }
 0x314   :  { %1471 = vmatpush1.bf16.msra.mxu1 %v4890_v5  ;;  %v4932_v5 = vld [vmem:[#allocation9 + $0xd0] ss:$24 sps:$4 sm:$0xff]  }
 0x315   :  { %1472 = vmatprep.subr.bf16.mxu1 %v4898_v6  ;;  %v4937_v6 = vld [vmem:[#allocation9 + $0xa4] ss:$24 sps:$4 sm:$0xff]  }
 0x318   :  { %1473 = vmatpush1.bf16.msra.mxu1 %v4896_v9  ;;  %v4938_v9 = vld [vmem:[#allocation9 + $0x70] ss:$24 sps:$4 sm:$0xff]  }
 0x319   :  { %1474 = vmatprep.subr.bf16.mxu1 %v4904_v11  ;;  %v4941_v11 = vld [vmem:[#allocation9 + $0x40] ss:$24 sps:$4 sm:$0xff]  }
 0x31c   :  { %1475 = vmatpush1.bf16.msra.mxu1 %v4902_v12  ;;  %v4946_v12 = vld [vmem:[#allocation9 + $0x14] ss:$24 sps:$4 sm:$0xff]  }
 0x31d   :  { %1476 = vmatprep.subr.bf16.mxu1 %v4910_v15  ;;  %v4947_v15 = vld [vmem:[#allocation9 + $0x1c0] ss:$24 sps:$4 sm:$0xff]  }
 0x320   :  { %1477 = vmatpush1.bf16.msra.mxu1 %v4908_v16  ;;  %v4952_v16 = vld [vmem:[#allocation9 + $0x194] ss:$24 sps:$4 sm:$0xff]  }
 0x321   :  { %1490 = vmatprep.subr.bf16.mxu1 %v4916_v19 }
 0x324   :  { %1491 = vmatpush2.bf16.msra.mxu1 %v4914_v20 }
 0x325   :  { %1492 = vmatprep.subr.bf16.mxu1 %v4922_v23 }
 0x328   :  { %1493 = vmatpush2.bf16.msra.mxu1 %v4920_v24 }
 0x3a3   :  { %v849_v26 = vpop.f32.mrf.mxu1 }
 0x3a5   :  { %v851_v27 = vpop.f32.mrf.mxu1 }
 0x3a7   :  { %v855_v28 = vpop.f32.mrf.mxu1 }
 0x3a9   :  { %v857_v29 = vpop.f32.mrf.mxu1 }
 0x3ab   :  { %v932_v30 = vpop.f32.mrf.mxu1 }
 0x3ac   :  { %v933_v37 = vadd.f32 %v932_v30, %v849_v26  ;;  %v1549_v30 = vld [vmem:[%s6538_s9 + $0x8] sm:$0xff] }
 0x3ad   :  { %v934_v31 = vpop.f32.mrf.mxu1 }
 0x3ae   :  { %v935_v35 = vadd.f32 %v934_v31, %v851_v27  ;;  %v4297_v27 = vld [vmem:[%s6538_s9 + $0x20] sm:$0xff]  ;;  %v1550_v31 = vld [vmem:[%s6538_s9 + $0x10] sm:$0xff] }
 0x3af   :  { %v938_v32 = vpop.f32.mrf.mxu1 }
 0x3b0   :  { %v939_v39 = vadd.f32 %v938_v32, %v855_v28  ;;  %v4298_v28 = vld [vmem:[%s6538_s9 + $0x28] sm:$0xff] }
 0x3b1   :  { %v940_v33 = vpop.f32.mrf.mxu1 }
 0x3b2   :  { %v941_v45 = vadd.f32 %v940_v33, %v857_v29  ;;  %v1548_v29 = vld [vmem:[%s6538_s9] sm:$0xff] }
 0x3c3   :  { %v1018_v34 = vpop.f32.mrf.mxu1 }
 0x3c4   :  { %v1029_v42 = vadd.f32 %v1018_v34, %v933_v37  ;;  %v4306_v37 = vld [vmem:[%s6538_s9 + $0x38] sm:$0xff] }
 0x3c5   :  { %v1020_v38 = vpop.f32.mrf.mxu1 }
 0x3c6   :  { %v1030_v40 = vadd.f32 %v1020_v38, %v935_v35  ;;  %v1045_v51 = vadd.f32 %v1038_v43, %v1029_v42  ;;  %v4307_v38 = vld [vmem:[%s6538_s9 + $0x40] sm:$0xff]  ;;  %s5308_s9 = smov 96  }
 0x3c7   :  { %v1024_v44 = vpop.f32.mrf.mxu1 }
 0x3c8   :  { %v1031_v46 = vadd.f32 %v1024_v44, %v939_v39  ;;  %v1046_v48 = vadd.f32 %v1042_v41, %v1030_v40  ;;  %v1049_v56 = vmax.f32 %v1045_v51, 0.0 }
 0x3c9   :  { %v1026_v47 = vpop.f32.mrf.mxu1 }
 0x3ca   :  { %v1047_v49 = vadd.f32 %v1038_v43, %v1031_v46  ;;  %v1032_v50 = vadd.f32 %v1026_v47, %v941_v45  ;;  %v1050_v54 = vmax.f32 %v1046_v48, 0.0 }
 0x3cc   :  { %v1048_v52 = vadd.f32 %v1042_v41, %v1032_v50  ;;  %v1051_v53 = vmax.f32 %v1047_v49, 0.0 }
 0x3ce   :  { %v1052_v55 = vmax.f32 %v1048_v52, 0.0  ;;  %v1053_v60 = vpack.c.bf16 %v1051_v53, %v1049_v56  ;;  %v1842_v52 = vld [vmem:[#allocation11] sm:$0x3] }
 0x3d0   :  { %v1054_v57 = vpack.c.bf16 %v1052_v55, %v1050_v54 }
 0x3d2   :  { %4293 = vmatprep.mubr.msk.bf16.mxu0 %vm1415_vm5, %v1054_v57  ;;  %4294 = vmatprep.mubr.msk.bf16.mxu1 %vm1415_vm5, %v1054_v57 }
 0x3d3   :  { %1452 = vmatmul.mubr.bf16.vlgmr.msra.gmra.mxu0 %v1053_v60  ;;  %1495 = vmatmul.mubr.bf16.vlgmr.msra.gmra.mxu1 %v1053_v60 }
 0x3d4   :  { %1506 = vmatpush1.bf16.msra.mxu0 %v4923_v58  ;;  %4295 = vmatprep.mubr.msk.bf16.mxu0 %vm1415_vm5, %v1054_v57  ;;  %v1847_v57 = vrot.slane %v1842_v52, %v5467_v59 }
 0x3d5   :  { %1507 = vmatprep.subr.bf16.mxu0 %v4928_v62  ;;  %1629 = vmatprep.mubr.f32.mxu1 %v5305_v0 }
 0x3d8   :  { %1508 = vmatpush1.bf16.msra.mxu0 %v4926_v63 }
 0x3d9   :  { %1509 = vmatprep.subr.bf16.mxu0 %v4931_v2 }
 0x3dc   :  { %1510 = vmatpush1.bf16.msra.mxu0 %v4929_v3 }
 0x3dd   :  { %1511 = vmatprep.subr.bf16.mxu0 %v4934_v4 }
 0x3e0   :  { %1512 = vmatpush1.bf16.msra.mxu0 %v4932_v5 }
 0x3e1   :  { %1513 = vmatprep.subr.bf16.mxu0 %v4937_v6 }
 0x3e4   :  { %1514 = vmatpush1.bf16.msra.mxu0 %v4935_v7 }
 0x3e5   :  { %1515 = vmatprep.subr.bf16.mxu0 %v4940_v8 }
 0x3e8   :  { %1516 = vmatpush1.bf16.msra.mxu0 %v4938_v9 }
 0x3e9   :  { %1517 = vmatprep.subr.bf16.mxu0 %v4943_v10 }
 0x3ec   :  { %1518 = vmatpush1.bf16.msra.mxu0 %v4941_v11 }
 0x3ed   :  { %1519 = vmatprep.subr.bf16.mxu0 %v4946_v12 }
 0x3f0   :  { %1520 = vmatpush1.bf16.msra.mxu0 %v4944_v13 }
 0x3f1   :  { %1533 = vmatprep.subr.bf16.mxu0 %v4949_v14 }
 0x3f4   :  { %1534 = vmatpush2.bf16.msra.mxu0 %v4947_v15 }
 0x3f5   :  { %1535 = vmatprep.subr.bf16.mxu0 %v4952_v16 }
 0x3f8   :  { %1536 = vmatpush2.bf16.msra.mxu0 %v4950_v17 }
 0x3fb   :  { %1538 = vmatmul.mubr.bf16.vlgmr.msra.gmra.mxu0 %v1053_v60 }
 0x493   :  { %v1453_v18 = vpop.f32.mrf.mxu0  ;;  %v1496_v19 = vpop.f32.mrf.mxu1 }
 0x495   :  { %v1455_v20 = vpop.f32.mrf.mxu0  ;;  %v1498_v21 = vpop.f32.mrf.mxu1 }
 0x497   :  { %v1500_v22 = vpop.f32.mrf.mxu1  ;;  %v1457_v23 = vpop.f32.mrf.mxu0 }
 0x499   :  { %v1502_v24 = vpop.f32.mrf.mxu1  ;;  %v1459_v26 = vpop.f32.mrf.mxu0 }
 0x49a   :  { %1593 = vmatprep.subr.mxu1 %v1502_v24 }
 0x49b   :  { %1594 = vmatpush1.msra.mxu1 %v1500_v22 }
 0x49c   :  { %1595 = vmatprep.subr.mxu1 %v1498_v21 }
 0x49d   :  { %1596 = vmatpush1.msra.mxu1 %v1496_v19 }
 0x49e   :  { %1685 = vmatprep.subr.mxu1 %v1459_v26  ;;  %4299 = vmatmul.mubr.msk.f32.vlgmr.msra.gmra.mxu1 %vm1555_vm6, %v4296_v25 }
 0x49f   :  { %1686 = vmatpush1.msra.mxu1 %v1457_v23  ;;  %1635 = vmatprep.mubr.f32.mxu1 %v5305_v0 }
 0x4a0   :  { %1687 = vmatprep.subr.mxu1 %v1455_v20  ;;  %v1851_v20 = vrot.slane %v1842_v52, %v5472_v61 }
 0x4a1   :  { %1688 = vmatpush1.msra.mxu1 %v1453_v18 }
 0x4a2   :  { %4300 = vmatmul.mubr.msk.f32.gmra.mxu1 %vm1555_vm6, %v4297_v27 }
 0x4a3   :  { %1641 = vmatprep.mubr.f32.mxu1 %v5305_v0 }
 0x4a6   :  { %4301 = vmatmul.mubr.msk.f32.gmra.mxu1 %vm1555_vm6, %v4298_v28 }
 0x4a7   :  { %1721 = vmatprep.mubr.f32.mxu1 %v5305_v0 }
 0x4aa   :  { %4302 = vmatmul.mubr.msk.f32.vlgmr.msra.gmra.mxu1 %vm1555_vm6, %v1548_v29 }
 0x4ab   :  { %1727 = vmatprep.mubr.f32.mxu1 %v5305_v0 }
 0x4ae   :  { %4303 = vmatmul.mubr.msk.f32.gmra.mxu1 %vm1555_vm6, %v1549_v30 }
 0x4af   :  { %1733 = vmatprep.mubr.f32.mxu1 %v5305_v0 }
 0x4b2   :  { %4304 = vmatmul.mubr.msk.f32.gmra.mxu1 %vm1555_vm6, %v1550_v31 }
 0x4b3   :  { %1817 = vmatprep.mubr.f32.mxu1 %v5305_v0 }
 0x4bb   :  { %v1539_v32 = vpop.f32.mrf.mxu0 }
 0x4bd   :  { %v1541_v33 = vpop.f32.mrf.mxu0 }
 0x4bf   :  { %v1543_v34 = vpop.f32.mrf.mxu0 }
 0x4c1   :  { %v1545_v35 = vpop.f32.mrf.mxu0 }
 0x4c2   :  { %1781 = vmatprep.subr.mxu1 %v1545_v35 }
 0x4c3   :  { %1782 = vmatpush1.msra.mxu1 %v1543_v34 }
 0x4c4   :  { %1783 = vmatprep.subr.mxu1 %v1541_v33 }
 0x4c5   :  { %1784 = vmatpush1.msra.mxu1 %v1539_v32 }
 0x4c6   :  { %4308 = vmatmul.mubr.msk.f32.vlgmr.msra.gmra.mxu1 %vm1555_vm6, %v4305_v36 }
 0x4c7   :  { %1823 = vmatprep.mubr.f32.mxu1 %v5305_v0 }
 0x4ca   :  { %4309 = vmatmul.mubr.msk.f32.gmra.mxu1 %vm1555_vm6, %v4306_v37 }
 0x4cb   :  { %1829 = vmatprep.mubr.f32.mxu1 %v5305_v0 }
 0x4ce   :  { %4310 = vmatmul.mubr.msk.f32.gmra.mxu1 %vm1555_vm6, %v4307_v38 }
 0x55e   :  { %v1631_v39 = vpop.f32.mrf.mxu1 }
 0x560   :  { %v1633_v40 = vpop.f32.mrf.mxu1 }
 0x562   :  { %v1637_v41 = vpop.f32.mrf.mxu1 }
 0x564   :  { %v1639_v42 = vpop.f32.mrf.mxu1 }
 0x566   :  { %v1643_v43 = vpop.f32.mrf.mxu1 }
 0x568   :  { %v1645_v44 = vpop.f32.mrf.mxu1 }
 0x56a   :  { %v1723_v45 = vpop.f32.mrf.mxu1 }
 0x56b   :  { %v1724_v53 = vadd.f32 %v1723_v45, %v1631_v39 }
 0x56c   :  { %v1725_v46 = vpop.f32.mrf.mxu1 }
 0x56d   :  { %v1726_v9 = vadd.f32 %v1725_v46, %v1633_v40 }
 0x56e   :  { %v1729_v47 = vpop.f32.mrf.mxu1 }
 0x56f   :  { %v1730_v55 = vadd.f32 %v1729_v47, %v1637_v41 }
 0x570   :  { %v1731_v48 = vpop.f32.mrf.mxu1 }
 0x571   :  { %v1732_v7 = vadd.f32 %v1731_v48, %v1639_v42 }
 0x572   :  { %v1735_v49 = vpop.f32.mrf.mxu1 }
 0x573   :  { %v1736_v63 = vadd.f32 %v1735_v49, %v1643_v43 }
 0x574   :  { %v1737_v50 = vpop.f32.mrf.mxu1 }
 0x575   :  { %v1738_v13 = vadd.f32 %v1737_v50, %v1645_v44 }
 0x586   :  { %v1819_v51 = vpop.f32.mrf.mxu1 }
 0x587   :  { %v1836_v56 = vadd.f32 %v1819_v51, %v1724_v53 }
 0x588   :  { %v1821_v54 = vpop.f32.mrf.mxu1 }
 0x589   :  { %v5560_v3 = vadd.f32 %v1847_v57, %v1836_v56  ;;  %v1837_v19 = vadd.f32 %v1821_v54, %v1726_v9  ;;  %v4956_v9 = vld [vmem:[%s6542_s13 + $0x158] ss:$24 sps:$4 sm:$0xff]  }
 0x58a   :  { %v1825_v58 = vpop.f32.mrf.mxu1 }
 0x58b   :  { %v1838_v60 = vadd.f32 %v1825_v58, %v1730_v55  ;;  %v1883_v12 = vmul.f32 %v5560_v3, %v5560_v3  ;;  %v5578_v28 = vadd.f32 %v1851_v20, %v1837_v19 }
 0x58c   :  { %v1827_v62 = vpop.f32.mrf.mxu1 }
 0x58d   :  { %v5558_v2 = vadd.f32 %v1847_v57, %v1838_v60  ;;  %v1839_v14 = vadd.f32 %v1827_v62, %v1732_v7  ;;  %v1884_v35 = vmul.f32 %v5578_v28, %v5578_v28  ;;  %v1871_v45 = vsel %vm1870_vm8, %v5578_v28, 0.0  ;;  %v4955_v7 = vld [vmem:[%s6542_s13 + $0x154] ss:$24 sps:$4 sm:$0xff]  }
 0x58e   :  { %v1831_v4 = vpop.f32.mrf.mxu1  ;;  %2603 = vmatprep.subr.bf16.mxu1 %v4955_v7  ;;  %v1991_v7 = vld [vmem:[#allocation12] sm:$0x1] }
 0x58f   :  { %v1840_v5 = vadd.f32 %v1831_v4, %v1736_v63  ;;  %v1885_v6 = vmul.f32 %v5558_v2, %v5558_v2  ;;  %v1860_v11 = vadd.f32 %v5558_v2, %v5560_v3  ;;  %v5576_v25 = vadd.f32 %v1851_v20, %v1839_v14  ;;  %v4962_v14 = vld [vmem:[%s6542_s13 + $0x128] ss:$24 sps:$4 sm:$0xff]  }
 0x590   :  { %v1833_v10 = vpop.f32.mrf.mxu1  ;;  %v1898_v43 = vsel %vm1870_vm8, %v1884_v35, 0.0 }
 0x591   :  { %v5564_v8 = vadd.f32 %v1847_v57, %v1840_v5  ;;  %v1889_v18 = vadd.f32 %v1885_v6, %v1883_v12  ;;  %v1841_v21 = vadd.f32 %v1833_v10, %v1738_v13  ;;  %v1886_v32 = vmul.f32 %v5576_v25, %v5576_v25  ;;  %v4953_v6 = vld [vmem:[%s6542_s13 + $0x150] ss:$24 sps:$4 sm:$0xff]   ;;  %v4958_v10 = vld [vmem:[%s6542_s13 + $0x15c] ss:$24 sps:$4 sm:$0xff]   ;;  %v4964_v12 = vld [vmem:[%s6542_s13 + $0x12c] ss:$24 sps:$4 sm:$0xff]  }
 0x592   :  { %v1872_v40 = vsel %vm1870_vm8, %v5576_v25, 0.0  ;;  %2604 = vmatpush1.bf16.msra.mxu1 %v4953_v6  ;;  %2654 = vmatprep.subr.bf16.mxu0 %v4958_v10  ;;  %v4959_v13 = vld [vmem:[%s6542_s13 + $0x120] ss:$24 sps:$4 sm:$0xff]   ;;  %v4970_v6 = vld [vmem:[%s6542_s13 + $0xfc] ss:$24 sps:$4 sm:$0xff]  }
 0x593   :  { %v1862_v15 = vsel %vm1861_vm7, %v5564_v8, 0.0  ;;  %v1887_v16 = vmul.f32 %v5564_v8, %v5564_v8  ;;  %v5580_v29 = vadd.f32 %v1851_v20, %v1841_v21  ;;  %v1899_v39 = vsel %vm1870_vm8, %v1886_v32, 0.0  ;;  %2655 = vmatpush1.bf16.msra.mxu0 %v4956_v9  ;;  %v4973_v9 = vld [vmem:[%s6542_s13 + $0xc4] ss:$24 sps:$4 sm:$0xff]   ;;  %v4971_v10 = vld [vmem:[%s6542_s13 + $0xc0] ss:$24 sps:$4 sm:$0xff]  }
 0x594   :  { %v1863_v17 = vadd.f32 %v1862_v15, %v1860_v11  ;;  %v1900_v47 = vadd.f32 %v1899_v39, %v1898_v43  ;;  %v1873_v48 = vadd.f32 %v1872_v40, %v1871_v45  ;;  %v4961_v11 = vld [vmem:[%s6542_s13 + $0x124] ss:$24 sps:$4 sm:$0xff]   ;;  %2656 = vmatprep.subr.bf16.mxu0 %v4964_v12 }
 0x595   :  { %v1890_v22 = vsel %vm1861_vm7, %v1887_v16, 0.0  ;;  %v1888_v36 = vmul.f32 %v5580_v29, %v5580_v29  ;;  %v1875_v46 = vsel %vm1874_vm9, %v5580_v29, 0.0  ;;  %2605 = vmatprep.subr.bf16.mxu1 %v4961_v11  ;;  %v4976_v11 = vld [vmem:[%s6542_s13 + $0xcc] ss:$24 sps:$4 sm:$0xff]  }
 0x596   :  { %v1864_v23 = vrot.slane %v1863_v17, 4  ;;  %v1891_v24 = vadd.f32 %v1890_v22, %v1889_v18  ;;  %v1876_v51 = vadd.f32 %v1875_v46, %v1873_v48  ;;  %2606 = vmatpush1.bf16.msra.mxu1 %v4959_v13  ;;  %v4974_v13 = vld [vmem:[%s6542_s13 + $0xc8] ss:$24 sps:$4 sm:$0xff]  }
 0x597   :  { %v1901_v44 = vsel %vm1874_vm9, %v1888_v36, 0.0  ;;  %2657 = vmatpush1.bf16.msra.mxu0 %v4962_v14 }
 0x598   :  { %v1865_v26 = vadd.f32 %v1864_v23, %v1863_v17  ;;  %v1892_v27 = vrot.slane %v1891_v24, 4  ;;  %v1902_v50 = vadd.f32 %v1901_v44, %v1900_v47  ;;  %v1877_v53 = vrot.slane %v1876_v51, 4  ;;  %2658 = vmatprep.subr.bf16.mxu0 %v4970_v6  ;;  %v5015_v6 = vld [vmem:[%s6542_s13 + $0x184] ss:$24 sps:$4 sm:$0xff]  }
 0x59a   :  { %v1866_v30 = vrot.slane %v1865_v26, 2  ;;  %v1893_v31 = vadd.f32 %v1892_v27, %v1891_v24  ;;  %v1903_v52 = vrot.slane %v1902_v50, 4  ;;  %v1878_v55 = vadd.f32 %v1877_v53, %v1876_v51 }
 0x59c   :  { %v1867_v33 = vadd.f32 %v1866_v30, %v1865_v26  ;;  %v1894_v34 = vrot.slane %v1893_v31, 2  ;;  %v1904_v54 = vadd.f32 %v1903_v52, %v1902_v50  ;;  %v1879_v57 = vrot.slane %v1878_v55, 2 }
 0x59e   :  { %v1868_v37 = vrot.slane %v1867_v33, 1  ;;  %v1895_v38 = vadd.f32 %v1894_v34, %v1893_v31  ;;  %v1905_v56 = vrot.slane %v1904_v54, 2  ;;  %v1880_v60 = vadd.f32 %v1879_v57, %v1878_v55 }
 0x5a0   :  { %v5591_v41 = vadd.f32 %v1868_v37, %v1867_v33  ;;  %v1896_v42 = vrot.slane %v1895_v38, 1  ;;  %v1906_v58 = vadd.f32 %v1905_v56, %v1904_v54  ;;  %v1881_v63 = vrot.slane %v1880_v60, 1 }
 0x5a2   :  { %1919 = vrot.lane.b32.xlu1 %v5591_v41, %s5308_s9  ;;  %1910 = vrot.lane.b32.xlu0 %v5591_v41, %s5309_s28  ;;  %v5601_v49 = vadd.f32 %v1896_v42, %v1895_v38  ;;  %v1907_v62 = vrot.slane %v1906_v58, 1  ;;  %v1882_v5 = vadd.f32 %v1881_v63, %v1880_v60  ;;  %v4965_v63 = vld [vmem:[%s6542_s13 + $0xf0] ss:$24 sps:$4 sm:$0xff]  }
 0x5a4   :  { %v1908_v4 = vadd.f32 %v1907_v62, %v1906_v58 }
 0x5a6   :  { %1923 = vrot.lane.b32.xlu1 %v5601_v49, %s5308_s9  ;;  %1927 = vrot.lane.b32.xlu0 %v5591_v41, %s5310_s29 }
 0x5aa   :  { %1931 = vrot.lane.b32.xlu1 %v5601_v49, %s5310_s29  ;;  %1935 = vrot.lane.b32.xlu0 %v5591_v41, %s5311_s30 }
 0x5ae   :  { %1939 = vrot.lane.b32.xlu1 %v5601_v49, %s5311_s30  ;;  %1943 = vrot.lane.b32.xlu0 %v5591_v41, %s5312_s10 }
 0x5b2   :  { %1947 = vrot.lane.b32.xlu1 %v5601_v49, %s5312_s10  ;;  %1915 = vrot.lane.b32.xlu0 %v5601_v49, %s5309_s28 }
 0x5b6   :  { %1955 = vrot.lane.b32.xlu1 %v5601_v49, %s5313_s21  ;;  %1951 = vrot.lane.b32.xlu0 %v5591_v41, %s5313_s21 }
 0x5ba   :  { %1963 = vrot.lane.b32.xlu1 %v5601_v49, %s5314_s6  ;;  %1959 = vrot.lane.b32.xlu0 %v5591_v41, %s5314_s6 }
 0x5be   :  { %1975 = vrot.lane.b32.xlu1 %v1908_v4, %s5309_s28  ;;  %1970 = vrot.lane.b32.xlu0 %v1882_v5, %s5309_s28 }
 0x5c2   :  { %1983 = vrot.lane.b32.xlu1 %v1908_v4, %s5308_s9  ;;  %1979 = vrot.lane.b32.xlu0 %v1882_v5, %s5308_s9 }
 0x614   :  { %v1920_v15 = vpop.permute.xlu1 %1919  ;;  %v1911_v16 = vpop.permute.xlu0 %1910 }
 0x615   :  { %v1913_v21 = vadd.f32 %v1911_v16, %v5591_v41  ;;  %v4979_v16 = vld [vmem:[%s6542_s13 + $0x94] ss:$24 sps:$4 sm:$0xff]  }
 0x617   :  { %v1922_v24 = vadd.f32 %v1920_v15, %v1913_v21  ;;  %v1995_v15 = vld [vmem:[#allocation14] sm:$0x1]  ;;  %v4980_v21 = vld [vmem:[%s6542_s13 + $0x98] ss:$24 sps:$4 sm:$0xff]  }
 0x618   :  { %v1924_v17 = vpop.permute.xlu1 %1923  ;;  %v1928_v18 = vpop.permute.xlu0 %1927 }
 0x619   :  { %v1930_v30 = vadd.f32 %v1928_v18, %v1922_v24 }
 0x61c   :  { %v1932_v19 = vpop.permute.xlu1 %1931  ;;  %v1936_v20 = vpop.permute.xlu0 %1935 }
 0x61d   :  { %v1938_v32 = vadd.f32 %v1936_v20, %v1930_v30  ;;  %v4982_v20 = vld [vmem:[%s6542_s13 + $0x9c] ss:$24 sps:$4 sm:$0xff]  }
 0x620   :  { %v1940_v22 = vpop.permute.xlu1 %1939  ;;  %v1944_v23 = vpop.permute.xlu0 %1943 }
 0x621   :  { %v1946_v36 = vadd.f32 %v1944_v23, %v1938_v32  ;;  %v4985_v23 = vld [vmem:[%s6542_s13 + $0x64] ss:$24 sps:$4 sm:$0xff]  }
 0x622   :  { %v4988_v32 = vld [vmem:[%s6542_s13 + $0x6c] ss:$24 sps:$4 sm:$0xff]  }
 0x624   :  { %v1948_v26 = vpop.permute.xlu1 %1947  ;;  %v1916_v27 = vpop.permute.xlu0 %1915 }
 0x625   :  { %v1918_v31 = vadd.f32 %v1916_v27, %v5601_v49 }
 0x627   :  { %v1926_v33 = vadd.f32 %v1924_v17, %v1918_v31  ;;  %v4983_v31 = vld [vmem:[%s6542_s13 + $0x60] ss:$24 sps:$4 sm:$0xff]  }
 0x628   :  { %v1956_v34 = vpop.permute.xlu1 %1955  ;;  %v1952_v35 = vpop.permute.xlu0 %1951 }
 0x629   :  { %v1934_v37 = vadd.f32 %v1932_v19, %v1926_v33  ;;  %v1954_v39 = vadd.f32 %v1952_v35, %v1946_v36  ;;  %v4977_v19 = vld [vmem:[%s6542_s13 + $0x90] ss:$24 sps:$4 sm:$0xff]  }
 0x62a   :  { %v4986_v36 = vld [vmem:[%s6542_s13 + $0x68] ss:$24 sps:$4 sm:$0xff]  }
 0x62b   :  { %v1942_v38 = vadd.f32 %v1940_v22, %v1934_v37 }
 0x62c   :  { %v1964_v40 = vpop.permute.xlu1 %1963  ;;  %v1960_v42 = vpop.permute.xlu0 %1959 }
 0x62d   :  { %v1950_v43 = vadd.f32 %v1948_v26, %v1942_v38  ;;  %v1962_v41 = vadd.f32 %v1960_v42, %v1954_v39 }
 0x62f   :  { %v1958_v44 = vadd.f32 %v1956_v34, %v1950_v43  ;;  %v1967_v45 = vadd.f32 %v1962_v41, %v1882_v5  ;;  %v4968_v5 = vld [vmem:[%s6542_s13 + $0xf8] ss:$24 sps:$4 sm:$0xff]   ;;  %v4991_v41 = vld [vmem:[%s6542_s13 + $0x34] ss:$24 sps:$4 sm:$0xff]  }
 0x630   :  { %v1976_v46 = vpop.permute.xlu1 %1975  ;;  %v1971_v47 = vpop.permute.xlu0 %1970  ;;  %2659 = vmatpush1.bf16.msra.mxu0 %v4968_v5  ;;  %v5012_v5 = vld [vmem:[%s6542_s13 + $0x1bc] ss:$24 sps:$4 sm:$0xff]  }
 0x631   :  { %v1966_v48 = vadd.f32 %v1964_v40, %v1958_v44  ;;  %v1973_v51 = vadd.f32 %v1971_v47, %v1967_v45  ;;  %2660 = vmatprep.subr.bf16.mxu0 %v4976_v11  ;;  %v4989_v47 = vld [vmem:[%s6542_s13 + $0x30] ss:$24 sps:$4 sm:$0xff]   ;;  %v5021_v11 = vld [vmem:[%s6542_s13 + $0x164] ss:$24 sps:$4 sm:$0xff]  }
 0x633   :  { %v1968_v50 = vadd.f32 %v1966_v48, %v1908_v4  ;;  %v4967_v4 = vld [vmem:[%s6542_s13 + $0xf4] ss:$24 sps:$4 sm:$0xff]  }
 0x634   :  { %v1980_v49 = vpop.permute.xlu0 %1979  ;;  %v1984_v54 = vpop.permute.xlu1 %1983  ;;  %2607 = vmatprep.subr.bf16.mxu1 %v4967_v4  ;;  %2661 = vmatpush1.bf16.msra.mxu0 %v4974_v13  ;;  %v5009_v4 = vld [vmem:[%s6542_s13 + $0x1b4] ss:$24 sps:$4 sm:$0xff]  }
 0x635   :  { %v1978_v52 = vadd.f32 %v1976_v46, %v1968_v50  ;;  %v1982_v53 = vadd.f32 %v1980_v49, %v1973_v51  ;;  %2608 = vmatpush1.bf16.msra.mxu1 %v4965_v63  ;;  %2662 = vmatprep.subr.bf16.mxu0 %v4982_v20  ;;  %v4992_v49 = vld [vmem:[%s6542_s13 + $0x38] ss:$24 sps:$4 sm:$0xff]  }
 0x636   :  { %2609 = vmatprep.subr.bf16.mxu1 %v4973_v9  ;;  %v5007_v63 = vld [vmem:[%s6542_s13 + $0x1b0] ss:$24 sps:$4 sm:$0xff]   ;;  %v5013_v9 = vld [vmem:[%s6542_s13 + $0x180] ss:$24 sps:$4 sm:$0xff]  }
 0x637   :  { %v1986_v55 = vadd.f32 %v1984_v54, %v1978_v52  ;;  %v1987_v56 = vmul.f32 0.004132231, %v1982_v53  ;;  %v4994_v52 = vld [vmem:[%s6542_s13 + $0x3c] ss:$24 sps:$4 sm:$0xff]   ;;  %v4995_v54 = vld [vmem:[%s6542_s13] ss:$24 sps:$4 sm:$0xff]  }
 0x638   :  { %2663 = vmatpush1.bf16.msra.mxu0 %v4980_v21  ;;  %v4997_v53 = vld [vmem:[%s6542_s13 + $0x4] ss:$24 sps:$4 sm:$0xff]  }
 0x639   :  { %v1988_v57 = vmul.f32 0.004132231, %v1986_v55  ;;  %v1989_v58 = vmul.f32 %v1987_v56, %v1987_v56  ;;  %2610 = vmatpush1.bf16.msra.mxu1 %v4971_v10  ;;  %2664 = vmatprep.subr.bf16.mxu0 %v4988_v32  ;;  %v5000_v55 = vld [vmem:[%s6542_s13 + $0xc] ss:$24 sps:$4 sm:$0xff]  }
 0x63a   :  { %2611 = vmatprep.subr.bf16.mxu1 %v4979_v16  ;;  %v5018_v10 = vld [vmem:[%s6542_s13 + $0x18c] ss:$24 sps:$4 sm:$0xff]  }
 0x63b   :  { %v1990_v60 = vsub.f32 %v1988_v57, %v1989_v58  ;;  %v5003_v57 = vld [vmem:[%s6542_s13 + $0x1e4] ss:$24 sps:$4 sm:$0xff]   ;;  %v5001_v58 = vld [vmem:[%s6542_s13 + $0x1e0] ss:$24 sps:$4 sm:$0xff]  }
 0x63c   :  { %2665 = vmatpush1.bf16.msra.mxu0 %v4986_v36 }
 0x63d   :  { %v1992_v62 = vadd.f32 1e-05, %v1990_v60  ;;  %2612 = vmatpush1.bf16.msra.mxu1 %v4977_v19  ;;  %2666 = vmatprep.subr.bf16.mxu0 %v4994_v52  ;;  %v5006_v60 = vld [vmem:[%s6542_s13 + $0x1ec] ss:$24 sps:$4 sm:$0xff]  }
 0x63e   :  { %2613 = vmatprep.subr.bf16.mxu1 %v4985_v23 }
 0x63f   :  { %5100 = vrsqrt.f32 %v1992_v62  ;;  %v5004_v62 = vld [vmem:[%s6542_s13 + $0x1e8] ss:$24 sps:$4 sm:$0xff]  }
 0x640   :  { %2667 = vmatpush1.bf16.msra.mxu0 %v4992_v49 }
 0x641   :  { %2614 = vmatpush1.bf16.msra.mxu1 %v4983_v31  ;;  %2668 = vmatprep.subr.bf16.mxu0 %v5000_v55 }
 0x642   :  { %2615 = vmatprep.subr.bf16.mxu1 %v4991_v41 }
 0x645   :  { %2616 = vmatpush1.bf16.msra.mxu1 %v4989_v47 }
 0x646   :  { %2617 = vmatprep.subr.bf16.mxu1 %v4997_v53 }
 0x649   :  { %2618 = vmatpush1.bf16.msra.mxu1 %v4995_v54 }
 0x64a   :  { %2629 = vmatprep.subr.bf16.mxu1 %v5003_v57 }
 0x64c   :  { %v5101_v12 = vpop.eup %5100 }
 0x64d   :  { %v1994_v14 = vmul.f32 %v5101_v12, %v1991_v7  ;;  %2630 = vmatpush2.bf16.msra.mxu1 %v5001_v58  ;;  %v5010_v7 = vld [vmem:[%s6542_s13 + $0x1b8] ss:$24 sps:$4 sm:$0xff]   ;;  %v5016_v12 = vld [vmem:[%s6542_s13 + $0x188] ss:$24 sps:$4 sm:$0xff]  }
 0x64e   :  { %2631 = vmatprep.subr.bf16.mxu1 %v5009_v4 }
 0x64f   :  { %v1996_v17 = vmul.f32 %v1994_v14, %v1987_v56  ;;  %v5685_v18 = vrot.slane %v1994_v14, %v5467_v59  ;;  %v4998_v56 = vld [vmem:[%s6542_s13 + $0x8] ss:$24 sps:$4 sm:$0xff]  }
 0x650   :  { %2669 = vmatpush1.bf16.msra.mxu0 %v4998_v56 }
 0x651   :  { %v1997_v22 = vsub.f32 %v1995_v15, %v1996_v17  ;;  %2041 = vrot.lane.b32.xlu1 %v5685_v18, %s5313_s21  ;;  %2022 = vrot.lane.b32.xlu0 %v5685_v18, %s5314_s6  ;;  %v2155_v26 = vmul.f32 %v5685_v18, %v5578_v28  ;;  %v2156_v27 = vmul.f32 %v5685_v18, %v5576_v25 }
 0x652   :  { %v2157_v30 = vmul.f32 %v5685_v18, %v5580_v29  ;;  %v2004_v33 = vmul.f32 %v5685_v18, %v5560_v3  ;;  %v2005_v34 = vmul.f32 %v5685_v18, %v5558_v2  ;;  %v2006_v35 = vmul.f32 %v5685_v18, %v5564_v8  ;;  %2680 = vmatprep.subr.bf16.mxu0 %v5006_v60 }
 0x653   :  { %v5704_v24 = vrot.slane %v1997_v22, %v5467_v59  ;;  %2632 = vmatpush2.bf16.msra.mxu1 %v5007_v63 }
 0x654   :  { %2681 = vmatpush2.bf16.msra.mxu0 %v5004_v62  ;;  %2633 = vmatprep.subr.bf16.mxu1 %v5015_v6 }
 0x655   :  { %2060 = vrot.lane.b32.xlu1 %v5685_v18, %s5312_s10  ;;  %2028 = vrot.lane.b32.xlu0 %v5704_v24, %s5314_s6  ;;  %v2158_v37 = vadd.f32 %v2155_v26, %v5704_v24  ;;  %v2159_v38 = vadd.f32 %v2156_v27, %v5704_v24  ;;  %v2160_v39 = vadd.f32 %v2157_v30, %v5704_v24 }
 0x656   :  { %v2013_v40 = vadd.f32 %v5704_v24, %v2004_v33  ;;  %v2014_v42 = vadd.f32 %v5704_v24, %v2005_v34  ;;  %v2015_v43 = vadd.f32 %v5704_v24, %v2006_v35  ;;  %2682 = vmatprep.subr.bf16.mxu0 %v5012_v5 }
 0x657   :  { %v2161_v44 = vmax.f32 %v2158_v37, 0.0  ;;  %v2162_v45 = vmax.f32 %v2159_v38, 0.0  ;;  %v2163_v46 = vmax.f32 %v2160_v39, 0.0  ;;  %2634 = vmatpush2.bf16.msra.mxu1 %v5013_v9 }
 0x658   :  { %v2016_v48 = vmax.f32 %v2013_v40, 0.0  ;;  %v2017_v50 = vmax.f32 %v2014_v42, 0.0  ;;  %v2018_v51 = vmax.f32 %v2015_v43, 0.0  ;;  %2683 = vmatpush2.bf16.msra.mxu0 %v5010_v7  ;;  %2705 = vmatprep.subr.bf16.mxu1 %v5021_v11 }
 0x659   :  { %2079 = vrot.lane.b32.xlu1 %v5685_v18, %s5311_s30  ;;  %2047 = vrot.lane.b32.xlu0 %v5704_v24, %s5313_s21  ;;  %2164 = vst.msk [vmem:[#allocation3 + $0x8] sm:$0xff] %vm1555_vm6, %v2161_v44  ;;  %2165 = vst.msk [vmem:[#allocation3 + $0x18] sm:$0xff] %vm1555_vm6, %v2162_v45 }
 0x65a   :  { %2166 = vst.msk [vmem:[#allocation3 + $0x28] sm:$0xff] %vm1555_vm6, %v2163_v46  ;;  %2019 = vst.msk [vmem:[#allocation3] sm:$0xff] %vm1555_vm6, %v2016_v48  ;;  %2684 = vmatprep.subr.bf16.mxu0 %v5018_v10 }
 0x65b   :  { %2020 = vst.msk [vmem:[#allocation3 + $0x10] sm:$0xff] %vm1555_vm6, %v2017_v50  ;;  %2021 = vst.msk [vmem:[#allocation3 + $0x20] sm:$0xff] %vm1555_vm6, %v2018_v51 }
 0x65c   :  { %2685 = vmatpush2.bf16.msra.mxu0 %v5016_v12 }
 0x65d   :  { %2098 = vrot.lane.b32.xlu1 %v5685_v18, %s5310_s29  ;;  %2066 = vrot.lane.b32.xlu0 %v5704_v24, %s5312_s10 }
 0x661   :  { %2117 = vrot.lane.b32.xlu1 %v5685_v18, %s5308_s9  ;;  %2085 = vrot.lane.b32.xlu0 %v5704_v24, %s5311_s30 }
 0x665   :  { %2136 = vrot.lane.b32.xlu1 %v5685_v18, %s5309_s28  ;;  %2104 = vrot.lane.b32.xlu0 %v5704_v24, %s5310_s29 }
 0x669   :  { %2142 = vrot.lane.b32.xlu1 %v5704_v24, %s5309_s28  ;;  %2123 = vrot.lane.b32.xlu0 %v5704_v24, %s5308_s9 }
 0x6c3   :  { %v2042_v13 = vpop.permute.xlu1 %2041  ;;  %v2023_v14 = vpop.permute.xlu0 %2022 }
 0x6c4   :  { %v2025_v15 = vmul.f32 %v2023_v14, %v5560_v3  ;;  %v2026_v16 = vmul.f32 %v2023_v14, %v5558_v2  ;;  %v2027_v17 = vmul.f32 %v2023_v14, %v5564_v8  ;;  %v2167_v18 = vmul.f32 %v2023_v14, %v5578_v28 }
 0x6c5   :  { %v2168_v19 = vmul.f32 %v2023_v14, %v5576_v25  ;;  %v2044_v22 = vmul.f32 %v2042_v13, %v5560_v3  ;;  %v2045_v23 = vmul.f32 %v2042_v13, %v5558_v2  ;;  %v2169_v24 = vmul.f32 %v2023_v14, %v5580_v29 }
 0x6c6   :  { %v2046_v33 = vmul.f32 %v2042_v13, %v5564_v8  ;;  %v2179_v34 = vmul.f32 %v2042_v13, %v5578_v28  ;;  %v2180_v41 = vmul.f32 %v2042_v13, %v5576_v25  ;;  %v2181_v44 = vmul.f32 %v2042_v13, %v5580_v29 }
 0x6c7   :  { %v2061_v20 = vpop.permute.xlu1 %2060  ;;  %v2029_v21 = vpop.permute.xlu0 %2028 }
 0x6c8   :  { %v2031_v26 = vadd.f32 %v2029_v21, %v2025_v15  ;;  %v2032_v27 = vadd.f32 %v2029_v21, %v2026_v16  ;;  %v2033_v30 = vadd.f32 %v2029_v21, %v2027_v17  ;;  %v2170_v31 = vadd.f32 %v2167_v18, %v2029_v21 }
 0x6c9   :  { %v2171_v32 = vadd.f32 %v2168_v19, %v2029_v21  ;;  %v2172_v36 = vadd.f32 %v2169_v24, %v2029_v21  ;;  %v2063_v45 = vmul.f32 %v2061_v20, %v5560_v3  ;;  %v2064_v25 = vmul.f32 %v2061_v20, %v5558_v2 }
 0x6ca   :  { %v2034_v35 = vmax.f32 %v2031_v26, 0.0  ;;  %v2035_v37 = vmax.f32 %v2032_v27, 0.0  ;;  %v2036_v38 = vmax.f32 %v2033_v30, 0.0  ;;  %v2173_v39 = vmax.f32 %v2170_v31, 0.0 }
 0x6cb   :  { %v2174_v40 = vmax.f32 %v2171_v32, 0.0  ;;  %v2080_v42 = vpop.permute.xlu1 %2079  ;;  %v2048_v43 = vpop.permute.xlu0 %2047  ;;  %v2175_v46 = vmax.f32 %v2172_v36, 0.0  ;;  %v2065_v29 = vmul.f32 %v2061_v20, %v5564_v8 }
 0x6cc   :  { %2038 = vst.msk [vmem:[#allocation3] sm:$0xff] %vm2037_vm10, %v2034_v35  ;;  %2176 = vst.msk [vmem:[#allocation3 + $0x8] sm:$0xff] %vm2037_vm10, %v2173_v39  ;;  %v2050_v28 = vadd.f32 %v2048_v43, %v2044_v22  ;;  %v2051_v47 = vadd.f32 %v2048_v43, %v2045_v23  ;;  %v2052_v48 = vadd.f32 %v2048_v43, %v2046_v33 }
 0x6cd   :  { %2177 = vst.msk [vmem:[#allocation3 + $0x18] sm:$0xff] %vm2037_vm10, %v2174_v40  ;;  %v2182_v50 = vadd.f32 %v2179_v34, %v2048_v43  ;;  %2039 = vst.msk [vmem:[#allocation3 + $0x10] sm:$0xff] %vm2037_vm10, %v2035_v37  ;;  %v2183_v51 = vadd.f32 %v2180_v41, %v2048_v43  ;;  %v2184_v49 = vadd.f32 %v2181_v44, %v2048_v43 }
 0x6ce   :  { %2040 = vst.msk [vmem:[#allocation3 + $0x20] sm:$0xff] %vm2037_vm10, %v2036_v38  ;;  %2178 = vst.msk [vmem:[#allocation3 + $0x28] sm:$0xff] %vm2037_vm10, %v2175_v46  ;;  %v2053_v52 = vmax.f32 %v2050_v28, 0.0  ;;  %v2054_v53 = vmax.f32 %v2051_v47, 0.0  ;;  %v2055_v54 = vmax.f32 %v2052_v48, 0.0  ;;  %v2082_v5 = vmul.f32 %v2080_v42, %v5560_v3 }
 0x6cf   :  { %v2185_v55 = vmax.f32 %v2182_v50, 0.0  ;;  %v2099_v56 = vpop.permute.xlu1 %2098  ;;  %v2067_v57 = vpop.permute.xlu0 %2066  ;;  %v2186_v58 = vmax.f32 %v2183_v51, 0.0  ;;  %v2187_v60 = vmax.f32 %v2184_v49, 0.0  ;;  %v2083_v6 = vmul.f32 %v2080_v42, %v5558_v2 }
 0x6d0   :  { %2057 = vst.msk [vmem:[#allocation3] sm:$0xff] %vm2056_vm11, %v2053_v52  ;;  %2058 = vst.msk [vmem:[#allocation3 + $0x10] sm:$0xff] %vm2056_vm11, %v2054_v53  ;;  %v2069_v62 = vadd.f32 %v2067_v57, %v2063_v45  ;;  %v2070_v63 = vadd.f32 %v2067_v57, %v2064_v25  ;;  %v2071_v4 = vadd.f32 %v2067_v57, %v2065_v29  ;;  %v5019_v52 = vld [vmem:[%s6542_s13 + $0x160] ss:$24 sps:$4 sm:$0xff]  }
 0x6d1   :  { %2188 = vst.msk [vmem:[#allocation3 + $0x8] sm:$0xff] %vm2056_vm11, %v2185_v55  ;;  %2059 = vst.msk [vmem:[#allocation3 + $0x20] sm:$0xff] %vm2056_vm11, %v2055_v54  ;;  %v2084_v7 = vmul.f32 %v2080_v42, %v5564_v8  ;;  %v2101_v17 = vmul.f32 %v2099_v56, %v5560_v3  ;;  %v2102_v19 = vmul.f32 %v2099_v56, %v5558_v2 }
 0x6d2   :  { %2189 = vst.msk [vmem:[#allocation3 + $0x18] sm:$0xff] %vm2056_vm11, %v2186_v58  ;;  %2190 = vst.msk [vmem:[#allocation3 + $0x28] sm:$0xff] %vm2056_vm11, %v2187_v60  ;;  %v2072_v9 = vmax.f32 %v2069_v62, 0.0  ;;  %v2073_v10 = vmax.f32 %v2070_v63, 0.0  ;;  %v2074_v11 = vmax.f32 %v2071_v4, 0.0  ;;  %v2103_v20 = vmul.f32 %v2099_v56, %v5564_v8 }
 0x6d3   :  { %v2118_v12 = vpop.permute.xlu1 %2117  ;;  %v2086_v13 = vpop.permute.xlu0 %2085  ;;  %v5024_v56 = vld [vmem:[%s6542_s13 + $0x134] ss:$24 sps:$4 sm:$0xff]   ;;  %v5022_v58 = vld [vmem:[%s6542_s13 + $0x130] ss:$24 sps:$4 sm:$0xff]   ;;  %v5027_v60 = vld [vmem:[%s6542_s13 + $0x104] ss:$24 sps:$4 sm:$0xff]  }
 0x6d4   :  { %v2088_v14 = vadd.f32 %v2086_v13, %v2082_v5  ;;  %2076 = vst.msk [vmem:[#allocation3] sm:$0xff] %vm2075_vm12, %v2072_v9  ;;  %2077 = vst.msk [vmem:[#allocation3 + $0x10] sm:$0xff] %vm2075_vm12, %v2073_v10  ;;  %v2089_v15 = vadd.f32 %v2086_v13, %v2083_v6  ;;  %v2090_v16 = vadd.f32 %v2086_v13, %v2084_v7  ;;  %v5025_v63 = vld [vmem:[%s6542_s13 + $0x100] ss:$24 sps:$4 sm:$0xff]   ;;  %v5030_v5 = vld [vmem:[%s6542_s13 + $0xd4] ss:$24 sps:$4 sm:$0xff]  }
 0x6d5   :  { %2078 = vst.msk [vmem:[#allocation3 + $0x20] sm:$0xff] %vm2075_vm12, %v2074_v11  ;;  %v2120_v30 = vmul.f32 %v2118_v12, %v5560_v3  ;;  %v2121_v39 = vmul.f32 %v2118_v12, %v5558_v2  ;;  %v2122_v40 = vmul.f32 %v2118_v12, %v5564_v8  ;;  %v5028_v6 = vld [vmem:[%s6542_s13 + $0xd0] ss:$24 sps:$4 sm:$0xff]   ;;  %v5033_v7 = vld [vmem:[%s6542_s13 + $0xa4] ss:$24 sps:$4 sm:$0xff]  }
 0x6d6   :  { %v2091_v18 = vmax.f32 %v2088_v14, 0.0  ;;  %v2092_v21 = vmax.f32 %v2089_v15, 0.0  ;;  %v2093_v22 = vmax.f32 %v2090_v16, 0.0  ;;  %v5031_v9 = vld [vmem:[%s6542_s13 + $0xa0] ss:$24 sps:$4 sm:$0xff]  }
 0x6d7   :  { %v2137_v23 = vpop.permute.xlu1 %2136  ;;  %v2105_v24 = vpop.permute.xlu0 %2104  ;;  %v5036_v10 = vld [vmem:[%s6542_s13 + $0x74] ss:$24 sps:$4 sm:$0xff]   ;;  %v5034_v11 = vld [vmem:[%s6542_s13 + $0x70] ss:$24 sps:$4 sm:$0xff]   ;;  %v5039_v12 = vld [vmem:[%s6542_s13 + $0x44] ss:$24 sps:$4 sm:$0xff]  }
 0x6d8   :  { %2095 = vst.msk [vmem:[#allocation3] sm:$0xff] %vm2094_vm13, %v2091_v18  ;;  %v2107_v26 = vadd.f32 %v2105_v24, %v2101_v17  ;;  %v2192_v27 = vld [vmem:[#allocation3 + $0x8] sm:$0xff]  ;;  %2096 = vst.msk [vmem:[#allocation3 + $0x10] sm:$0xff] %vm2094_vm13, %v2092_v21  ;;  %v2139_v31 = vmul.f32 %v2137_v23, %v5560_v3  ;;  %v2108_v32 = vadd.f32 %v2105_v24, %v2102_v19  ;;  %v5037_v13 = vld [vmem:[%s6542_s13 + $0x40] ss:$24 sps:$4 sm:$0xff]  }
 0x6d9   :  { %2097 = vst.msk [vmem:[#allocation3 + $0x20] sm:$0xff] %vm2094_vm13, %v2093_v22  ;;  %v2109_v33 = vadd.f32 %v2105_v24, %v2103_v20  ;;  %v2194_v34 = vld [vmem:[#allocation3 + $0x18] sm:$0xff]  ;;  %v2140_v35 = vmul.f32 %v2137_v23, %v5558_v2  ;;  %v2141_v36 = vmul.f32 %v2137_v23, %v5564_v8  ;;  %v2196_v49 = vld [vmem:[#allocation3 + $0x28] sm:$0xff] }
 0x6da   :  { %v2110_v37 = vmax.f32 %v2107_v26, 0.0  ;;  %v2198_v38 = vpack.c.bf16 %v2194_v34, %v2192_v27  ;;  %v2111_v42 = vmax.f32 %v2108_v32, 0.0  ;;  %v2200_v57 = vpack.c.bf16 %v2196_v49, %v2196_v49  ;;  %v5042_v14 = vld [vmem:[%s6542_s13 + $0x14] ss:$24 sps:$4 sm:$0xff]   ;;  %v5040_v15 = vld [vmem:[%s6542_s13 + $0x10] ss:$24 sps:$4 sm:$0xff]  }
 0x6db   :  { %v2112_v43 = vmax.f32 %v2109_v33, 0.0  ;;  %v2143_v41 = vpop.permute.xlu1 %2142  ;;  %v2124_v44 = vpop.permute.xlu0 %2123  ;;  %v5045_v16 = vld [vmem:[%s6542_s13 + $0x1f4] ss:$24 sps:$4 sm:$0xff]   ;;  %v5043_v17 = vld [vmem:[%s6542_s13 + $0x1f0] ss:$24 sps:$4 sm:$0xff]   ;;  %v2760_v49 = vld [vmem:[%s6543_s14 + $0x20] sm:$0xff] }
 0x6dc   :  { %2114 = vst.msk [vmem:[#allocation3] sm:$0xff] %vm2113_vm14, %v2110_v37  ;;  %4377 = vmatprep.mubr.msk.bf16.mxu1 %vm1870_vm8, %v2198_v38  ;;  %4379 = vmatprep.mubr.msk.bf16.mxu0 %vm1870_vm8, %v2198_v38  ;;  %v2145_v3 = vadd.f32 %v2143_v41, %v2139_v31  ;;  %v2146_v45 = vadd.f32 %v2143_v41, %v2140_v35  ;;  %2115 = vst.msk [vmem:[#allocation3 + $0x10] sm:$0xff] %vm2113_vm14, %v2111_v42  ;;  %v5048_v18 = vld [vmem:[%s6542_s13 + $0x1c4] ss:$24 sps:$4 sm:$0xff]   ;;  %v5046_v19 = vld [vmem:[%s6542_s13 + $0x1c0] ss:$24 sps:$4 sm:$0xff]  }
 0x6dd   :  { %v2147_v46 = vadd.f32 %v2143_v41, %v2141_v36  ;;  %2116 = vst.msk [vmem:[#allocation3 + $0x20] sm:$0xff] %vm2113_vm14, %v2112_v43  ;;  %v2126_v2 = vadd.f32 %v2124_v44, %v2120_v30  ;;  %v2127_v28 = vadd.f32 %v2124_v44, %v2121_v39  ;;  %v2128_v8 = vadd.f32 %v2124_v44, %v2122_v40  ;;  %v5051_v20 = vld [vmem:[%s6542_s13 + $0x194] ss:$24 sps:$4 sm:$0xff]   ;;  %v5049_v21 = vld [vmem:[%s6542_s13 + $0x190] ss:$24 sps:$4 sm:$0xff]   ;;  %v4384_v43 = vld [vmem:[%s6543_s14 + $0x38] sm:$0xff] }
 0x6de   :  { %v2148_v47 = vmax.f32 %v2145_v3, 0.0  ;;  %v2149_v48 = vmax.f32 %v2146_v45, 0.0  ;;  %v4383_v42 = vld [vmem:[%s6543_s14 + $0x30] sm:$0xff]  ;;  %v4385_v41 = vld [vmem:[%s6543_s14 + $0x40] sm:$0xff]  ;;  %v4386_v44 = vld [vmem:[%s6543_s14 + $0x48] sm:$0xff] }
 0x6df   :  { %v2150_v50 = vmax.f32 %v2147_v46, 0.0  ;;  %v2129_v25 = vmax.f32 %v2126_v2, 0.0  ;;  %v2130_v29 = vmax.f32 %v2127_v28, 0.0  ;;  %v2131_v51 = vmax.f32 %v2128_v8, 0.0  ;;  %v4387_v3 = vld [vmem:[%s6543_s14 + $0x50] sm:$0xff]  ;;  %v4388_v45 = vld [vmem:[%s6543_s14 + $0x58] sm:$0xff] }
 0x6e0   :  { %v2756_v46 = vld [vmem:[%s6543_s14] sm:$0xff]  ;;  %v2757_v2 = vld [vmem:[%s6543_s14 + $0x8] sm:$0xff] }
 0x6e1   :  { %2133 = vst.msk [vmem:[#allocation3] sm:$0xff] %vm2132_vm15, %v2129_v25  ;;  %2134 = vst.msk [vmem:[#allocation3 + $0x10] sm:$0xff] %vm2132_vm15, %v2130_v29  ;;  %v2759_v25 = vld [vmem:[%s6543_s14 + $0x18] sm:$0xff] }
 0x6e2   :  { %2135 = vst.msk [vmem:[#allocation3 + $0x20] sm:$0xff] %vm2132_vm15, %v2131_v51 }
 0x6e3   :  { %2152 = vst.msk [vmem:[#allocation3] sm:$0xff] %vm2151_vm1, %v2148_v47  ;;  %2153 = vst.msk [vmem:[#allocation3 + $0x10] sm:$0xff] %vm2151_vm1, %v2149_v48  ;;  %v2758_v47 = vld [vmem:[%s6543_s14 + $0x10] sm:$0xff] }
 0x6e4   :  { %2154 = vst.msk [vmem:[#allocation3 + $0x20] sm:$0xff] %vm2151_vm1, %v2150_v50 }
 0x6ea   :  { %v2191_v53 = vld [vmem:[#allocation3] sm:$0xff]  ;;  %v2193_v54 = vld [vmem:[#allocation3 + $0x10] sm:$0xff] }
 0x6eb   :  { %v2197_v55 = vpack.c.bf16 %v2193_v54, %v2191_v53  ;;  %v2195_v62 = vld [vmem:[#allocation3 + $0x20] sm:$0xff]  ;;  %v4401_v54 = vld [vmem:[%s6543_s14 + $0x60] sm:$0xff] }
 0x6ec   :  { %v2199_v4 = vpack.c.bf16 %v2195_v62, %v2195_v62  ;;  %v4406_v62 = vld [vmem:[%s6543_s14 + $0x88] sm:$0xff] }
 0x6ed   :  { %2636 = vmatmul.mubr.bf16.vlgmr.msra.gmra.mxu1 %v2197_v55  ;;  %2687 = vmatmul.mubr.bf16.vlgmr.msra.gmra.mxu0 %v2197_v55 }
 0x6ee   :  { %2706 = vmatpush1.bf16.msra.mxu1 %v5019_v52  ;;  %4378 = vmatprep.mubr.msk.bf16.mxu1 %vm1870_vm8, %v2200_v57 }
 0x6ef   :  { %4380 = vmatprep.mubr.msk.bf16.mxu0 %vm1870_vm8, %v2200_v57  ;;  %2707 = vmatprep.subr.bf16.mxu1 %v5024_v56  ;;  %v4402_v56 = vld [vmem:[%s6543_s14 + $0x68] sm:$0xff] }
 0x6f2   :  { %2708 = vmatpush1.bf16.msra.mxu1 %v5022_v58  ;;  %v4404_v58 = vld [vmem:[%s6543_s14 + $0x78] sm:$0xff] }
 0x6f3   :  { %2709 = vmatprep.subr.bf16.mxu1 %v5027_v60  ;;  %v4405_v60 = vld [vmem:[%s6543_s14 + $0x80] sm:$0xff] }
 0x6f5   :  { %2646 = vmatmul.mubr.bf16.gmra.mxu1 %v2199_v4  ;;  %2697 = vmatmul.mubr.bf16.gmra.mxu0 %v2199_v4 }
 0x6f6   :  { %2710 = vmatpush1.bf16.msra.mxu1 %v5025_v63  ;;  %4381 = vmatprep.mubr.msk.bf16.mxu1 %vm1870_vm8, %v2198_v38  ;;  %v5052_v63 = vld [vmem:[%s6545_s16 + $0xa8] ss:$12 sps:$4 sm:$0xff]  }
 0x6f7   :  { %2711 = vmatprep.subr.bf16.mxu1 %v5030_v5  ;;  %2852 = vmatprep.mubr.f32.mxu0 %v5305_v0  ;;  %v5055_v5 = vld [vmem:[%s6545_s16 + $0xb0] ss:$12 sps:$4 sm:$0xff]  }
 0x6fa   :  { %2712 = vmatpush1.bf16.msra.mxu1 %v5028_v6  ;;  %v5056_v6 = vld [vmem:[%s6545_s16 + $0x90] ss:$12 sps:$4 sm:$0xff]  }
 0x6fb   :  { %2713 = vmatprep.subr.bf16.mxu1 %v5033_v7  ;;  %v5058_v7 = vld [vmem:[%s6545_s16 + $0x94] ss:$12 sps:$4 sm:$0xff]  }
 0x6fe   :  { %2714 = vmatpush1.bf16.msra.mxu1 %v5031_v9  ;;  %v5059_v9 = vld [vmem:[%s6545_s16 + $0x98] ss:$12 sps:$4 sm:$0xff]  }
 0x6ff   :  { %2715 = vmatprep.subr.bf16.mxu1 %v5036_v10  ;;  %v5060_v10 = vld [vmem:[%s6545_s16 + $0x78] ss:$12 sps:$4 sm:$0xff]  }
 0x702   :  { %2716 = vmatpush1.bf16.msra.mxu1 %v5034_v11  ;;  %v5062_v11 = vld [vmem:[%s6545_s16 + $0x7c] ss:$12 sps:$4 sm:$0xff]  }
 0x703   :  { %2717 = vmatprep.subr.bf16.mxu1 %v5039_v12  ;;  %v5063_v12 = vld [vmem:[%s6545_s16 + $0x80] ss:$12 sps:$4 sm:$0xff]  }
 0x706   :  { %2718 = vmatpush1.bf16.msra.mxu1 %v5037_v13  ;;  %v5064_v13 = vld [vmem:[%s6545_s16 + $0x60] ss:$12 sps:$4 sm:$0xff]  }
 0x707   :  { %2719 = vmatprep.subr.bf16.mxu1 %v5042_v14  ;;  %v5066_v14 = vld [vmem:[%s6545_s16 + $0x64] ss:$12 sps:$4 sm:$0xff]  }
 0x70a   :  { %2720 = vmatpush1.bf16.msra.mxu1 %v5040_v15  ;;  %v5067_v15 = vld [vmem:[%s6545_s16 + $0x68] ss:$12 sps:$4 sm:$0xff]  }
 0x70b   :  { %2731 = vmatprep.subr.bf16.mxu1 %v5045_v16  ;;  %v5070_v16 = vld [vmem:[%s6545_s16 + $0x4c] ss:$12 sps:$4 sm:$0xff]  }
 0x70e   :  { %2732 = vmatpush2.bf16.msra.mxu1 %v5043_v17  ;;  %v5068_v17 = vld [vmem:[%s6545_s16 + $0x48] ss:$12 sps:$4 sm:$0xff]  }
 0x70f   :  { %2733 = vmatprep.subr.bf16.mxu1 %v5048_v18  ;;  %v5071_v18 = vld [vmem:[%s6545_s16 + $0x50] ss:$12 sps:$4 sm:$0xff]  }
 0x712   :  { %2734 = vmatpush2.bf16.msra.mxu1 %v5046_v19  ;;  %v5074_v19 = vld [vmem:[%s6545_s16 + $0x34] ss:$12 sps:$4 sm:$0xff]  }
 0x713   :  { %2735 = vmatprep.subr.bf16.mxu1 %v5051_v20  ;;  %v5072_v20 = vld [vmem:[%s6545_s16 + $0x30] ss:$12 sps:$4 sm:$0xff]  }
 0x716   :  { %2736 = vmatpush2.bf16.msra.mxu1 %v5049_v21  ;;  %v5075_v21 = vld [vmem:[%s6545_s16 + $0x38] ss:$12 sps:$4 sm:$0xff]  }
 0x719   :  { %2738 = vmatmul.mubr.bf16.vlgmr.msra.gmra.mxu1 %v2197_v55  ;;  %v2761_v55 = vld [vmem:[%s6543_s14 + $0x28] sm:$0xff] }
 0x71a   :  { %4382 = vmatprep.mubr.msk.bf16.mxu1 %vm1870_vm8, %v2200_v57  ;;  %v4403_v57 = vld [vmem:[%s6543_s14 + $0x70] sm:$0xff] }
 0x721   :  { %2748 = vmatmul.mubr.bf16.gmra.mxu1 %v2199_v4  ;;  %v5054_v4 = vld [vmem:[%s6545_s16 + $0xac] ss:$12 sps:$4 sm:$0xff]  }
 0x722   :  { %3097 = vmatprep.mubr.f32.mxu1 %v5305_v0 }
 0x7ad   :  { %v2637_v22 = vpop.f32.mrf.mxu1  ;;  %v2688_v23 = vpop.f32.mrf.mxu0 }
 0x7af   :  { %v2639_v24 = vpop.f32.mrf.mxu1  ;;  %v2690_v26 = vpop.f32.mrf.mxu0 }
 0x7b1   :  { %v2641_v27 = vpop.f32.mrf.mxu1  ;;  %v2692_v30 = vpop.f32.mrf.mxu0 }
 0x7b3   :  { %v2643_v31 = vpop.f32.mrf.mxu1  ;;  %v2694_v32 = vpop.f32.mrf.mxu0 }
 0x7b5   :  { %v2647_v33 = vpop.f32.mrf.mxu1  ;;  %v2698_v34 = vpop.f32.mrf.mxu0 }
 0x7b7   :  { %v2649_v35 = vpop.f32.mrf.mxu1  ;;  %v2700_v36 = vpop.f32.mrf.mxu0 }
 0x7b8   :  { %2814 = vmatprep.subr.mxu0 %v2700_v36  ;;  %v5091_v36 = vld [vmem:[%s6545_s16 + $0xf8] ss:$12 sps:$4 sm:$0xff]  }
 0x7b9   :  { %v2651_v37 = vpop.f32.mrf.mxu1  ;;  %v2702_v38 = vpop.f32.mrf.mxu0  ;;  %2815 = vmatpush1.msra.mxu0 %v2698_v34  ;;  %v5090_v34 = vld [vmem:[%s6545_s16 + $0xf4] ss:$12 sps:$4 sm:$0xff]  }
 0x7ba   :  { %2816 = vmatprep.subr.mxu0 %v2694_v32  ;;  %v5084_v32 = vld [vmem:[%s6545_s16 + $0x108] ss:$12 sps:$4 sm:$0xff]   ;;  %v5092_v38 = vld [vmem:[%s6545_s16 + $0xd8] ss:$12 sps:$4 sm:$0xff]  }
 0x7bb   :  { %v2652_v39 = vpop.f32.mrf.mxu1  ;;  %v2703_v40 = vpop.f32.mrf.mxu0  ;;  %2817 = vmatpush1.msra.mxu0 %v2692_v30  ;;  %v5083_v30 = vld [vmem:[%s6545_s16 + $0x8] ss:$12 sps:$4 sm:$0xff]  }
 0x7bc   :  { %2818 = vmatprep.subr.mxu0 %v2690_v26  ;;  %v5082_v26 = vld [vmem:[%s6545_s16 + $0x4] ss:$12 sps:$4 sm:$0xff]   ;;  %v5094_v37 = vld [vmem:[%s6545_s16 + $0xdc] ss:$12 sps:$4 sm:$0xff]   ;;  %v5095_v39 = vld [vmem:[%s6545_s16 + $0xe0] ss:$12 sps:$4 sm:$0xff]  }
 0x7bd   :  { %2819 = vmatpush1.msra.mxu0 %v2688_v23  ;;  %v5076_v23 = vld [vmem:[%s6545_s16 + $0x18] ss:$12 sps:$4 sm:$0xff]  }
 0x7be   :  { %4389 = vmatmul.mubr.msk.f32.vlgmr.msra.gmra.mxu0 %vm2769_vm2, %v4383_v42  ;;  %2933 = vmatprep.subr.mxu0 %v2649_v35  ;;  %v5088_v35 = vld [vmem:[%s6545_s16 + $0xf0] ss:$12 sps:$4 sm:$0xff]   ;;  %v5096_v42 = vld [vmem:[%s6545_s16 + $0xc0] ss:$12 sps:$4 sm:$0xff]  }
 0x7bf   :  { %2934 = vmatpush1.msra.mxu0 %v2647_v33  ;;  %2858 = vmatprep.mubr.f32.mxu0 %v5305_v0  ;;  %v5087_v33 = vld [vmem:[%s6545_s16 + $0x110] ss:$12 sps:$4 sm:$0xff]  }
 0x7c0   :  { %2935 = vmatprep.subr.mxu0 %v2643_v31  ;;  %v5086_v31 = vld [vmem:[%s6545_s16 + $0x10c] ss:$12 sps:$4 sm:$0xff]   ;;  %v5098_v40 = vld [vmem:[%s6545_s16 + $0xc4] ss:$12 sps:$4 sm:$0xff]  }
 0x7c1   :  { %2936 = vmatpush1.msra.mxu0 %v2641_v27  ;;  %v5080_v27 = vld [vmem:[%s6545_s16] ss:$12 sps:$4 sm:$0xff]  }
 0x7c2   :  { %4390 = vmatmul.mubr.msk.f32.gmra.mxu0 %vm2769_vm2, %v4384_v43  ;;  %2937 = vmatprep.subr.mxu0 %v2639_v24  ;;  %v5079_v24 = vld [vmem:[%s6545_s16 + $0x20] ss:$12 sps:$4 sm:$0xff]   ;;  %v5099_v43 = vld [vmem:[%s6545_s16 + $0xc8] ss:$12 sps:$4 sm:$0xff]  }
 0x7c3   :  { %2938 = vmatpush1.msra.mxu0 %v2637_v22  ;;  %2864 = vmatprep.mubr.f32.mxu0 %v5305_v0  ;;  %v5078_v22 = vld [vmem:[%s6545_s16 + $0x1c] ss:$12 sps:$4 sm:$0xff]  }
 0x7c4   :  { %3437 = vmatprep.subr.bf16.mxu0 %v5054_v4 }
 0x7c6   :  { %4391 = vmatmul.mubr.msk.f32.gmra.mxu0 %vm2769_vm2, %v4385_v41 }
 0x7c7   :  { %2870 = vmatprep.mubr.f32.mxu0 %v5305_v0 }
 0x7ca   :  { %4392 = vmatmul.mubr.msk.f32.gmra.mxu0 %vm2769_vm2, %v4386_v44 }
 0x7cb   :  { %2876 = vmatprep.mubr.f32.mxu0 %v5305_v0 }
 0x7ce   :  { %4393 = vmatmul.mubr.msk.f32.gmra.mxu0 %vm2769_vm2, %v4387_v3 }
 0x7cf   :  { %2882 = vmatprep.mubr.f32.mxu0 %v5305_v0 }
 0x7d2   :  { %4394 = vmatmul.mubr.msk.f32.gmra.mxu0 %vm2769_vm2, %v4388_v45 }
 0x7d3   :  { %2971 = vmatprep.mubr.f32.mxu0 %v5305_v0 }
 0x7d6   :  { %4395 = vmatmul.mubr.msk.f32.vlgmr.msra.gmra.mxu0 %vm2769_vm2, %v2756_v46 }
 0x7d7   :  { %2977 = vmatprep.mubr.f32.mxu0 %v5305_v0  ;;  %3438 = vmatpush1.bf16.msra.mxu0 %v5052_v63 }
 0x7d8   :  { %3439 = vmatprep.subr.bf16.mxu0 %v5058_v7 }
 0x7d9   :  { %v2739_v28 = vpop.f32.mrf.mxu1 }
 0x7da   :  { %4396 = vmatmul.mubr.msk.f32.gmra.mxu0 %vm2769_vm2, %v2757_v2 }
 0x7db   :  { %v2741_v8 = vpop.f32.mrf.mxu1  ;;  %2983 = vmatprep.mubr.f32.mxu0 %v5305_v0  ;;  %3440 = vmatpush1.bf16.msra.mxu0 %v5056_v6 }
 0x7dc   :  { %3441 = vmatprep.subr.bf16.mxu0 %v5062_v11 }
 0x7dd   :  { %v2743_v48 = vpop.f32.mrf.mxu1 }
 0x7de   :  { %4397 = vmatmul.mubr.msk.f32.gmra.mxu0 %vm2769_vm2, %v2758_v47 }
 0x7df   :  { %v2745_v50 = vpop.f32.mrf.mxu1  ;;  %2989 = vmatprep.mubr.f32.mxu0 %v5305_v0  ;;  %3442 = vmatpush1.bf16.msra.mxu0 %v5060_v10 }
 0x7e0   :  { %3443 = vmatprep.subr.bf16.mxu0 %v5066_v14 }
 0x7e1   :  { %v2749_v29 = vpop.f32.mrf.mxu1 }
 0x7e2   :  { %4398 = vmatmul.mubr.msk.f32.gmra.mxu0 %vm2769_vm2, %v2759_v25 }
 0x7e3   :  { %v2751_v51 = vpop.f32.mrf.mxu1  ;;  %2995 = vmatprep.mubr.f32.mxu0 %v5305_v0  ;;  %3444 = vmatpush1.bf16.msra.mxu0 %v5064_v13 }
 0x7e4   :  { %3059 = vmatprep.subr.mxu1 %v2751_v51  ;;  %3445 = vmatprep.subr.bf16.mxu0 %v5070_v16 }
 0x7e5   :  { %v2753_v52 = vpop.f32.mrf.mxu1  ;;  %3060 = vmatpush1.msra.mxu1 %v2749_v29 }
 0x7e6   :  { %3061 = vmatprep.subr.mxu1 %v2745_v50  ;;  %4399 = vmatmul.mubr.msk.f32.gmra.mxu0 %vm2769_vm2, %v2760_v49 }
 0x7e7   :  { %v2754_v53 = vpop.f32.mrf.mxu1  ;;  %3062 = vmatpush1.msra.mxu1 %v2743_v48  ;;  %3001 = vmatprep.mubr.f32.mxu0 %v5305_v0 }
 0x7e8   :  { %3063 = vmatprep.subr.mxu1 %v2741_v8  ;;  %3446 = vmatpush1.bf16.msra.mxu0 %v5068_v17 }
 0x7e9   :  { %3064 = vmatpush1.msra.mxu1 %v2739_v28  ;;  %3447 = vmatprep.subr.bf16.mxu0 %v5074_v19 }
 0x7ea   :  { %4407 = vmatmul.mubr.msk.f32.vlgmr.msra.gmra.mxu1 %vm2769_vm2, %v4401_v54  ;;  %4400 = vmatmul.mubr.msk.f32.gmra.mxu0 %vm2769_vm2, %v2761_v55 }
 0x7eb   :  { %3103 = vmatprep.mubr.f32.mxu1 %v5305_v0  ;;  %3500 = vmatprep.subr.bf16.mxu1 %v5307_v1 }
 0x7ec   :  { %3501 = vmatpush1.bf16.msra.mxu1 %v5055_v5  ;;  %3448 = vmatpush1.bf16.msra.mxu0 %v5072_v20 }
 0x7ed   :  { %3502 = vmatprep.subr.bf16.mxu1 %v5307_v1  ;;  %3449 = vmatprep.subr.bf16.mxu0 %v5078_v22 }
 0x7ee   :  { %4408 = vmatmul.mubr.msk.f32.gmra.mxu1 %vm2769_vm2, %v4402_v56  ;;  %v3146_v56 = vld [vmem:[#allocation15] sm:$0x3] }
 0x7ef   :  { %3109 = vmatprep.mubr.f32.mxu1 %v5305_v0  ;;  %v6157_v63 = vrot.slane %v3146_v56, %v5472_v61  ;;  %v3151_v7 = vrot.slane %v3146_v56, %v5467_v59 }
 0x7f0   :  { %3503 = vmatpush1.bf16.msra.mxu1 %v5059_v9  ;;  %3450 = vmatpush1.bf16.msra.mxu0 %v5076_v23 }
 0x7f1   :  { %3504 = vmatprep.subr.bf16.mxu1 %v5307_v1  ;;  %3451 = vmatprep.subr.bf16.mxu0 %v5082_v26 }
 0x7f2   :  { %4409 = vmatmul.mubr.msk.f32.gmra.mxu1 %vm2769_vm2, %v4403_v57 }
 0x7f3   :  { %3115 = vmatprep.mubr.f32.mxu1 %v5305_v0 }
 0x7f4   :  { %3505 = vmatpush1.bf16.msra.mxu1 %v5063_v12  ;;  %3452 = vmatpush1.bf16.msra.mxu0 %v5080_v27 }
 0x7f5   :  { %3506 = vmatprep.subr.bf16.mxu1 %v5307_v1  ;;  %3461 = vmatprep.subr.bf16.mxu0 %v5086_v31 }
 0x7f6   :  { %4410 = vmatmul.mubr.msk.f32.gmra.mxu1 %vm2769_vm2, %v4404_v58 }
 0x7f7   :  { %3121 = vmatprep.mubr.f32.mxu1 %v5305_v0 }
 0x7f8   :  { %3507 = vmatpush1.bf16.msra.mxu1 %v5067_v15  ;;  %3462 = vmatpush2.bf16.msra.mxu0 %v5084_v32 }
 0x7f9   :  { %3508 = vmatprep.subr.bf16.mxu1 %v5307_v1  ;;  %3463 = vmatprep.subr.bf16.mxu0 %v5090_v34 }
 0x7fa   :  { %4411 = vmatmul.mubr.msk.f32.gmra.mxu1 %vm2769_vm2, %v4405_v60 }
 0x7fb   :  { %3127 = vmatprep.mubr.f32.mxu1 %v5305_v0 }
 0x7fc   :  { %3509 = vmatpush1.bf16.msra.mxu1 %v5071_v18  ;;  %3464 = vmatpush2.bf16.msra.mxu0 %v5088_v35 }
 0x7fd   :  { %3510 = vmatprep.subr.bf16.mxu1 %v5307_v1  ;;  %3465 = vmatprep.subr.bf16.mxu0 %v5094_v37 }
 0x7fe   :  { %4412 = vmatmul.mubr.msk.f32.gmra.mxu1 %vm2769_vm2, %v4406_v62 }
 0x800   :  { %3511 = vmatpush1.bf16.msra.mxu1 %v5075_v21  ;;  %3466 = vmatpush2.bf16.msra.mxu0 %v5092_v38 }
 0x801   :  { %3512 = vmatprep.subr.bf16.mxu1 %v5307_v1  ;;  %3467 = vmatprep.subr.bf16.mxu0 %v5098_v40 }
 0x804   :  { %3513 = vmatpush1.bf16.msra.mxu1 %v5079_v24  ;;  %3468 = vmatpush2.bf16.msra.mxu0 %v5096_v42 }
 0x805   :  { %3514 = vmatprep.subr.bf16.mxu1 %v5307_v1  ;;  %4589 = vmatprep.subr.mxu0 %v5305_v0 }
 0x808   :  { %3515 = vmatpush1.bf16.msra.mxu1 %v5083_v30 }
 0x809   :  { %3524 = vmatprep.subr.bf16.mxu1 %v5307_v1 }
 0x80c   :  { %3525 = vmatpush2.bf16.msra.mxu1 %v5087_v33 }
 0x80d   :  { %3526 = vmatprep.subr.bf16.mxu1 %v5307_v1 }
 0x810   :  { %3527 = vmatpush2.bf16.msra.mxu1 %v5091_v36 }
 0x811   :  { %3528 = vmatprep.subr.bf16.mxu1 %v5307_v1 }
 0x814   :  { %3529 = vmatpush2.bf16.msra.mxu1 %v5095_v39 }
 0x815   :  { %3530 = vmatprep.subr.bf16.mxu1 %v5307_v1 }
 0x818   :  { %3531 = vmatpush2.bf16.msra.mxu1 %v5099_v43 }
 0x819   :  { %4742 = vmatprep.subr.mxu1 %v5305_v0 }
 0x87e   :  { %v2854_v41 = vpop.f32.mrf.mxu0 }
 0x880   :  { %v2856_v44 = vpop.f32.mrf.mxu0 }
 0x882   :  { %v2860_v3 = vpop.f32.mrf.mxu0 }
 0x884   :  { %v2862_v45 = vpop.f32.mrf.mxu0 }
 0x886   :  { %v2866_v1 = vpop.f32.mrf.mxu0 }
 0x888   :  { %v2868_v46 = vpop.f32.mrf.mxu0 }
 0x88a   :  { %v2872_v2 = vpop.f32.mrf.mxu0 }
 0x88c   :  { %v2874_v28 = vpop.f32.mrf.mxu0 }
 0x88e   :  { %v2878_v8 = vpop.f32.mrf.mxu0 }
 0x890   :  { %v2880_v47 = vpop.f32.mrf.mxu0 }
 0x892   :  { %v6152_v48 = vpop.f32.mrf.mxu0 }
 0x894   :  { %v6154_v50 = vpop.f32.mrf.mxu0 }
 0x896   :  { %v2973_v25 = vpop.f32.mrf.mxu0 }
 0x897   :  { %v2974_v58 = vadd.f32 %v2973_v25, %v2854_v41 }
 0x898   :  { %v2975_v29 = vpop.f32.mrf.mxu0 }
 0x899   :  { %v2976_v57 = vadd.f32 %v2975_v29, %v2856_v44 }
 0x89a   :  { %v2979_v51 = vpop.f32.mrf.mxu0 }
 0x89b   :  { %v2980_v4 = vadd.f32 %v2979_v51, %v2860_v3 }
 0x89c   :  { %v2981_v49 = vpop.f32.mrf.mxu0 }
 0x89d   :  { %v2982_v10 = vadd.f32 %v2981_v49, %v2862_v45 }
 0x89e   :  { %v2985_v52 = vpop.f32.mrf.mxu0 }
 0x89f   :  { %v2986_v20 = vadd.f32 %v2985_v52, %v2866_v1 }
 0x8a0   :  { %v2987_v53 = vpop.f32.mrf.mxu0 }
 0x8a1   :  { %v2988_v19 = vadd.f32 %v2987_v53, %v2868_v46 }
 0x8a2   :  { %v2991_v54 = vpop.f32.mrf.mxu0 }
 0x8a3   :  { %v2992_v24 = vadd.f32 %v2991_v54, %v2872_v2 }
 0x8a4   :  { %v2993_v60 = vpop.f32.mrf.mxu0 }
 0x8a5   :  { %v2994_v33 = vadd.f32 %v2993_v60, %v2874_v28 }
 0x8a6   :  { %v2997_v12 = vpop.f32.mrf.mxu0 }
 0x8a7   :  { %v2998_v45 = vadd.f32 %v2997_v12, %v2878_v8 }
 0x8a8   :  { %v2999_v21 = vpop.f32.mrf.mxu0 }
 0x8a9   :  { %v3000_v44 = vadd.f32 %v2999_v21, %v2880_v47 }
 0x8aa   :  { %v3099_v55 = vpop.f32.mrf.mxu1  ;;  %v3003_v36 = vpop.f32.mrf.mxu0 }
 0x8ab   :  { %v3134_v6 = vadd.f32 %v3099_v55, %v2974_v58  ;;  %v3004_v28 = vadd.f32 %v3003_v36, %v6152_v48  ;;  %v4456_v36 = vld [vmem:[%s6546_s17 + $0x70] sm:$0xff] }
 0x8ac   :  { %v3101_v62 = vpop.f32.mrf.mxu1  ;;  %v3005_v1 = vpop.f32.mrf.mxu0 }
 0x8ad   :  { %v3135_v5 = vadd.f32 %v3101_v62, %v2976_v57  ;;  %v3158_v17 = vadd.f32 %v3151_v7, %v3134_v6  ;;  %v3006_v54 = vadd.f32 %v3005_v1, %v6154_v50  ;;  %v3558_v1 = vld [vmem:[%s6546_s17 + $0x8] sm:$0xff] }
 0x8ae   :  { %v3105_v9 = vpop.f32.mrf.mxu1 }
 0x8af   :  { %v3136_v11 = vadd.f32 %v3105_v9, %v2980_v4  ;;  %v3159_v14 = vadd.f32 %v6157_v63, %v3135_v5  ;;  %v3170_v30 = vmax.f32 %v3158_v17, 0.0 }
 0x8b0   :  { %v3107_v13 = vpop.f32.mrf.mxu1 }
 0x8b1   :  { %v3160_v15 = vadd.f32 %v3151_v7, %v3136_v11  ;;  %v3137_v16 = vadd.f32 %v3107_v13, %v2982_v10  ;;  %v3171_v59 = vmax.f32 %v3159_v14, 0.0 }
 0x8b2   :  { %v3111_v18 = vpop.f32.mrf.mxu1 }
 0x8b3   :  { %v3161_v61 = vadd.f32 %v6157_v63, %v3137_v16  ;;  %v3172_v22 = vmax.f32 %v3160_v15, 0.0  ;;  %v3138_v31 = vadd.f32 %v3111_v18, %v2986_v20 }
 0x8b4   :  { %v3113_v23 = vpop.f32.mrf.mxu1 }
 0x8b5   :  { %v3173_v26 = vmax.f32 %v3161_v61, 0.0  ;;  %v3139_v27 = vadd.f32 %v3113_v23, %v2988_v19  ;;  %v3182_v37 = vpack.c.bf16 %v3172_v22, %v3170_v30  ;;  %v3162_v43 = vadd.f32 %v3151_v7, %v3138_v31 }
 0x8b6   :  { %v3117_v32 = vpop.f32.mrf.mxu1 }
 0x8b7   :  { %v3183_v34 = vpack.c.bf16 %v3173_v26, %v3171_v59  ;;  %v3140_v35 = vadd.f32 %v3117_v32, %v2992_v24  ;;  %v3163_v39 = vadd.f32 %v6157_v63, %v3139_v27  ;;  %v3174_v49 = vmax.f32 %v3162_v43, 0.0  ;;  %v4459_v43 = vld [vmem:[%s6546_s17 + $0x88] sm:$0xff] }
 0x8b8   :  { %v3119_v38 = vpop.f32.mrf.mxu1 }
 0x8b9   :  { %v3164_v40 = vadd.f32 %v3151_v7, %v3140_v35  ;;  %v3141_v42 = vadd.f32 %v3119_v38, %v2994_v33  ;;  %4449 = vmatprep.mubr.msk.bf16.mxu0 %vm306_vm3, %v3183_v34  ;;  %4452 = vmatprep.mubr.msk.bf16.mxu1 %vm306_vm3, %v3183_v34  ;;  %v3175_v25 = vmax.f32 %v3163_v39, 0.0  ;;  %v4455_v34 = vld [vmem:[%s6546_s17 + $0x68] sm:$0xff]  ;;  %v4457_v38 = vld [vmem:[%s6546_s17 + $0x78] sm:$0xff] }
 0x8ba   :  { %v3123_v41 = vpop.f32.mrf.mxu1  ;;  %3470 = vmatmul.mubr.bf16.vlgmr.msra.gmra.mxu0 %v3182_v37  ;;  %3533 = vmatmul.mubr.bf16.vlgmr.msra.gmra.mxu1 %v3182_v37  ;;  %v4463_v35 = vld [vmem:[%s6546_s17 + $0xa8] sm:$0xff]  ;;  %v4464_v37 = vld [vmem:[%s6546_s17 + $0xb0] sm:$0xff]  ;;  %v4465_v39 = vld [vmem:[%s6546_s17 + $0xb8] sm:$0xff] }
 0x8bb   :  { %v3165_v3 = vadd.f32 %v6157_v63, %v3141_v42  ;;  %v3176_v46 = vmax.f32 %v3164_v40, 0.0  ;;  %v3142_v52 = vadd.f32 %v3123_v41, %v2998_v45  ;;  %v4458_v40 = vld [vmem:[%s6546_s17 + $0x80] sm:$0xff]  ;;  %v4467_v41 = vld [vmem:[%s6546_s17 + $0xc8] sm:$0xff]  ;;  %v4461_v45 = vld [vmem:[%s6546_s17 + $0x98] sm:$0xff] }
 0x8bc   :  { %v3125_v2 = vpop.f32.mrf.mxu1  ;;  %v4466_v42 = vld [vmem:[%s6546_s17 + $0xc0] sm:$0xff] }
 0x8bd   :  { %v3177_v29 = vmax.f32 %v3165_v3, 0.0  ;;  %v3143_v51 = vadd.f32 %v3125_v2, %v3000_v44  ;;  %v3184_v47 = vpack.c.bf16 %v3176_v46, %v3174_v49  ;;  %v3166_v48 = vadd.f32 %v3151_v7, %v3142_v52  ;;  %v4460_v44 = vld [vmem:[%s6546_s17 + $0x90] sm:$0xff]  ;;  %v3557_v3 = vld [vmem:[%s6546_s17] sm:$0xff]  ;;  %v3562_v49 = vld [vmem:[%s6546_s17 + $0x28] sm:$0xff] }
 0x8be   :  { %v3129_v53 = vpop.f32.mrf.mxu1  ;;  %v4462_v46 = vld [vmem:[%s6546_s17 + $0xa0] sm:$0xff]  ;;  %v3559_v2 = vld [vmem:[%s6546_s17 + $0x10] sm:$0xff] }
 0x8bf   :  { %v3185_v55 = vpack.c.bf16 %v3177_v29, %v3175_v25  ;;  %v3144_v56 = vadd.f32 %v3129_v53, %v3004_v28  ;;  %v3167_v58 = vadd.f32 %v6157_v63, %v3143_v51  ;;  %v3178_v6 = vmax.f32 %v3166_v48, 0.0  ;;  %v3560_v28 = vld [vmem:[%s6546_s17 + $0x18] sm:$0xff]  ;;  %v4494_v25 = vld [vmem:[%s6546_s17 + $0xd0] sm:$0xff]  ;;  %v3561_v29 = vld [vmem:[%s6546_s17 + $0x20] sm:$0xff] }
 0x8c0   :  { %v3131_v57 = vpop.f32.mrf.mxu1  ;;  %v4495_v51 = vld [vmem:[%s6546_s17 + $0xd8] sm:$0xff]  ;;  %v4496_v52 = vld [vmem:[%s6546_s17 + $0xe0] sm:$0xff]  ;;  %v3563_v53 = vld [vmem:[%s6546_s17 + $0x30] sm:$0xff] }
 0x8c1   :  { %v3168_v8 = vadd.f32 %v3151_v7, %v3144_v56  ;;  %v3145_v60 = vadd.f32 %v3131_v57, %v3006_v54  ;;  %4450 = vmatprep.mubr.msk.bf16.mxu0 %vm306_vm3, %v3185_v55  ;;  %4453 = vmatprep.mubr.msk.bf16.mxu1 %vm306_vm3, %v3185_v55  ;;  %v3179_v5 = vmax.f32 %v3167_v58, 0.0  ;;  %v4497_v54 = vld [vmem:[%s6546_s17 + $0xe8] sm:$0xff]  ;;  %v3564_v55 = vld [vmem:[%s6546_s17 + $0x38] sm:$0xff]  ;;  %v4498_v56 = vld [vmem:[%s6546_s17 + $0xf0] sm:$0xff] }
 0x8c2   :  { %3480 = vmatmul.mubr.bf16.gmra.mxu0 %v3184_v47  ;;  %3541 = vmatmul.mubr.bf16.gmra.mxu1 %v3184_v47  ;;  %v3565_v57 = vld [vmem:[%s6546_s17 + $0x40] sm:$0xff]  ;;  %v4499_v47 = vld [vmem:[%s6546_s17 + $0xf8] sm:$0xff]  ;;  %v3566_v58 = vld [vmem:[%s6546_s17 + $0x48] sm:$0xff] }
 0x8c3   :  { %v3169_v62 = vadd.f32 %v6157_v63, %v3145_v60  ;;  %v3180_v4 = vmax.f32 %v3168_v8, 0.0  ;;  %v4500_v8 = vld [vmem:[%s6546_s17 + $0x100] sm:$0xff]  ;;  %v3567_v60 = vld [vmem:[%s6546_s17 + $0x50] sm:$0xff]  ;;  %v4501_v48 = vld [vmem:[%s6546_s17 + $0x108] sm:$0xff] }
 0x8c5   :  { %v3181_v50 = vmax.f32 %v3169_v62, 0.0  ;;  %v3186_v10 = vpack.c.bf16 %v3180_v4, %v3178_v6  ;;  %v3568_v62 = vld [vmem:[%s6546_s17 + $0x58] sm:$0xff]  ;;  %v4502_v4 = vld [vmem:[%s6546_s17 + $0x110] sm:$0xff]  ;;  %v4504_v6 = vld [vmem:[%s6546_s17 + $0x120] sm:$0xff] }
 0x8c7   :  { %v3187_v9 = vpack.c.bf16 %v3181_v50, %v3179_v5  ;;  %v3569_v5 = vld [vmem:[%s6546_s17 + $0x60] sm:$0xff]  ;;  %v4503_v50 = vld [vmem:[%s6546_s17 + $0x118] sm:$0xff] }
 0x8c9   :  { %4451 = vmatprep.mubr.msk.bf16.mxu0 %vm306_vm3, %v3187_v9  ;;  %4454 = vmatprep.mubr.msk.bf16.mxu1 %vm306_vm3, %v3187_v9  ;;  %v4505_v9 = vld [vmem:[%s6546_s17 + $0x128] sm:$0xff]  ;;  %vm4151_vm3 = vcmask 394240  }
 0x8ca   :  { %3490 = vmatmul.mubr.bf16.gmra.mxu0 %v3186_v10  ;;  %3549 = vmatmul.mubr.bf16.gmra.mxu1 %v3186_v10  ;;  %v4506_v10 = vld [vmem:[%s6546_s17 + $0x130] sm:$0xff] }
 0x8cb   :  { %4601 = vmatprep.mubr.msk.f32.mxu0 %vm5306_vm0, %v5305_v0  ;;  %4625 = vmatprep.mubr.msk.f32.mxu1 %vm5306_vm0, %v5305_v0 }
 0x97a   :  { %v6178_v7 = vpop.f32.mrf.mxu0  ;;  %v6180_v63 = vpop.f32.mrf.mxu1 }
 0x97c   :  { %v3473_v11 = vpop.f32.mrf.mxu0  ;;  %v3536_v12 = vpop.f32.mrf.mxu1 }
 0x97e   :  { %v6182_v13 = vpop.f32.mrf.mxu0  ;;  %v6184_v14 = vpop.f32.mrf.mxu1 }
 0x980   :  { %v3477_v15 = vpop.f32.mrf.mxu0  ;;  %v3539_v16 = vpop.f32.mrf.mxu1 }
 0x982   :  { %v6186_v17 = vpop.f32.mrf.mxu0  ;;  %v6188_v18 = vpop.f32.mrf.mxu1 }
 0x984   :  { %v3483_v19 = vpop.f32.mrf.mxu0  ;;  %v3544_v61 = vpop.f32.mrf.mxu1 }
 0x986   :  { %v3485_v20 = vpop.f32.mrf.mxu0  ;;  %v3545_v21 = vpop.f32.mrf.mxu1 }
 0x988   :  { %v3487_v22 = vpop.f32.mrf.mxu0  ;;  %v3547_v23 = vpop.f32.mrf.mxu1 }
 0x98a   :  { %v3491_v24 = vpop.f32.mrf.mxu0  ;;  %v3550_v59 = vpop.f32.mrf.mxu1 }
 0x98c   :  { %v3493_v26 = vpop.f32.mrf.mxu0  ;;  %v3552_v27 = vpop.f32.mrf.mxu1 }
 0x98e   :  { %v3495_v30 = vpop.f32.mrf.mxu0  ;;  %v3553_v31 = vpop.f32.mrf.mxu1 }
 0x990   :  { %v3497_v32 = vpop.f32.mrf.mxu0  ;;  %v3555_v33 = vpop.f32.mrf.mxu1 }
 0x991   :  { %4590 = vmatpush3.msra.mxu0 %v3497_v32  ;;  %4748 = vmatpush3.msra.mxu1 %v3497_v32 }
 0x992   :  { %4591 = vmatprep.subr.mxu0 %v5305_v0  ;;  %4743 = vmatprep.subr.mxu1 %v5305_v0 }
 0x993   :  { %4592 = vmatpush3.msra.mxu0 %v3493_v26  ;;  %4749 = vmatpush3.msra.mxu1 %v3493_v26 }
 0x994   :  { %4593 = vmatprep.subr.mxu0 %v5305_v0  ;;  %4744 = vmatprep.subr.mxu1 %v5305_v0 }
 0x995   :  { %4594 = vmatpush3.msra.mxu0 %v3487_v22  ;;  %4750 = vmatpush3.msra.mxu1 %v3487_v22 }
 0x996   :  { %4595 = vmatprep.subr.mxu0 %v5305_v0  ;;  %4745 = vmatprep.subr.mxu1 %v5305_v0 }
 0x997   :  { %4596 = vmatpush3.msra.mxu0 %v3483_v19  ;;  %4751 = vmatpush3.msra.mxu1 %v3483_v19 }
 0x998   :  { %4597 = vmatprep.subr.mxu0 %v5305_v0  ;;  %4746 = vmatprep.subr.mxu1 %v5305_v0 }
 0x999   :  { %4598 = vmatpush3.msra.mxu0 %v3477_v15  ;;  %4752 = vmatpush3.msra.mxu1 %v3477_v15 }
 0x99a   :  { %4599 = vmatprep.subr.mxu0 %v5305_v0  ;;  %4747 = vmatprep.subr.mxu1 %v5305_v0 }
 0x99b   :  { %4600 = vmatpush3.msra.mxu0 %v3473_v11  ;;  %4753 = vmatpush3.msra.mxu1 %v3473_v11 }
 0x99c   :  { %4602 = vmatmul.mubr.msk.f32.vlgmr.msra.gmra.mxu0 %vm1870_vm8, %v4455_v34  ;;  %4626 = vmatmul.mubr.msk.f32.vlgmr.msra.gmra.mxu1 %vm1870_vm8, %v4463_v35 }
 0x99d   :  { %4640 = vmatprep.subr.mxu1 %v5305_v0  ;;  %4691 = vmatprep.subr.mxu0 %v5305_v0 }
 0x99e   :  { %4641 = vmatpush3.msra.mxu1 %v3495_v30  ;;  %4692 = vmatpush3.msra.mxu0 %v3553_v31 }
 0x99f   :  { %4642 = vmatprep.subr.mxu1 %v5305_v0  ;;  %4693 = vmatprep.subr.mxu0 %v5305_v0 }
 0x9a0   :  { %4604 = vmatprep.mubr.msk.f32.mxu0 %vm5306_vm0, %v5305_v0  ;;  %4628 = vmatprep.mubr.msk.f32.mxu1 %vm5306_vm0, %v5305_v0 }
 0x9a1   :  { %4643 = vmatpush3.msra.mxu1 %v3491_v24  ;;  %4694 = vmatpush3.msra.mxu0 %v3550_v59 }
 0x9a2   :  { %4605 = vmatmul.mubr.msk.f32.gmra.mxu0 %vm1870_vm8, %v4456_v36  ;;  %4629 = vmatmul.mubr.msk.f32.gmra.mxu1 %vm1870_vm8, %v4464_v37 }
 0x9a3   :  { %4644 = vmatprep.subr.mxu1 %v5305_v0  ;;  %4695 = vmatprep.subr.mxu0 %v5305_v0 }
 0x9a4   :  { %4645 = vmatpush3.msra.mxu1 %v3485_v20  ;;  %4696 = vmatpush3.msra.mxu0 %v3545_v21 }
 0x9a5   :  { %4646 = vmatprep.subr.mxu1 %v5305_v0  ;;  %4697 = vmatprep.subr.mxu0 %v5305_v0 }
 0x9a6   :  { %4607 = vmatprep.mubr.msk.f32.mxu0 %vm5306_vm0, %v5305_v0  ;;  %4631 = vmatprep.mubr.msk.f32.mxu1 %vm5306_vm0, %v5305_v0 }
 0x9a7   :  { %4647 = vmatpush3.msra.mxu1 %v6186_v17  ;;  %4698 = vmatpush3.msra.mxu0 %v6188_v18 }
 0x9a8   :  { %4608 = vmatmul.mubr.msk.f32.gmra.mxu0 %vm1870_vm8, %v4457_v38  ;;  %4632 = vmatmul.mubr.msk.f32.gmra.mxu1 %vm1870_vm8, %v4465_v39 }
 0x9a9   :  { %4648 = vmatprep.subr.mxu1 %v5305_v0  ;;  %4699 = vmatprep.subr.mxu0 %v5305_v0 }
 0x9aa   :  { %4649 = vmatpush3.msra.mxu1 %v6182_v13  ;;  %4700 = vmatpush3.msra.mxu0 %v6184_v14 }
 0x9ab   :  { %4650 = vmatprep.subr.mxu1 %v5305_v0  ;;  %4701 = vmatprep.subr.mxu0 %v5305_v0 }
 0x9ac   :  { %4610 = vmatprep.mubr.msk.f32.mxu0 %vm5306_vm0, %v5305_v0  ;;  %4634 = vmatprep.mubr.msk.f32.mxu1 %vm5306_vm0, %v5305_v0 }
 0x9ad   :  { %4651 = vmatpush3.msra.mxu1 %v6178_v7  ;;  %4702 = vmatpush3.msra.mxu0 %v6180_v63 }
 0x9ae   :  { %4611 = vmatmul.mubr.msk.f32.gmra.mxu0 %vm1870_vm8, %v4458_v40  ;;  %4635 = vmatmul.mubr.msk.f32.gmra.mxu1 %vm1870_vm8, %v4466_v42 }
 0x9af   :  { %4613 = vmatprep.mubr.msk.f32.mxu0 %vm5306_vm0, %v5305_v0  ;;  %4637 = vmatprep.mubr.msk.f32.mxu1 %vm5306_vm0, %v5305_v0 }
 0x9b2   :  { %4614 = vmatmul.mubr.msk.f32.gmra.mxu0 %vm1870_vm8, %v4459_v43  ;;  %4638 = vmatmul.mubr.msk.f32.gmra.mxu1 %vm1870_vm8, %v4467_v41 }
 0x9b3   :  { %4616 = vmatprep.mubr.msk.f32.mxu0 %vm5306_vm0, %v5305_v0  ;;  %4652 = vmatprep.mubr.msk.f32.mxu1 %vm5306_vm0, %v5305_v0 }
 0x9b6   :  { %4617 = vmatmul.mubr.msk.f32.gmra.mxu0 %vm1870_vm8, %v4460_v44  ;;  %4653 = vmatmul.mubr.msk.f32.vlgmr.msra.gmra.mxu1 %vm1870_vm8, %v3557_v3  ;;  %v6458_v44 = vld [vmem:[#allocation17] ss:$0 sm:$0xff] }
 0x9b7   :  { %4619 = vmatprep.mubr.msk.f32.mxu0 %vm5306_vm0, %v5305_v0  ;;  %4655 = vmatprep.mubr.msk.f32.mxu1 %vm5306_vm0, %v5305_v0 }
 0x9ba   :  { %4620 = vmatmul.mubr.msk.f32.gmra.mxu0 %vm1870_vm8, %v4461_v45  ;;  %4656 = vmatmul.mubr.msk.f32.gmra.mxu1 %vm1870_vm8, %v3558_v1 }
 0x9bb   :  { %4622 = vmatprep.mubr.msk.f32.mxu0 %vm5306_vm0, %v5305_v0  ;;  %4658 = vmatprep.mubr.msk.f32.mxu1 %vm5306_vm0, %v5305_v0 }
 0x9be   :  { %4623 = vmatmul.mubr.msk.f32.gmra.mxu0 %vm1870_vm8, %v4462_v46  ;;  %4659 = vmatmul.mubr.msk.f32.gmra.mxu1 %vm1870_vm8, %v3559_v2 }
 0x9bf   :  { %4661 = vmatprep.mubr.msk.f32.mxu1 %vm5306_vm0, %v5305_v0  ;;  %4703 = vmatprep.mubr.msk.f32.mxu0 %vm5306_vm0, %v5305_v0 }
 0x9c2   :  { %4662 = vmatmul.mubr.msk.f32.gmra.mxu1 %vm1870_vm8, %v3560_v28  ;;  %4704 = vmatmul.mubr.msk.f32.vlgmr.msra.gmra.mxu0 %vm1870_vm8, %v4494_v25 }
 0x9c3   :  { %4664 = vmatprep.mubr.msk.f32.mxu1 %vm5306_vm0, %v5305_v0  ;;  %4706 = vmatprep.mubr.msk.f32.mxu0 %vm5306_vm0, %v5305_v0 }
 0x9c6   :  { %4665 = vmatmul.mubr.msk.f32.gmra.mxu1 %vm1870_vm8, %v3561_v29  ;;  %4707 = vmatmul.mubr.msk.f32.gmra.mxu0 %vm1870_vm8, %v4495_v51 }
 0x9c7   :  { %4667 = vmatprep.mubr.msk.f32.mxu1 %vm5306_vm0, %v5305_v0  ;;  %4709 = vmatprep.mubr.msk.f32.mxu0 %vm5306_vm0, %v5305_v0 }
 0x9ca   :  { %4668 = vmatmul.mubr.msk.f32.gmra.mxu1 %vm1870_vm8, %v3562_v49  ;;  %4710 = vmatmul.mubr.msk.f32.gmra.mxu0 %vm1870_vm8, %v4496_v52 }
 0x9cb   :  { %4670 = vmatprep.mubr.msk.f32.mxu1 %vm5306_vm0, %v5305_v0  ;;  %4712 = vmatprep.mubr.msk.f32.mxu0 %vm5306_vm0, %v5305_v0 }
 0x9ce   :  { %4671 = vmatmul.mubr.msk.f32.gmra.mxu1 %vm1870_vm8, %v3563_v53  ;;  %4713 = vmatmul.mubr.msk.f32.gmra.mxu0 %vm1870_vm8, %v4497_v54 }
 0x9cf   :  { %4673 = vmatprep.mubr.msk.f32.mxu1 %vm5306_vm0, %v5305_v0  ;;  %4715 = vmatprep.mubr.msk.f32.mxu0 %vm5306_vm0, %v5305_v0 }
 0x9d2   :  { %4674 = vmatmul.mubr.msk.f32.gmra.mxu1 %vm1870_vm8, %v3564_v55  ;;  %4716 = vmatmul.mubr.msk.f32.gmra.mxu0 %vm1870_vm8, %v4498_v56 }
 0x9d3   :  { %4676 = vmatprep.mubr.msk.f32.mxu1 %vm5306_vm0, %v5305_v0  ;;  %4718 = vmatprep.mubr.msk.f32.mxu0 %vm5306_vm0, %v5305_v0 }
 0x9d6   :  { %4677 = vmatmul.mubr.msk.f32.gmra.mxu1 %vm1870_vm8, %v3565_v57  ;;  %4719 = vmatmul.mubr.msk.f32.gmra.mxu0 %vm1870_vm8, %v4499_v47 }
 0x9d7   :  { %4679 = vmatprep.mubr.msk.f32.mxu1 %vm5306_vm0, %v5305_v0  ;;  %4721 = vmatprep.mubr.msk.f32.mxu0 %vm5306_vm0, %v5305_v0 }
 0x9da   :  { %4680 = vmatmul.mubr.msk.f32.gmra.mxu1 %vm1870_vm8, %v3566_v58  ;;  %4722 = vmatmul.mubr.msk.f32.gmra.mxu0 %vm1870_vm8, %v4500_v8 }
 0x9db   :  { %4682 = vmatprep.mubr.msk.f32.mxu1 %vm5306_vm0, %v5305_v0  ;;  %4724 = vmatprep.mubr.msk.f32.mxu0 %vm5306_vm0, %v5305_v0 }
 0x9de   :  { %4683 = vmatmul.mubr.msk.f32.gmra.mxu1 %vm1870_vm8, %v3567_v60  ;;  %4725 = vmatmul.mubr.msk.f32.gmra.mxu0 %vm1870_vm8, %v4501_v48 }
 0x9df   :  { %4685 = vmatprep.mubr.msk.f32.mxu1 %vm5306_vm0, %v5305_v0  ;;  %4727 = vmatprep.mubr.msk.f32.mxu0 %vm5306_vm0, %v5305_v0 }
 0x9e2   :  { %4686 = vmatmul.mubr.msk.f32.gmra.mxu1 %vm1870_vm8, %v3568_v62  ;;  %4728 = vmatmul.mubr.msk.f32.gmra.mxu0 %vm1870_vm8, %v4502_v4 }
 0x9e3   :  { %4688 = vmatprep.mubr.msk.f32.mxu1 %vm5306_vm0, %v5305_v0  ;;  %4730 = vmatprep.mubr.msk.f32.mxu0 %vm5306_vm0, %v5305_v0 }
 0x9e6   :  { %4689 = vmatmul.mubr.msk.f32.gmra.mxu1 %vm1870_vm8, %v3569_v5  ;;  %4731 = vmatmul.mubr.msk.f32.gmra.mxu0 %vm1870_vm8, %v4503_v50 }
 0x9e7   :  { %4733 = vmatprep.mubr.msk.f32.mxu0 %vm5306_vm0, %v5305_v0 }
 0x9ea   :  { %4734 = vmatmul.mubr.msk.f32.gmra.mxu0 %vm1870_vm8, %v4504_v6 }
 0x9eb   :  { %4736 = vmatprep.mubr.msk.f32.mxu0 %vm5306_vm0, %v5305_v0 }
 0x9ee   :  { %4737 = vmatmul.mubr.msk.f32.gmra.mxu0 %vm1870_vm8, %v4505_v9 }
 0x9ef   :  { %4739 = vmatprep.mubr.msk.f32.mxu0 %vm5306_vm0, %v5305_v0  ;;  %vm4138_vm0 = vcmask 400384  }
 0x9f2   :  { %4740 = vmatmul.mubr.msk.f32.gmra.mxu0 %vm1870_vm8, %v4506_v10 }
 0xa5c   :  { %v3689_v7 = vpop.f32.mrf.mxu0  ;;  %v6448_v63 = vpop.f32.mrf.mxu1 }
 0xa5e   :  { %v4603_v11 = vpop.f32.mrf.mxu0  ;;  %v4627_v12 = vpop.f32.mrf.mxu1 }
 0xa62   :  { %v3694_v13 = vpop.f32.mrf.mxu0  ;;  %v6450_v14 = vpop.f32.mrf.mxu1 }
 0xa64   :  { %v4606_v15 = vpop.f32.mrf.mxu0  ;;  %v4630_v16 = vpop.f32.mrf.mxu1 }
 0xa68   :  { %v3699_v17 = vpop.f32.mrf.mxu0  ;;  %v6452_v18 = vpop.f32.mrf.mxu1 }
 0xa6a   :  { %v4609_v0 = vpop.f32.mrf.mxu0  ;;  %v4633_v19 = vpop.f32.mrf.mxu1 }
 0xa6e   :  { %v3704_v61 = vpop.f32.mrf.mxu0  ;;  %v6454_v20 = vpop.f32.mrf.mxu1 }
 0xa70   :  { %v4612_v21 = vpop.f32.mrf.mxu0  ;;  %v4636_v22 = vpop.f32.mrf.mxu1 }
 0xa72   :  { %v3709_v23 = vpop.f32.mrf.mxu0  ;;  %v6456_v24 = vpop.f32.mrf.mxu1 }
 0xa74   :  { %v4615_v59 = vpop.f32.mrf.mxu0  ;;  %v4639_v26 = vpop.f32.mrf.mxu1 }
 0xa76   :  { %v3714_v27 = vpop.f32.mrf.mxu0  ;;  %v3858_v30 = vpop.f32.mrf.mxu1 }
 0xa77   :  { %v3859_v42 = vadd.f32 %v3858_v30, %v3689_v7 }
 0xa78   :  { %v4618_v31 = vpop.f32.mrf.mxu0  ;;  %v4654_v32 = vpop.f32.mrf.mxu1 }
 0xa7a   :  { %v3719_v33 = vpop.f32.mrf.mxu0  ;;  %v3863_v34 = vpop.f32.mrf.mxu1 }
 0xa7b   :  { %v3864_v46 = vadd.f32 %v3863_v34, %v3694_v13 }
 0xa7c   :  { %v4621_v35 = vpop.f32.mrf.mxu0  ;;  %v4657_v36 = vpop.f32.mrf.mxu1 }
 0xa7e   :  { %v3724_v37 = vpop.f32.mrf.mxu0  ;;  %v3868_v38 = vpop.f32.mrf.mxu1 }
 0xa7f   :  { %v3869_v52 = vadd.f32 %v3868_v38, %v3699_v17 }
 0xa80   :  { %v4624_v39 = vpop.f32.mrf.mxu0  ;;  %v4660_v40 = vpop.f32.mrf.mxu1 }
 0xa82   :  { %v3873_v43 = vpop.f32.mrf.mxu1  ;;  %v4041_v41 = vpop.f32.mrf.mxu0 }
 0xa83   :  { %v4105_v3 = vadd.f32 %v4041_v41, %v3859_v42  ;;  %v3874_v58 = vadd.f32 %v3873_v43, %v3704_v61 }
 0xa84   :  { %v4663_v45 = vpop.f32.mrf.mxu1  ;;  %v4705_v1 = vpop.f32.mrf.mxu0 }
 0xa85   :  { %v4125_v2 = vadd.f32 %v6458_v44, %v4105_v3 }
 0xa86   :  { %v3878_v28 = vpop.f32.mrf.mxu1  ;;  %v4046_v25 = vpop.f32.mrf.mxu0 }
 0xa87   :  { %4139 = vst.msk [vmem:[%s6548_s19] sm:$0xff] %vm4138_vm0, %v4125_v2  ;;  %v4106_v29 = vadd.f32 %v4046_v25, %v3864_v46  ;;  %v3879_v50 = vadd.f32 %v3878_v28, %v3709_v23 }
 0xa88   :  { %v4666_v51 = vpop.f32.mrf.mxu1  ;;  %v4708_v49 = vpop.f32.mrf.mxu0 }
 0xa89   :  { %v4126_v53 = vadd.f32 %v6458_v44, %v4106_v29 }
 0xa8a   :  { %v3883_v54 = vpop.f32.mrf.mxu1  ;;  %v4051_v55 = vpop.f32.mrf.mxu0 }
 0xa8b   :  { %4140 = vst.msk [vmem:[%s6548_s19 + $0x8] sm:$0xff] %vm4138_vm0, %v4126_v53  ;;  %v4107_v56 = vadd.f32 %v4051_v55, %v3869_v52  ;;  %v3884_v13 = vadd.f32 %v3883_v54, %v3714_v27 }
 0xa8c   :  { %v4669_v57 = vpop.f32.mrf.mxu1  ;;  %v4711_v47 = vpop.f32.mrf.mxu0 }
 0xa8d   :  { %v4127_v8 = vadd.f32 %v6458_v44, %v4107_v56 }
 0xa8e   :  { %v3888_v60 = vpop.f32.mrf.mxu1  ;;  %v4056_v48 = vpop.f32.mrf.mxu0 }
 0xa8f   :  { %4141 = vst.msk [vmem:[%s6548_s19 + $0x10] sm:$0xff] %vm4138_vm0, %v4127_v8  ;;  %v4108_v62 = vadd.f32 %v4056_v48, %v3874_v58  ;;  %v3889_v21 = vadd.f32 %v3888_v60, %v3719_v33 }
 0xa90   :  { %v4672_v4 = vpop.f32.mrf.mxu1  ;;  %v4714_v5 = vpop.f32.mrf.mxu0 }
 0xa91   :  { %v4128_v6 = vadd.f32 %v6458_v44, %v4108_v62 }
 0xa92   :  { %v3893_v9 = vpop.f32.mrf.mxu1  ;;  %v4061_v10 = vpop.f32.mrf.mxu0 }
 0xa93   :  { %4142 = vst.msk [vmem:[%s6548_s19 + $0x18] sm:$0xff] %vm4138_vm0, %v4128_v6  ;;  %v4109_v7 = vadd.f32 %v4061_v10, %v3879_v50  ;;  %v3894_v31 = vadd.f32 %v3893_v9, %v3724_v37 }
 0xa94   :  { %v4675_v11 = vpop.f32.mrf.mxu1  ;;  %v4717_v12 = vpop.f32.mrf.mxu0 }
 0xa95   :  { %v4129_v15 = vadd.f32 %v6458_v44, %v4109_v7 }
 0xa96   :  { %v3898_v16 = vpop.f32.mrf.mxu1  ;;  %v4066_v17 = vpop.f32.mrf.mxu0 }
 0xa97   :  { %4143 = vst.msk [vmem:[%s6548_s19 + $0x20] sm:$0xff] %vm4138_vm0, %v4129_v15  ;;  %v4110_v0 = vadd.f32 %v4066_v17, %v3884_v13  ;;  %v3899_v39 = vadd.f32 %v3898_v16, %v6448_v63 }
 0xa98   :  { %v4678_v19 = vpop.f32.mrf.mxu1  ;;  %v4720_v61 = vpop.f32.mrf.mxu0 }
 0xa99   :  { %v4130_v22 = vadd.f32 %v6458_v44, %v4110_v0 }
 0xa9a   :  { %v3903_v23 = vpop.f32.mrf.mxu1  ;;  %v4071_v59 = vpop.f32.mrf.mxu0 }
 0xa9b   :  { %4144 = vst.msk [vmem:[%s6548_s19 + $0x28] sm:$0xff] %vm4138_vm0, %v4130_v22  ;;  %v4111_v26 = vadd.f32 %v4071_v59, %v3889_v21  ;;  %v3904_v45 = vadd.f32 %v3903_v23, %v6450_v14 }
 0xa9c   :  { %v4681_v27 = vpop.f32.mrf.mxu1  ;;  %v4723_v30 = vpop.f32.mrf.mxu0 }
 0xa9d   :  { %v4131_v32 = vadd.f32 %v6458_v44, %v4111_v26 }
 0xa9e   :  { %v3908_v34 = vpop.f32.mrf.mxu1  ;;  %v4076_v35 = vpop.f32.mrf.mxu0 }
 0xa9f   :  { %4145 = vst.msk [vmem:[%s6548_s19 + $0x30] sm:$0xff] %vm4138_vm0, %v4131_v32  ;;  %v4112_v33 = vadd.f32 %v4076_v35, %v3894_v31  ;;  %v3909_v29 = vadd.f32 %v3908_v34, %v6452_v18 }
 0xaa0   :  { %v4684_v36 = vpop.f32.mrf.mxu1  ;;  %v4726_v38 = vpop.f32.mrf.mxu0 }
 0xaa1   :  { %v4132_v40 = vadd.f32 %v6458_v44, %v4112_v33 }
 0xaa2   :  { %v3913_v42 = vpop.f32.mrf.mxu1  ;;  %v4081_v43 = vpop.f32.mrf.mxu0 }
 0xaa3   :  { %4146 = vst.msk [vmem:[%s6548_s19 + $0x38] sm:$0xff] %vm4138_vm0, %v4132_v40  ;;  %v4113_v37 = vadd.f32 %v4081_v43, %v3899_v39  ;;  %v3914_v53 = vadd.f32 %v3913_v42, %v6454_v20 }
 0xaa4   :  { %v4687_v41 = vpop.f32.mrf.mxu1  ;;  %v4729_v3 = vpop.f32.mrf.mxu0 }
 0xaa5   :  { %v4133_v1 = vadd.f32 %v6458_v44, %v4113_v37 }
 0xaa6   :  { %v3918_v46 = vpop.f32.mrf.mxu1  ;;  %v4086_v2 = vpop.f32.mrf.mxu0 }
 0xaa7   :  { %4147 = vst.msk [vmem:[%s6548_s19 + $0x40] sm:$0xff] %vm4138_vm0, %v4133_v1  ;;  %v4114_v63 = vadd.f32 %v4086_v2, %v3904_v45  ;;  %v3919_v57 = vadd.f32 %v3918_v46, %v6456_v24 }
 0xaa8   :  { %v4732_v28 = vpop.f32.mrf.mxu0  ;;  %v4690_v25 = vpop.f32.mrf.mxu1 }
 0xaa9   :  { %v4134_v51 = vadd.f32 %v6458_v44, %v4114_v63 }
 0xaaa   :  { %v4091_v49 = vpop.f32.mrf.mxu0 }
 0xaab   :  { %4148 = vst.msk [vmem:[%s6548_s19 + $0x48] sm:$0xff] %vm4138_vm0, %v4134_v51  ;;  %v4115_v14 = vadd.f32 %v4091_v49, %v3909_v29 }
 0xaac   :  { %v4735_v52 = vpop.f32.mrf.mxu0 }
 0xaad   :  { %v4135_v54 = vadd.f32 %v6458_v44, %v4115_v14 }
 0xaae   :  { %v4096_v55 = vpop.f32.mrf.mxu0 }
 0xaaf   :  { %4149 = vst.msk [vmem:[%s6548_s19 + $0x50] sm:$0xff] %vm4138_vm0, %v4135_v54  ;;  %v4116_v18 = vadd.f32 %v4096_v55, %v3914_v53 }
 0xab0   :  { %v4738_v56 = vpop.f32.mrf.mxu0 }
 0xab1   :  { %v4136_v47 = vadd.f32 %v6458_v44, %v4116_v18 }
 0xab2   :  { %v4101_v58 = vpop.f32.mrf.mxu0 }
 0xab3   :  { %4150 = vst.msk [vmem:[%s6548_s19 + $0x58] sm:$0xff] %vm4138_vm0, %v4136_v47  ;;  %v4117_v20 = vadd.f32 %v4101_v58, %v3919_v57 }
 0xab4   :  { %v4741_v8 = vpop.f32.mrf.mxu0 }
 0xab5   :  { %v4137_v60 = vadd.f32 %v6458_v44, %v4117_v20 }
 0xab7   :  { %4152 = vst.msk [vmem:[%s6548_s19 + $0x60] sm:$0x3] %vm4151_vm3, %v4137_v60 }
 0xab8   :  { %4157 = vsyncpa [#allocation5], 1 }
 0xab9   :  { %4158 = vsyncpa [#allocation7], 1 }
 0xaba   :  { %4159 = vsyncpa [#allocation10], 1 }
 0xabb   :  { %4160 = vsyncpa [#allocation13], 1 }
 0xabc   :  { %4161 = vsyncpa [#allocation16], 1 }

</bundles_post_ra>
